<compile_context>
chip_gen: v7x
topology: tpu7x:2x2x1
jax: 0.10.0
libtpu: 0.0.40
codegen_flags: <defaults>
</compile_context>

<pallas_src>
import math

import jax
import jax.numpy as jnp
from jax.experimental import pallas as pl
from jax.experimental.pallas import tpu as pltpu

BN_EPS = 1e-5
BN_FOLD = 1.0 / math.sqrt(1.0 + BN_EPS)     # BatchNorm eval-at-init folded scale
LAST_CHANNEL = 1280
NUM_CLASSES = 20
STEM_CIN = 8                                # real input channels (1) zero-padded to 8 lanes

# modified_config used by EfficientNetV2._feature_extractor (version-independent in the ref code)
MODIFIED_CONFIG = [
    [1, 3, 1, 24, 24, 2, True],
    [4, 3, 2, 24, 48, 4, True],
    [4, 3, 2, 48, 64, 4, True],
    [4, 3, 2, 64, 128, 6, False],
    [6, 3, 1, 128, 160, 9, False],
    [6, 3, 2, 160, 256, 15, False],
]

# Tap tables: (plane, dh, dw) per (kh, kw) in row-major order.
#  stride 1: single plane = padded input.
#  stride 2: 4 space-to-depth parity planes; plane = 2*(kh%2)+(kw%2), offset = (kh//2, kw//2).
_TAPS_S1 = tuple((0, kh, kw) for kh in range(3) for kw in range(3))
_TAPS_S2 = tuple((2 * (kh % 2) + (kw % 2), kh // 2, kw // 2)
                 for kh in range(3) for kw in range(3))


def _round_up(x, m):
    return (x + m - 1) // m * m


def _lane_pad(c):
    """Network-wide channel padding to a multiple of 128 (lane-dense stores / full MXU width)."""
    return _round_up(c, 128)


def _tpu_tuning():
    """Generation-aware scoped-VMEM limit and matmul N-tile (safe fallbacks if query fails)."""
    vmem_limit = 32 * 1024 * 1024           # conservative default (safe on v5e/v6e/v7x)
    tn = 256                                # v6e/v7x: 2x256^2 MXU
    try:
        info = pltpu.get_tpu_info()
        cap = getattr(info, "vmem_capacity_bytes", None)
        if cap:
            vmem_limit = min(3 * int(cap) // 4, 100 * 1024 * 1024)
        if "5" in str(getattr(info, "chip_version", "")):
            tn = 128                        # v5e: 4x128^2 MXU -> native 128-wide output tiles
    except Exception:
        pass
    return vmem_limit, tn


VMEM_LIMIT, TN_MATMUL = _tpu_tuning()


def _apply_act(y, act):
    if act == "silu":
        return y * jax.nn.sigmoid(y)
    if act == "sigmoid":
        return jax.nn.sigmoid(y)
    return y


def _space_to_depth(xp):
    """(N, Hp, Wp, C) -> (4, N, Hp//2, Wp//2, C) parity planes (Hp, Wp even)."""
    return jnp.stack([xp[:, a::2, b::2, :] for a in (0, 1) for b in (0, 1)], axis=0)


# ----------------------------------------------------------------------------
# Fused matmul:  Y = act(X @ W + b) [+ residual]   (single K block: K always fits VMEM here)
# ----------------------------------------------------------------------------
def _make_matmul_kernel(act, has_res):
    def kernel(x_ref, w_ref, b_ref, *rest):
        if has_res:
            r_ref, o_ref = rest
        else:
            (o_ref,) = rest
        y = jnp.dot(x_ref[...], w_ref[...], preferred_element_type=jnp.float32) + b_ref[...]
        y = _apply_act(y, act)
        if has_res:
            y = y + r_ref[...].astype(jnp.float32)
        o_ref[...] = y.astype(o_ref.dtype)

    return kernel


_MM_KERNELS = {(a, r): _make_matmul_kernel(a, r)
               for a in ("none", "silu", "sigmoid") for r in (False, True)}


def matmul_fused(x, w, b, act="none", residual=None):
    """MXU matmul with fused bias/activation/residual epilogue; bf16 I/O, f32 accumulation."""
    m, k = x.shape
    n = w.shape[1]
    tm = min(256, _round_up(m, 8))
    tn = min(TN_MATMUL, _round_up(n, 128))
    mp, np_, kp = _round_up(m, tm), _round_up(n, tn), _round_up(k, 128)

    xb = x.astype(jnp.bfloat16)
    if (mp, kp) != (m, k):
        xb = jnp.pad(xb, ((0, mp - m), (0, kp - k)))
    wb = w.astype(jnp.bfloat16)
    if (kp, np_) != (k, n):
        wb = jnp.pad(wb, ((0, kp - k), (0, np_ - n)))
    bb = b.reshape(1, n).astype(jnp.float32)
    if np_ != n:
        bb = jnp.pad(bb, ((0, 0), (0, np_ - n)))

    has_res = residual is not None
    in_specs = [
        pl.BlockSpec((tm, kp), lambda i, j: (i, 0)),
        pl.BlockSpec((kp, tn), lambda i, j: (0, j)),
        pl.BlockSpec((1, tn), lambda i, j: (0, j)),
    ]
    args = [xb, wb, bb]
    if has_res:
        rb = residual.astype(jnp.bfloat16)          # stays bf16; cast happens in the epilogue
        if (mp, np_) != (m, n):
            rb = jnp.pad(rb, ((0, mp - m), (0, np_ - n)))
        in_specs.append(pl.BlockSpec((tm, tn), lambda i, j: (i, j)))
        args.append(rb)

    flops = 2 * mp * np_ * kp
    transcendentals = mp * np_ if act in ("silu", "sigmoid") else 0
    bytes_accessed = (2 * (mp * kp + kp * np_ + mp * np_) + 4 * np_
                      + (2 * mp * np_ if has_res else 0))

    out = pl.pallas_call(
        _MM_KERNELS[(act, has_res)],
        grid_spec=pltpu.PrefetchScalarGridSpec(
            num_scalar_prefetch=0,
            grid=(mp // tm, np_ // tn),
            in_specs=in_specs,
            out_specs=pl.BlockSpec((tm, tn), lambda i, j: (i, j)),
        ),
        out_shape=jax.ShapeDtypeStruct((mp, np_), jnp.bfloat16),
        compiler_params=pltpu.CompilerParams(
            dimension_semantics=("parallel", "parallel"),
            vmem_limit_bytes=VMEM_LIMIT),
        cost_estimate=pl.CostEstimate(flops=flops, transcendentals=transcendentals,
                                      bytes_accessed=bytes_accessed),
    )(*args)
    if (mp, np_) != (m, n):
        out = out[:m, :n]
    return out


# ----------------------------------------------------------------------------
# 3x3 regular conv (stem + FusedMBConv): in-kernel tap accumulation, no im2col
# ----------------------------------------------------------------------------
def _make_conv3x3_kernel(taps, ho, wo, act, has_res, flatten):
    def kernel(x_ref, w_ref, b_ref, *rest):
        if has_res:
            r_ref, o_ref = rest
        else:
            (o_ref,) = rest
        cin = x_ref.shape[-1]
        cout = o_ref.shape[-1]
        bias = b_ref[...]                                    # (1, cout) f32
        if flatten:
            # One MXU matmul per tap on the (Ho*Wo, Cin) flattened window (Wo % 8 == 0).
            acc = jnp.zeros((ho * wo, cout), jnp.float32)
            for t, (p, dh, dw) in enumerate(taps):
                xt = x_ref[p, 0, dh:dh + ho, dw:dw + wo, :].reshape(ho * wo, cin)
                acc = acc + jnp.dot(xt, w_ref[t], preferred_element_type=jnp.float32)
            y = _apply_act(acc + bias, act).reshape(1, ho, wo, cout)
            if has_res:
                y = y + r_ref[...].astype(jnp.float32)
            o_ref[...] = y.astype(o_ref.dtype)
        else:
            # Wo not sublane-aligned (only tiny late-stage spatial): one output row at a time.
            for r in range(ho):
                acc = jnp.zeros((wo, cout), jnp.float32)
                for t, (p, dh, dw) in enumerate(taps):
                    xt = x_ref[p, 0, dh + r, dw:dw + wo, :]  # (wo, cin)
                    acc = acc + jnp.dot(xt, w_ref[t], preferred_element_type=jnp.float32)
                y = _apply_act(acc + bias, act)
                if has_res:
                    y = y + r_ref[0, r].astype(jnp.float32)
                o_ref[0, r] = y.astype(o_ref.dtype)

    return kernel


_CONV_KERNELS = {}


def _get_conv_kernel(key):
    if key not in _CONV_KERNELS:
        _CONV_KERNELS[key] = _make_conv3x3_kernel(*key)
    return _CONV_KERNELS[key]


def conv3x3_bn_act(x, prm, stride, act="silu", residual=None):
    n, h, w_, _ = x.shape
    wgt, bias = prm["w"], prm["b"]          # (9, cin, cout) bf16, (cout,) f32
    cin, cout = wgt.shape[1], wgt.shape[2]
    xb = jnp.pad(x.astype(jnp.bfloat16), ((0, 0), (1, 1), (1, 1), (0, 0)))
    if stride == 1:
        planes, taps, ho, wo = xb[None], _TAPS_S1, h, w_
    else:
        planes, taps = _space_to_depth(xb), _TAPS_S2
        ho, wo = (h - 1) // 2 + 1, (w_ - 1) // 2 + 1
    p_, _, hs, ws, _ = planes.shape
    has_res = residual is not None
    kernel = _get_conv_kernel((taps, ho, wo, act, has_res, wo % 8 == 0))

    in_specs = [
        pl.BlockSpec((p_, 1, hs, ws, cin), lambda i: (0, i, 0, 0, 0)),
        pl.BlockSpec((9, cin, cout), lambda i: (0, 0, 0)),
        pl.BlockSpec((1, cout), lambda i: (0, 0)),
    ]
    args = [planes, wgt, bias.reshape(1, cout)]
    if has_res:
        in_specs.append(pl.BlockSpec((1, ho, wo, cout), lambda i: (i, 0, 0, 0)))
        args.append(residual.astype(jnp.bfloat16))

    return pl.pallas_call(
        kernel,
        grid_spec=pltpu.PrefetchScalarGridSpec(
            num_scalar_prefetch=0, grid=(n,),
            in_specs=in_specs,
            out_specs=pl.BlockSpec((1, ho, wo, cout), lambda i: (i, 0, 0, 0)),
        ),
        out_shape=jax.ShapeDtypeStruct((n, ho, wo, cout), jnp.bfloat16),
        compiler_params=pltpu.CompilerParams(
            dimension_semantics=("parallel",), vmem_limit_bytes=VMEM_LIMIT),
    )(*args)


# ----------------------------------------------------------------------------
# Depthwise 3x3 + BN + SiLU with the ENTIRE Squeeze-Excitation block fused into its epilogue:
#   GAP -> fc1 -> SiLU -> fc2 -> sigmoid -> channel gate, output already gated (bf16)
# ----------------------------------------------------------------------------
def _make_dwse_kernel(taps, ho, wo):
    inv_hw = 1.0 / (ho * wo)

    def kernel(x_ref, w_ref, b_ref, w1_ref, b1_ref, w2_ref, b2_ref, o_ref):
        c = x_ref.shape[-1]
        acc = jnp.zeros((ho, wo, c), jnp.float32)
        for t, (p, dh, dw) in enumerate(taps):
            acc = acc + x_ref[p, 0, dh:dh + ho, dw:dw + wo, :].astype(jnp.float32) * w_ref[t]
        acc = acc + b_ref[...]
        y = acc * jax.nn.sigmoid(acc)                        # SiLU (f32 compute, bf16 store)
        # fused SE: squeeze (GAP) -> excite (fc1, SiLU, fc2, sigmoid) -> gate
        gap = jnp.sum(jnp.sum(y, axis=0), axis=0, keepdims=True) * inv_hw     # (1, c)
        s = jnp.dot(gap, w1_ref[...], preferred_element_type=jnp.float32) + b1_ref[...]
        s = s * jax.nn.sigmoid(s)
        g = jnp.dot(s, w2_ref[...], preferred_element_type=jnp.float32) + b2_ref[...]
        g = jax.nn.sigmoid(g)                                # (1, c) channel gate
        o_ref[0] = (y * g).astype(o_ref.dtype)

    return kernel


_DWSE_KERNELS = {}


def _get_dwse_kernel(key):
    if key not in _DWSE_KERNELS:
        _DWSE_KERNELS[key] = _make_dwse_kernel(*key)
    return _DWSE_KERNELS[key]


def depthwise_se(x, dw, se1, se2, stride):
    n, h, w_, c = x.shape
    xp = jnp.pad(x.astype(jnp.bfloat16), ((0, 0), (1, 1), (1, 1), (0, 0)))
    if stride == 1:
        planes, taps, ho, wo = xp[None], _TAPS_S1, h, w_
    else:
        planes, taps = _space_to_depth(xp), _TAPS_S2
        ho, wo = (h - 1) // 2 + 1, (w_ - 1) // 2 + 1
    p_, _, hs, ws, _ = planes.shape
    red = se1["w"].shape[-1]
    kernel = _get_dwse_kernel((taps, ho, wo))

    return pl.pallas_call(
        kernel,
        grid_spec=pltpu.PrefetchScalarGridSpec(
            num_scalar_prefetch=0, grid=(n,),
            in_specs=[
                pl.BlockSpec((p_, 1, hs, ws, c), lambda i: (0, i, 0, 0, 0)),
                pl.BlockSpec((9, c), lambda i: (0, 0)),
                pl.BlockSpec((1, c), lambda i: (0, 0)),
                pl.BlockSpec((c, red), lambda i: (0, 0)),
                pl.BlockSpec((1, red), lambda i: (0, 0)),
                pl.BlockSpec((red, c), lambda i: (0, 0)),
                pl.BlockSpec((1, c), lambda i: (0, 0)),
            ],
            out_specs=pl.BlockSpec((1, ho, wo, c), lambda i: (i, 0, 0, 0)),
        ),
        out_shape=jax.ShapeDtypeStruct((n, ho, wo, c), jnp.bfloat16),
        compiler_params=pltpu.CompilerParams(
            dimension_semantics=("parallel",), vmem_limit_bytes=VMEM_LIMIT),
    )(planes, dw["w"], dw["b"].reshape(1, c),
      se1["w"], se1["b"].reshape(1, red), se2["w"], se2["b"].reshape(1, c))


# ----------------------------------------------------------------------------
# Head (1x1 conv -> BN -> SiLU) + global-average-pool + classifier Linear, fused per image.
# Dropout is eval-mode identity.
# ----------------------------------------------------------------------------
def _head_classifier_kernel(x_ref, wh_ref, bh_ref, wc_ref, bc_ref, o_ref):
    hw = x_ref.shape[1]
    y = jnp.dot(x_ref[0], wh_ref[...], preferred_element_type=jnp.float32) + bh_ref[...]
    y = y * jax.nn.sigmoid(y)                                          # SiLU, (hw, 1280) f32
    pooled = jnp.sum(y, axis=0, keepdims=True) * (1.0 / hw)            # fused GAP, (1, 1280)
    o_ref[...] = (jnp.dot(pooled, wc_ref[...], preferred_element_type=jnp.float32)
                  + bc_ref[...])


def head_classifier(x, head, cls):
    n, hw, cin = x.shape
    c_last = head["w"].shape[-1]
    ncls = cls["w"].shape[-1]
    return pl.pallas_call(
        _head_classifier_kernel,
        grid_spec=pltpu.PrefetchScalarGridSpec(
            num_scalar_prefetch=0, grid=(n,),
            in_specs=[
                pl.BlockSpec((1, hw, cin), lambda i: (i, 0, 0)),
                pl.BlockSpec((cin, c_last), lambda i: (0, 0)),
                pl.BlockSpec((1, c_last), lambda i: (0, 0)),
                pl.BlockSpec((c_last, ncls), lambda i: (0, 0)),
                pl.BlockSpec((1, ncls), lambda i: (0, 0)),
            ],
            out_specs=pl.BlockSpec((1, ncls), lambda i: (i, 0)),
        ),
        out_shape=jax.ShapeDtypeStruct((n, ncls), jnp.float32),
        compiler_params=pltpu.CompilerParams(
            dimension_semantics=("parallel",), vmem_limit_bytes=VMEM_LIMIT),
    )(x.astype(jnp.bfloat16), head["w"], head["b"].reshape(1, c_last),
      cls["w"], cls["b"].reshape(1, ncls))


# ----------------------------------------------------------------------------
# Parameter initialization (deterministic, synthetic; BN folded for eval; channels lane-padded).
# Padded channels carry exact zeros through every conv / SiLU / residual / SE path.
# ----------------------------------------------------------------------------
def _init_conv3x3(keys, cin, cout, cin_store, cout_store):
    w = jax.random.normal(next(keys), (3, 3, cin, cout), jnp.float32) / math.sqrt(9 * cin)
    w = jnp.pad(w * BN_FOLD, ((0, 0), (0, 0), (0, cin_store - cin), (0, cout_store - cout)))
    return {"w": w.reshape(9, cin_store, cout_store).astype(jnp.bfloat16),
            "b": jnp.zeros((cout_store,), jnp.float32)}


def _init_conv1x1(keys, cin, cout, cin_store, cout_store):
    w = jax.random.normal(next(keys), (cin, cout), jnp.float32) / math.sqrt(cin)
    w = jnp.pad(w * BN_FOLD, ((0, cin_store - cin), (0, cout_store - cout)))
    return {"w": w.astype(jnp.bfloat16), "b": jnp.zeros((cout_store,), jnp.float32)}


def _init_fc(keys, cin, cout, cin_store=None, cout_store=None):   # SE convs / classifier: bias
    cin_store = cin if cin_store is None else cin_store
    cout_store = cout if cout_store is None else cout_store
    w = jax.random.normal(next(keys), (cin, cout), jnp.float32) / math.sqrt(cin)
    b = jax.random.normal(next(keys), (cout,), jnp.float32) * 0.01
    w = jnp.pad(w, ((0, cin_store - cin), (0, cout_store - cout)))
    b = jnp.pad(b, ((0, cout_store - cout),))
    return {"w": w, "b": b}


def _init_dw(keys, c, c_store):
    w = jax.random.normal(next(keys), (3, 3, c), jnp.float32) / 3.0
    w = jnp.pad(w * BN_FOLD, ((0, 0), (0, 0), (0, c_store - c)))
    return {"w": w.reshape(9, c_store), "b": jnp.zeros((c_store,), jnp.float32)}


def init_params(key):
    keys = iter(jax.random.split(key, 512))
    params = {"stem": _init_conv3x3(keys, 1, MODIFIED_CONFIG[0][3],
                                    cin_store=STEM_CIN,
                                    cout_store=_lane_pad(MODIFIED_CONFIG[0][3]))}
    blocks = []
    for e, k, s, n_in, n_out, n_layers, fused in MODIFIED_CONFIG:
        for r in range(n_layers):
            cin = n_in if r == 0 else n_out
            stride = s if r == 0 else 1
            expanded = e * cin
            cin_p, cout_p, cexp_p = _lane_pad(cin), _lane_pad(n_out), _lane_pad(expanded)
            use_res = (cin == n_out) and (stride == 1)
            if fused:
                blk = {"type": "fused", "stride": stride, "use_residual": use_res,
                       "conv": _init_conv3x3(keys, cin, expanded, cin_p, cexp_p)}
                if e != 1:
                    blk["pw"] = _init_conv1x1(keys, expanded, n_out, cexp_p, cout_p)
            else:
                reduced = cin // 4
                blk = {"type": "mb", "stride": stride, "use_residual": use_res,
                       "expand": _init_conv1x1(keys, cin, expanded, cin_p, cexp_p),
                       "dw": _init_dw(keys, expanded, cexp_p),
                       "se1": _init_fc(keys, expanded, reduced, cin_store=cexp_p),
                       "se2": _init_fc(keys, reduced, expanded, cout_store=cexp_p),
                       "pw": _init_conv1x1(keys, expanded, n_out, cexp_p, cout_p)}
            blocks.append(blk)
    params["blocks"] = blocks
    params["head"] = _init_conv1x1(keys, MODIFIED_CONFIG[-1][4], LAST_CHANNEL,
                                   _lane_pad(MODIFIED_CONFIG[-1][4]), LAST_CHANNEL)
    params["classifier"] = _init_fc(keys, LAST_CHANNEL, NUM_CLASSES)
    return params


# ----------------------------------------------------------------------------
# Forward pass
# ----------------------------------------------------------------------------
def forward(params, x_nchw):
    x = jnp.transpose(x_nchw, (0, 2, 3, 1))                               # NCHW -> NHWC
    x = jnp.pad(x, ((0, 0), (0, 0), (0, 0), (0, STEM_CIN - x.shape[-1])))   # 1 -> 8 lanes
    x = x.astype(jnp.bfloat16)

    # stem: Conv(1 -> 24, k3, s1, p1) + BN + SiLU
    x = conv3x3_bn_act(x, params["stem"], stride=1, act="silu")

    for blk in params["blocks"]:
        residual = x
        n, h, w_, c = x.shape
        if blk["type"] == "fused":
            if "pw" in blk:
                x = conv3x3_bn_act(x, blk["conv"], blk["stride"], act="silu")
                n2, h2, w2, cexp = x.shape
                cout = blk["pw"]["w"].shape[-1]
                res = (residual.reshape(n2 * h2 * w2, cout)
                       if blk["use_residual"] else None)
                x = matmul_fused(x.reshape(n2 * h2 * w2, cexp),
                                 blk["pw"]["w"], blk["pw"]["b"],
                                 act="none", residual=res).reshape(n2, h2, w2, cout)
            else:  # expansion == 1: pointwise conv is Identity; residual fused into the conv
                res = residual if blk["use_residual"] else None
                x = conv3x3_bn_act(x, blk["conv"], blk["stride"], act="silu", residual=res)
        else:  # MBConv: expand (1x1) -> depthwise+SE (fused) -> project (1x1, + residual)
            cexp = blk["expand"]["w"].shape[-1]
            xe = matmul_fused(x.reshape(n * h * w_, c),
                              blk["expand"]["w"], blk["expand"]["b"],
                              act="silu").reshape(n, h, w_, cexp)
            xd = depthwise_se(xe, blk["dw"], blk["se1"], blk["se2"], blk["stride"])
            n2, h2, w2, _ = xd.shape
            cout = blk["pw"]["w"].shape[-1]
            res = (residual.reshape(n2 * h2 * w2, cout)
                   if blk["use_residual"] else None)
            x = matmul_fused(xd.reshape(n2 * h2 * w2, cexp),
                             blk["pw"]["w"], blk["pw"]["b"],
                             act="none", residual=res).reshape(n2, h2, w2, cout)

    # head Conv(256 -> 1280, k1) + BN + SiLU, AdaptiveAvgPool(1), Flatten, Dropout(eval), Linear
    n, h, w_, c = x.shape
    logits = head_classifier(x.reshape(n, h * w_, c),
                             params["head"], params["classifier"])
    return logits[:, :NUM_CLASSES]


if __name__ == "__main__":
    root = jax.random.PRNGKey(0)
    pkey, xkey = jax.random.split(root)
    params = init_params(pkey)
    # EfficientNetV2 stem here is Conv2d(1, 24, ...): single-channel NCHW input
    x = jax.random.normal(xkey, (2, 1, 16, 16), jnp.float32)
    logits = forward(params, x)
    logits = jax.block_until_ready(logits)
    assert logits.shape == (2, NUM_CLASSES), logits.shape
    assert bool(jnp.all(jnp.isfinite(logits)))
    print("KERNEL_OK")
</pallas_src>

<mosaic_0001>
module attributes {stable_mosaic.version = 11 : i64} {
  func.func @kernel(%arg0: i32, %arg1: memref<1x1x18x18x8xbf16, #tpu.memory_space<vmem>>, %arg2: memref<9x8x128xbf16, #tpu.memory_space<vmem>>, %arg3: memref<1x128xf32, #tpu.memory_space<vmem>>, %arg4: memref<1x16x16x128xbf16, #tpu.memory_space<vmem>>) attributes {dimension_semantics = [#tpu.dimension_semantics<parallel>], iteration_bounds = array<i64: 2>, scalar_prefetch = 0 : i64, scratch_operands = 0 : i64, tpu.core_type = #tpu.core_type<tc>, window_params = [{transform_indices = @transform_0, window_bounds = array<i64: 1, 1, 18, 18, 8>}, {pipeline_mode = #tpu.pipeline_mode<synchronous>, transform_indices = @transform_1, window_bounds = array<i64: 9, 8, 128>}, {pipeline_mode = #tpu.pipeline_mode<synchronous>, transform_indices = @transform_2, window_bounds = array<i64: 1, 128>}, {transform_indices = @transform_3, window_bounds = array<i64: 1, 16, 16, 128>}]} {
    %c0 = arith.constant 0 : index
    %c0_0 = arith.constant 0 : index
    %0 = vector.load %arg3[%c0, %c0_0] : memref<1x128xf32, #tpu.memory_space<vmem>>, vector<1x128xf32>
    %cst = arith.constant 0.000000e+00 : f32
    %1 = vector.broadcast %cst : f32 to vector<256x128xf32>
    %c0_1 = arith.constant 0 : index
    %c0_2 = arith.constant 0 : index
    %c0_3 = arith.constant 0 : index
    %c0_4 = arith.constant 0 : index
    %c0_5 = arith.constant 0 : index
    %2 = vector.load %arg1[%c0_1, %c0_2, %c0_3, %c0_4, %c0_5] : memref<1x1x18x18x8xbf16, #tpu.memory_space<vmem>>, vector<1x1x16x16x8xbf16>
    %3 = vector.shape_cast %2 : vector<1x1x16x16x8xbf16> to vector<16x16x8xbf16>
    %4 = vector.shape_cast %3 : vector<16x16x8xbf16> to vector<256x8xbf16>
    %c0_6 = arith.constant 0 : index
    %c0_7 = arith.constant 0 : index
    %c0_8 = arith.constant 0 : index
    %5 = vector.load %arg2[%c0_6, %c0_7, %c0_8] : memref<9x8x128xbf16, #tpu.memory_space<vmem>>, vector<1x8x128xbf16>
    %6 = vector.shape_cast %5 : vector<1x8x128xbf16> to vector<8x128xbf16>
    %cst_9 = arith.constant dense<0.000000e+00> : vector<256x128xf32>
    %7 = tpu.matmul %4, %6, %cst_9 {dimension_numbers = #tpu.dot_dimension_numbers<[1], [0], [0], [1], [0, 0, 1, 1], [], []>} : vector<256x8xbf16>, vector<8x128xbf16>, vector<256x128xf32> -> vector<256x128xf32>
    %8 = arith.addf %1, %7 : vector<256x128xf32>
    %c0_10 = arith.constant 0 : index
    %c0_11 = arith.constant 0 : index
    %c0_12 = arith.constant 0 : index
    %c1 = arith.constant 1 : index
    %c0_13 = arith.constant 0 : index
    %9 = vector.load %arg1[%c0_10, %c0_11, %c0_12, %c1, %c0_13] : memref<1x1x18x18x8xbf16, #tpu.memory_space<vmem>>, vector<1x1x16x16x8xbf16>
    %10 = vector.shape_cast %9 : vector<1x1x16x16x8xbf16> to vector<16x16x8xbf16>
    %11 = vector.shape_cast %10 : vector<16x16x8xbf16> to vector<256x8xbf16>
    %c1_14 = arith.constant 1 : index
    %c0_15 = arith.constant 0 : index
    %c0_16 = arith.constant 0 : index
    %12 = vector.load %arg2[%c1_14, %c0_15, %c0_16] : memref<9x8x128xbf16, #tpu.memory_space<vmem>>, vector<1x8x128xbf16>
    %13 = vector.shape_cast %12 : vector<1x8x128xbf16> to vector<8x128xbf16>
    %cst_17 = arith.constant dense<0.000000e+00> : vector<256x128xf32>
    %14 = tpu.matmul %11, %13, %cst_17 {dimension_numbers = #tpu.dot_dimension_numbers<[1], [0], [0], [1], [0, 0, 1, 1], [], []>} : vector<256x8xbf16>, vector<8x128xbf16>, vector<256x128xf32> -> vector<256x128xf32>
    %15 = arith.addf %8, %14 : vector<256x128xf32>
    %c0_18 = arith.constant 0 : index
    %c0_19 = arith.constant 0 : index
    %c0_20 = arith.constant 0 : index
    %c2 = arith.constant 2 : index
    %c0_21 = arith.constant 0 : index
    %16 = vector.load %arg1[%c0_18, %c0_19, %c0_20, %c2, %c0_21] : memref<1x1x18x18x8xbf16, #tpu.memory_space<vmem>>, vector<1x1x16x16x8xbf16>
    %17 = vector.shape_cast %16 : vector<1x1x16x16x8xbf16> to vector<16x16x8xbf16>
    %18 = vector.shape_cast %17 : vector<16x16x8xbf16> to vector<256x8xbf16>
    %c2_22 = arith.constant 2 : index
    %c0_23 = arith.constant 0 : index
    %c0_24 = arith.constant 0 : index
    %19 = vector.load %arg2[%c2_22, %c0_23, %c0_24] : memref<9x8x128xbf16, #tpu.memory_space<vmem>>, vector<1x8x128xbf16>
    %20 = vector.shape_cast %19 : vector<1x8x128xbf16> to vector<8x128xbf16>
    %cst_25 = arith.constant dense<0.000000e+00> : vector<256x128xf32>
    %21 = tpu.matmul %18, %20, %cst_25 {dimension_numbers = #tpu.dot_dimension_numbers<[1], [0], [0], [1], [0, 0, 1, 1], [], []>} : vector<256x8xbf16>, vector<8x128xbf16>, vector<256x128xf32> -> vector<256x128xf32>
    %22 = arith.addf %15, %21 : vector<256x128xf32>
    %c0_26 = arith.constant 0 : index
    %c0_27 = arith.constant 0 : index
    %c1_28 = arith.constant 1 : index
    %c0_29 = arith.constant 0 : index
    %c0_30 = arith.constant 0 : index
    %23 = vector.load %arg1[%c0_26, %c0_27, %c1_28, %c0_29, %c0_30] : memref<1x1x18x18x8xbf16, #tpu.memory_space<vmem>>, vector<1x1x16x16x8xbf16>
    %24 = vector.shape_cast %23 : vector<1x1x16x16x8xbf16> to vector<16x16x8xbf16>
    %25 = vector.shape_cast %24 : vector<16x16x8xbf16> to vector<256x8xbf16>
    %c3 = arith.constant 3 : index
    %c0_31 = arith.constant 0 : index
    %c0_32 = arith.constant 0 : index
    %26 = vector.load %arg2[%c3, %c0_31, %c0_32] : memref<9x8x128xbf16, #tpu.memory_space<vmem>>, vector<1x8x128xbf16>
    %27 = vector.shape_cast %26 : vector<1x8x128xbf16> to vector<8x128xbf16>
    %cst_33 = arith.constant dense<0.000000e+00> : vector<256x128xf32>
    %28 = tpu.matmul %25, %27, %cst_33 {dimension_numbers = #tpu.dot_dimension_numbers<[1], [0], [0], [1], [0, 0, 1, 1], [], []>} : vector<256x8xbf16>, vector<8x128xbf16>, vector<256x128xf32> -> vector<256x128xf32>
    %29 = arith.addf %22, %28 : vector<256x128xf32>
    %c0_34 = arith.constant 0 : index
    %c0_35 = arith.constant 0 : index
    %c1_36 = arith.constant 1 : index
    %c1_37 = arith.constant 1 : index
    %c0_38 = arith.constant 0 : index
    %30 = vector.load %arg1[%c0_34, %c0_35, %c1_36, %c1_37, %c0_38] : memref<1x1x18x18x8xbf16, #tpu.memory_space<vmem>>, vector<1x1x16x16x8xbf16>
    %31 = vector.shape_cast %30 : vector<1x1x16x16x8xbf16> to vector<16x16x8xbf16>
    %32 = vector.shape_cast %31 : vector<16x16x8xbf16> to vector<256x8xbf16>
    %c4 = arith.constant 4 : index
    %c0_39 = arith.constant 0 : index
    %c0_40 = arith.constant 0 : index
    %33 = vector.load %arg2[%c4, %c0_39, %c0_40] : memref<9x8x128xbf16, #tpu.memory_space<vmem>>, vector<1x8x128xbf16>
    %34 = vector.shape_cast %33 : vector<1x8x128xbf16> to vector<8x128xbf16>
    %cst_41 = arith.constant dense<0.000000e+00> : vector<256x128xf32>
    %35 = tpu.matmul %32, %34, %cst_41 {dimension_numbers = #tpu.dot_dimension_numbers<[1], [0], [0], [1], [0, 0, 1, 1], [], []>} : vector<256x8xbf16>, vector<8x128xbf16>, vector<256x128xf32> -> vector<256x128xf32>
    %36 = arith.addf %29, %35 : vector<256x128xf32>
    %c0_42 = arith.constant 0 : index
    %c0_43 = arith.constant 0 : index
    %c1_44 = arith.constant 1 : index
    %c2_45 = arith.constant 2 : index
    %c0_46 = arith.constant 0 : index
    %37 = vector.load %arg1[%c0_42, %c0_43, %c1_44, %c2_45, %c0_46] : memref<1x1x18x18x8xbf16, #tpu.memory_space<vmem>>, vector<1x1x16x16x8xbf16>
    %38 = vector.shape_cast %37 : vector<1x1x16x16x8xbf16> to vector<16x16x8xbf16>
    %39 = vector.shape_cast %38 : vector<16x16x8xbf16> to vector<256x8xbf16>
    %c5 = arith.constant 5 : index
    %c0_47 = arith.constant 0 : index
    %c0_48 = arith.constant 0 : index
    %40 = vector.load %arg2[%c5, %c0_47, %c0_48] : memref<9x8x128xbf16, #tpu.memory_space<vmem>>, vector<1x8x128xbf16>
    %41 = vector.shape_cast %40 : vector<1x8x128xbf16> to vector<8x128xbf16>
    %cst_49 = arith.constant dense<0.000000e+00> : vector<256x128xf32>
    %42 = tpu.matmul %39, %41, %cst_49 {dimension_numbers = #tpu.dot_dimension_numbers<[1], [0], [0], [1], [0, 0, 1, 1], [], []>} : vector<256x8xbf16>, vector<8x128xbf16>, vector<256x128xf32> -> vector<256x128xf32>
    %43 = arith.addf %36, %42 : vector<256x128xf32>
    %c0_50 = arith.constant 0 : index
    %c0_51 = arith.constant 0 : index
    %c2_52 = arith.constant 2 : index
    %c0_53 = arith.constant 0 : index
    %c0_54 = arith.constant 0 : index
    %44 = vector.load %arg1[%c0_50, %c0_51, %c2_52, %c0_53, %c0_54] : memref<1x1x18x18x8xbf16, #tpu.memory_space<vmem>>, vector<1x1x16x16x8xbf16>
    %45 = vector.shape_cast %44 : vector<1x1x16x16x8xbf16> to vector<16x16x8xbf16>
    %46 = vector.shape_cast %45 : vector<16x16x8xbf16> to vector<256x8xbf16>
    %c6 = arith.constant 6 : index
    %c0_55 = arith.constant 0 : index
    %c0_56 = arith.constant 0 : index
    %47 = vector.load %arg2[%c6, %c0_55, %c0_56] : memref<9x8x128xbf16, #tpu.memory_space<vmem>>, vector<1x8x128xbf16>
    %48 = vector.shape_cast %47 : vector<1x8x128xbf16> to vector<8x128xbf16>
    %cst_57 = arith.constant dense<0.000000e+00> : vector<256x128xf32>
    %49 = tpu.matmul %46, %48, %cst_57 {dimension_numbers = #tpu.dot_dimension_numbers<[1], [0], [0], [1], [0, 0, 1, 1], [], []>} : vector<256x8xbf16>, vector<8x128xbf16>, vector<256x128xf32> -> vector<256x128xf32>
    %50 = arith.addf %43, %49 : vector<256x128xf32>
    %c0_58 = arith.constant 0 : index
    %c0_59 = arith.constant 0 : index
    %c2_60 = arith.constant 2 : index
    %c1_61 = arith.constant 1 : index
    %c0_62 = arith.constant 0 : index
    %51 = vector.load %arg1[%c0_58, %c0_59, %c2_60, %c1_61, %c0_62] : memref<1x1x18x18x8xbf16, #tpu.memory_space<vmem>>, vector<1x1x16x16x8xbf16>
    %52 = vector.shape_cast %51 : vector<1x1x16x16x8xbf16> to vector<16x16x8xbf16>
    %53 = vector.shape_cast %52 : vector<16x16x8xbf16> to vector<256x8xbf16>
    %c7 = arith.constant 7 : index
    %c0_63 = arith.constant 0 : index
    %c0_64 = arith.constant 0 : index
    %54 = vector.load %arg2[%c7, %c0_63, %c0_64] : memref<9x8x128xbf16, #tpu.memory_space<vmem>>, vector<1x8x128xbf16>
    %55 = vector.shape_cast %54 : vector<1x8x128xbf16> to vector<8x128xbf16>
    %cst_65 = arith.constant dense<0.000000e+00> : vector<256x128xf32>
    %56 = tpu.matmul %53, %55, %cst_65 {dimension_numbers = #tpu.dot_dimension_numbers<[1], [0], [0], [1], [0, 0, 1, 1], [], []>} : vector<256x8xbf16>, vector<8x128xbf16>, vector<256x128xf32> -> vector<256x128xf32>
    %57 = arith.addf %50, %56 : vector<256x128xf32>
    %c0_66 = arith.constant 0 : index
    %c0_67 = arith.constant 0 : index
    %c2_68 = arith.constant 2 : index
    %c2_69 = arith.constant 2 : index
    %c0_70 = arith.constant 0 : index
    %58 = vector.load %arg1[%c0_66, %c0_67, %c2_68, %c2_69, %c0_70] : memref<1x1x18x18x8xbf16, #tpu.memory_space<vmem>>, vector<1x1x16x16x8xbf16>
    %59 = vector.shape_cast %58 : vector<1x1x16x16x8xbf16> to vector<16x16x8xbf16>
    %60 = vector.shape_cast %59 : vector<16x16x8xbf16> to vector<256x8xbf16>
    %c8 = arith.constant 8 : index
    %c0_71 = arith.constant 0 : index
    %c0_72 = arith.constant 0 : index
    %61 = vector.load %arg2[%c8, %c0_71, %c0_72] : memref<9x8x128xbf16, #tpu.memory_space<vmem>>, vector<1x8x128xbf16>
    %62 = vector.shape_cast %61 : vector<1x8x128xbf16> to vector<8x128xbf16>
    %cst_73 = arith.constant dense<0.000000e+00> : vector<256x128xf32>
    %63 = tpu.matmul %60, %62, %cst_73 {dimension_numbers = #tpu.dot_dimension_numbers<[1], [0], [0], [1], [0, 0, 1, 1], [], []>} : vector<256x8xbf16>, vector<8x128xbf16>, vector<256x128xf32> -> vector<256x128xf32>
    %64 = arith.addf %57, %63 : vector<256x128xf32>
    %65 = vector.broadcast %0 : vector<1x128xf32> to vector<256x128xf32>
    %66 = arith.addf %64, %65 : vector<256x128xf32>
    %67 = arith.negf %66 : vector<256x128xf32>
    %68 = math.exp %67 : vector<256x128xf32>
    %cst_74 = arith.constant 1.000000e+00 : f32
    %69 = vector.broadcast %cst_74 : f32 to vector<256x128xf32>
    %70 = arith.addf %69, %68 : vector<256x128xf32>
    %71 = arith.divf %69, %70 : vector<256x128xf32>
    %72 = arith.mulf %66, %71 : vector<256x128xf32>
    %73 = vector.shape_cast %72 : vector<256x128xf32> to vector<1x16x16x128xf32>
    %74 = arith.truncf %73 : vector<1x16x16x128xf32> to vector<1x16x16x128xbf16>
    %c0_75 = arith.constant 0 : index
    %c0_76 = arith.constant 0 : index
    %c0_77 = arith.constant 0 : index
    %c0_78 = arith.constant 0 : index
    %75 = vector.load %arg4[%c0_75, %c0_76, %c0_77, %c0_78] : memref<1x16x16x128xbf16, #tpu.memory_space<vmem>>, vector<1x16x16x128xbf16>
    tpu.vector_store %arg4[%c0_75, %c0_76, %c0_77, %c0_78], %74 {strides = array<i32>} : memref<1x16x16x128xbf16, #tpu.memory_space<vmem>>, vector<1x16x16x128xbf16>,
    return
  }
  func.func @transform_0(%arg0: i32) -> (i32, i32, i32, i32, i32) {
    %c0_i32 = arith.constant 0 : i32
    %c0_i32_0 = arith.constant 0 : i32
    %c0_i32_1 = arith.constant 0 : i32
    %c0_i32_2 = arith.constant 0 : i32
    %c0_i32_3 = arith.constant 0 : i32
    return %c0_i32, %arg0, %c0_i32_0, %c0_i32_1, %c0_i32_2 : i32, i32, i32, i32, i32
  }
  func.func @transform_1(%arg0: i32) -> (i32, i32, i32) {
    %c0_i32 = arith.constant 0 : i32
    %c0_i32_0 = arith.constant 0 : i32
    %c0_i32_1 = arith.constant 0 : i32
    %c0_i32_2 = arith.constant 0 : i32
    return %c0_i32, %c0_i32_0, %c0_i32_1 : i32, i32, i32
  }
  func.func @transform_2(%arg0: i32) -> (i32, i32) {
    %c0_i32 = arith.constant 0 : i32
    %c0_i32_0 = arith.constant 0 : i32
    %c0_i32_1 = arith.constant 0 : i32
    return %c0_i32, %c0_i32_0 : i32, i32
  }
  func.func @transform_3(%arg0: i32) -> (i32, i32, i32, i32) {
    %c0_i32 = arith.constant 0 : i32
    %c0_i32_0 = arith.constant 0 : i32
    %c0_i32_1 = arith.constant 0 : i32
    %c0_i32_2 = arith.constant 0 : i32
    return %arg0, %c0_i32, %c0_i32_0, %c0_i32_1 : i32, i32, i32, i32
  }
}

</mosaic_0001>

<bundles_post_ra>
// kernel: tpu_custom_call.1
= control target key start
LH: loop header
LB: loop body
LE: loop exit
PB: predicated region body
PF: predicated region fallthrough
CT: control target
= control target key end

     0   :  { %8 = vsyncpa [#allocation3], 0  ;;  %s9063_s0 = inlined_call_operand.vmem [shape: bf16[1,2,18,18,8], index: 0, kind: input, shape index: {}]   ;;  %s9064_s1 = inlined_call_operand.vmem [shape: bf16[9,8,128], index: 1, kind: input, shape index: {}]   ;;  %s9065_s2 = inlined_call_operand.vmem [shape: f32[1,128], index: 2, kind: input, shape index: {}]   ;;  %s9066_s3 = inlined_call_operand.hbm [shape: bf16[2,16,16,128], index: 3, kind: output, shape index: {}]  }
   0x1   :  { %10 = vsyncpa [#allocation3 + $0x1], 0  ;;  %s7057_s12 = smov 0   ;;  %s7059_s13 = smov 0  }
   0x2   :  { %s7061_s14 = smov 0   ;;  %s7063_s15 = smov 0  }
   0x3 LB: > { %s7078_s16 = sadd.s32 4294967295, %s7032_s15   ;;  %s5228_s17 = sadd.s32 4294967294, %s7032_s15   ;;  %s7032_s15 = sphi %s7063_s15, %s9139_s15   ;;  %s7028_s14 = sphi %s7061_s14, %s9138_s14   ;;  %s7024_s13 = sphi %s7059_s13, %s9137_s13   ;;  %s7020_s12 = sphi %s7057_s12, %s9136_s12  }
   0x4   : > { %s7082_s18 = sadd.s32 1, %s7032_s15   ;;  %s91_s19 = sadd.s32 1, %s7028_s14 }
   0x5   : > { %s88_s20 = ssub.s32 %s7032_s15, %s7082_s18  ;;  %p101_p0 = scmp.ne.s32.totalorder %s7028_s14, %s7024_s13 }
   0x6   : > { %p89_p1 = scmp.eq.s32.totalorder %s88_s20, 0  ;;  %p102_p2 = scmp.eq.s32.totalorder %s7078_s16, 1 }
   0x7   : > { %p107_p3 = scmp.ne.s32.totalorder %s7024_s13, %s7020_s12  ;;  %p108_p4 = scmp.eq.s32.totalorder %s5228_s17, 1 }
   0x8   : > { %s7093_s21 = scalar_select %p89_p1, %s7028_s14, %s91_s19  }
   0x9   : > { %p7095_p5 = por %p102_p2, %p101_p0  ;;  %p7099_p6 = por %p108_p4, %p107_p3 }
   0xa   : > { %p5231_p7 = scmp.ge.s32.totalorder %s7032_s15, 1  ;;  %p140_p8 = scmp.lt.s32.totalorder %s7032_s15, 3 }
   0xc   : > { %p141_p9 = pnand %p5231_p7, %p140_p8 }
   0xe   : > { %144 = sbr.rel (%p141_p9) target bundleno = 642 (0x282), region = 32 }
  0x15   : > { %v5234_v0 = vld [vmem:[%s9064_s1 + $0x4] sm:$0xf]  ;;  %vm706_vm0 = vcmask 1043456   ;;  %v5461_v1 = vld [vmem:[%s9064_s1 + $0x10] sm:$0xf]  ;;  %p164_p10 = scmp.lt.s32.totalorder %s7078_s16, 1 }
  0x16   : > { %6685 = vmatprep.subr.msk.bf16.mxu1 %vm706_vm0, %v5234_v0  ;;  %6689 = vmatprep.subr.msk.bf16.mxu0 %vm706_vm0, %v5461_v1  ;;  %v708_v2 = vsel %vm706_vm0, %v5234_v0, 0  ;;  %v7116_v3 = vsel %vm706_vm0, %v5461_v1, 0  ;;  %v203_v4 = vld [vmem:[%s9064_s1] sm:$0xf]  ;;  %v5526_v5 = vld [vmem:[%s9064_s1 + $0x14] sm:$0xf] }
  0x17   : > { %9082 = vst [vmem:[#allocation5_spill] sm:$0xff] %v7116_v3  ;;  %6122 = vmatpush3.bf16.msra.mxu1 %v708_v2  ;;  %6258 = vmatpush3.bf16.msra.mxu0 %v7116_v3  ;;  %s165_s28 = scalar_select %p164_p10, %s7078_s16, 1  ;;  %vm220_vm1 = vsmask.f32 3328  ;;  %vm221_vm2 = vsmask.f32 7440 }
  0x18   : > { %6686 = vmatprep.subr.msk.bf16.mxu1 %vm706_vm0, %v203_v4  ;;  %6691 = vmatprep.subr.msk.bf16.mxu0 %vm706_vm0, %v5526_v5  ;;  %vm657_vm3 = vcmask 64512   ;;  %v7144_v17 = vsel %vm706_vm0, %v203_v4, 0  ;;  %v7150_v26 = vld [vmem:[%s9064_s1 + $0x18] sm:$0xf]  ;;  %vm7157_vm4 = vmor %vm220_vm1, %vm221_vm2  ;;  %v7163_v37 = vsel %vm706_vm0, %v5526_v5, 0  ;;  %vm1211_vm5 = vcmask 1042432  }
  0x19   : > { %s6695_s6 = smul.u32 216, %s165_s28  ;;  %v7167_v41 = vsel %vm706_vm0, %v7150_v26, 0  ;;  %vm1212_vm6 = vcmask 1046532   ;;  %s161_s8 = sand.u32 1, %s7024_s13  }
  0x1a   : > { %vm7383_vm7 = vmor %vm1211_vm5, %vm1212_vm6  ;;  %s5872_s11 = sshll.u32 %s7078_s16, 11  ;;  %s9022_s16 = scalar_lea.sflag [#allocation3], %s161_s8 }
  0x1b   : > { %s7131_s9 = scalar_lea.vmem %s9063_s0, %s6695_s6  ;;  %s9014_s24 = scalar_lea.hbm %s9066_s3, %s5872_s11 }
  0x1c   : > { %v171_v6 = vld [vmem:[%s7131_s9] sm:$0xf]  ;;  %v172_v7 = vld [vmem:[%s7131_s9 + $0x4] sm:$0xf]  ;;  %v204_v8 = vld [vmem:[%s7131_s9 + $0x8] sm:$0x1] }
  0x1d   : > { %v224_v9 = vshrl.u32 %v171_v6, 16  ;;  %v227_v10 = vshll.u32 %v171_v6, 16  ;;  %v233_v11 = vshll.u32 %v172_v7, 16  ;;  %v237_v12 = vshrl.u32 %v172_v7, 16  ;;  %v5413_v13 = vld [vmem:[%s7131_s9 + $0xc] sm:$0xf] }
  0x1e   : > { %v243_v14 = vshll.u32 %v204_v8, 16  ;;  %v7138_v15 = vld [vmem:[%s7131_s9 + $0x10] sm:$0xf]  ;;  %v7141_v16 = vld [vmem:[%s7131_s9 + $0x14] sm:$0x1]  ;;  %v2028_v23 = vshrl.u32 %v5413_v13, 16 }
  0x1f   : > { %v226_v18 = vrot.slane %v224_v9, 4  ;;  %v229_v19 = vrot.slane %v227_v10, 5  ;;  %v235_v20 = vrot.slane %v233_v11, 5  ;;  %v239_v21 = vrot.slane %v237_v12, 4  ;;  %v173_v31 = vld [vmem:[%s7131_s9 + $0xc] sm:$0xf] }
  0x20   : > { %v245_v22 = vrot.slane %v243_v14, 5  ;;  %v2031_v24 = vshll.u32 %v5413_v13, 16  ;;  %v2037_v25 = vshll.u32 %v7138_v15, 16  ;;  %v2041_v29 = vshrl.u32 %v7138_v15, 16  ;;  %v174_v36 = vld [vmem:[%s7131_s9 + $0x10] sm:$0xf] }
  0x21   : > { %v230_v27 = vor.u32 %v229_v19, %v226_v18  ;;  %v240_v28 = vor.u32 %v239_v21, %v235_v20  ;;  %v2047_v30 = vshll.u32 %v7141_v16, 16  ;;  %v2030_v33 = vrot.slane %v2028_v23, 4  ;;  %v205_v44 = vld [vmem:[%s7131_s9 + $0x14] sm:$0x1]  ;;  %v5416_v55 = vld [vmem:[%s7131_s9 + $0x18] sm:$0xf] }
  0x22   : > { %v2033_v34 = vrot.slane %v2031_v24, 5  ;;  %v2039_v35 = vrot.slane %v2037_v25, 5  ;;  %v2043_v40 = vrot.slane %v2041_v29, 4  ;;  %v248_v45 = vshrl.u32 %v173_v31, 16  ;;  %v7176_v60 = vld [vmem:[%s7131_s9 + $0x1c] sm:$0xf] }
  0x23   : > { %v231_v38 = vrot.slane %v230_v27, 4  ;;  %v241_v39 = vrot.slane %v240_v28, 4  ;;  %v2049_v43 = vrot.slane %v2047_v30, 5  ;;  %v251_v46 = vshll.u32 %v173_v31, 16  ;;  %v7184_v1 = vld [vmem:[%s7131_s9 + $0x20] sm:$0x1] }
  0x24   : > { %v2034_v42 = vor.u32 %v2033_v34, %v2030_v33  ;;  %v2044_v49 = vor.u32 %v2043_v40, %v2039_v35  ;;  %v257_v50 = vshll.u32 %v174_v36, 16  ;;  %v250_v53 = vrot.slane %v248_v45, 4  ;;  %v175_v18 = vld [vmem:[%s7131_s9 + $0x18] sm:$0xf]  ;;  %v176_v23 = vld [vmem:[%s7131_s9 + $0x1c] sm:$0xf] }
  0x25   : > { %v236_v47 = vsel %vm7157_vm4, %v231_v38, %v235_v20  ;;  %v246_v48 = vsel %vm7157_vm4, %v241_v39, %v245_v22  ;;  %v253_v54 = vrot.slane %v251_v46, 5  ;;  %v261_v58 = vshrl.u32 %v174_v36, 16  ;;  %v206_v31 = vld [vmem:[%s7131_s9 + $0x20] sm:$0x1]  ;;  %v5419_v40 = vld [vmem:[%s7131_s9 + $0x24] sm:$0xf] }
  0x26   : > { %v5235_v51 = vcombine.low %v236_v47, %v246_v48  ;;  %v2035_v52 = vrot.slane %v2034_v42, 4  ;;  %v2045_v56 = vrot.slane %v2044_v49, 4  ;;  %v259_v57 = vrot.slane %v257_v50, 5  ;;  %v7207_v46 = vld [vmem:[%s7131_s9 + $0x28] sm:$0xf]  ;;  %s7034_s26 = smov [#allocation2]  }
  0x27   : > { %v267_v59 = vshll.u32 %v205_v44, 16  ;;  %v2771_v62 = vrot.slane %v7138_v15, 5  ;;  %v2774_v63 = vrot.slane %v7141_v16, 5  ;;  %v254_v0 = vor.u32 %v253_v54, %v250_v53  ;;  %v7216_v54 = vld [vmem:[%s7131_s9 + $0x2c] sm:$0x1]  ;;  %s6974_s27 = sshll.u32 %s7034_s26, 4  ;;  %s6975_s27 = int_to_ptr.vmem [resolvable:$false] %s6974_s27 }
  0x28   : > { %6123 = vmatprep.mubr.msk.bf16.mxu1 %vm657_vm3, %v5235_v51  ;;  %v2040_v61 = vsel %vm7157_vm4, %v2035_v52, %v2039_v35  ;;  %v2050_v2 = vsel %vm7157_vm4, %v2045_v56, %v2049_v43  ;;  %v263_v4 = vrot.slane %v261_v58, 4  ;;  %v2052_v6 = vshrl.u32 %v5416_v55, 16  ;;  %v5315_v51 = vld [vmem:[%s9064_s1 + $0x8] sm:$0xf]  ;;  %v7416_v16 = vld [vmem:[%s7131_s9 + $0x7c] sm:$0xf] }
  0x29   : > { %v269_v5 = vrot.slane %v267_v59, 5  ;;  %v5462_v7 = vcombine.low %v2040_v61, %v2050_v2  ;;  %v255_v8 = vrot.slane %v254_v0, 4  ;;  %v2055_v9 = vshll.u32 %v5416_v55, 16  ;;  %v177_v0 = vld [vmem:[%s7131_s9 + $0x24] sm:$0xf]  ;;  %s6976_s28 = scalar_lea.vmem %s6975_s27, 4096 }
  0x2a   : > { %v2061_v10 = vshll.u32 %v7176_v60, 16  ;;  %v264_v11 = vor.u32 %v263_v4, %v259_v57  ;;  %v2054_v12 = vrot.slane %v2052_v6, 4  ;;  %v2065_v13 = vshrl.u32 %v7176_v60, 16 }
  0x2b   : > { %v2071_v14 = vshll.u32 %v7184_v1, 16  ;;  %6259 = vmatprep.mubr.msk.bf16.mxu0 %vm657_vm3, %v5462_v7  ;;  %v260_v19 = vsel %vm7157_vm4, %v255_v8, %v259_v57  ;;  %v2057_v20 = vrot.slane %v2055_v9, 5  ;;  %v2778_v22 = vrot.slane %v7176_v60, 5  ;;  %v178_v7 = vld [vmem:[%s7131_s9 + $0x28] sm:$0xf] }
  0x2c   : > { %v2063_v21 = vrot.slane %v2061_v10, 5  ;;  %v265_v24 = vrot.slane %v264_v11, 4  ;;  %v2067_v25 = vrot.slane %v2065_v13, 4  ;;  %v2781_v28 = vrot.slane %v7184_v1, 5  ;;  %v207_v13 = vld [vmem:[%s7131_s9 + $0x2c] sm:$0x1] }
  0x2d   : > { %v2073_v27 = vrot.slane %v2071_v14, 5  ;;  %v2058_v29 = vor.u32 %v2057_v20, %v2054_v12  ;;  %v7200_v30 = vrot.slane %v2778_v22, 4  ;;  %v272_v33 = vshrl.u32 %v175_v18, 16 }
  0x2e   : > { %v275_v34 = vshll.u32 %v175_v18, 16  ;;  %v270_v35 = vsel %vm7157_vm4, %v265_v24, %v269_v5  ;;  %v2068_v36 = vor.u32 %v2067_v25, %v2063_v21  ;;  %v281_v38 = vshll.u32 %v176_v23, 16  ;;  %v5422_v24 = vld [vmem:[%s7131_s9 + $0x30] sm:$0xf] }
  0x2f   : > { %v285_v39 = vshrl.u32 %v176_v23, 16  ;;  %v5236_v42 = vcombine.low %v260_v19, %v270_v35  ;;  %v2059_v43 = vrot.slane %v2058_v29, 4  ;;  %v274_v44 = vrot.slane %v272_v33, 4  ;;  %v7236_v33 = vld [vmem:[%s7131_s9 + $0x34] sm:$0xf] }
  0x30   : > { %v277_v45 = vrot.slane %v275_v34, 5  ;;  %v2069_v47 = vrot.slane %v2068_v36, 4  ;;  %v283_v48 = vrot.slane %v281_v38, 5  ;;  %v291_v50 = vshll.u32 %v206_v31, 16 }
  0x31   : > { %v287_v49 = vrot.slane %v285_v39, 4  ;;  %6124 = vmatmul.mubr.msk.bf16.vlgmr.msra.gmra.mrb[0].mxu1 %vm657_vm3, %v5236_v42  ;;  %v2064_v52 = vsel %vm7157_vm4, %v2059_v43, %v2063_v21  ;;  %v2076_v55 = vshrl.u32 %v5419_v40, 16  ;;  %v2079_v56 = vshll.u32 %v5419_v40, 16  ;;  %v7244_v40 = vld [vmem:[%s7131_s9 + $0x38] sm:$0x1] }
  0x32   : > { %v278_v53 = vor.u32 %v277_v45, %v274_v44  ;;  %6156 = vmatpush3.bf16.msra.mxu1 %v7144_v17  ;;  %v2074_v57 = vsel %vm7157_vm4, %v2069_v47, %v2073_v27  ;;  %v293_v59 = vrot.slane %v291_v50, 5  ;;  %v2085_v61 = vshll.u32 %v7207_v46, 16 }
  0x33   : > { %v288_v58 = vor.u32 %v287_v49, %v283_v48  ;;  %v5463_v2 = vcombine.low %v2064_v52, %v2074_v57  ;;  %v2078_v5 = vrot.slane %v2076_v55, 4  ;;  %v2081_v6 = vrot.slane %v2079_v56, 5  ;;  %6687 = vmatprep.subr.msk.bf16.mxu1 %vm706_vm0, %v5315_v51  ;;  %v179_v52 = vld [vmem:[%s7131_s9 + $0x30] sm:$0xf] }
  0x34   : > { %v279_v4 = vrot.slane %v278_v53, 4  ;;  %v2087_v9 = vrot.slane %v2085_v61, 5  ;;  %v2089_v17 = vshrl.u32 %v7207_v46, 16  ;;  %v2095_v10 = vshll.u32 %v7216_v54, 16 }
  0x35   : > { %v289_v8 = vrot.slane %v288_v58, 4  ;;  %6260 = vmatmul.mubr.msk.bf16.vlgmr.msra.gmra.mrb[0].mxu0 %vm657_vm3, %v5463_v2  ;;  %v2082_v12 = vor.u32 %v2081_v6, %v2078_v5  ;;  %v296_v14 = vshrl.u32 %v177_v0, 16  ;;  %v299_v18 = vshll.u32 %v177_v0, 16  ;;  %v180_v58 = vld [vmem:[%s7131_s9 + $0x34] sm:$0xf] }
  0x36   : > { %v284_v11 = vsel %vm7157_vm4, %v279_v4, %v283_v48  ;;  %6292 = vmatpush3.bf16.msra.mxu0 %v7163_v37  ;;  %v2091_v20 = vrot.slane %v2089_v17, 4  ;;  %v2097_v21 = vrot.slane %v2095_v10, 5  ;;  %v305_v23 = vshll.u32 %v178_v7, 16  ;;  %v208_v4 = vld [vmem:[%s7131_s9 + $0x38] sm:$0x1] }
  0x37   : > { %v294_v19 = vsel %vm7157_vm4, %v289_v8, %v293_v59  ;;  %v2083_v27 = vrot.slane %v2082_v12, 4  ;;  %v298_v29 = vrot.slane %v296_v14, 4  ;;  %v301_v31 = vrot.slane %v299_v18, 5  ;;  %6692 = vmatprep.subr.msk.bf16.mxu0 %vm706_vm0, %v7150_v26  ;;  %v5425_v12 = vld [vmem:[%s7131_s9 + $0x3c] sm:$0xf] }
  0x38   : > { %v5237_v25 = vcombine.low %v284_v11, %v294_v19  ;;  %v2092_v34 = vor.u32 %v2091_v20, %v2087_v9  ;;  %v307_v35 = vrot.slane %v305_v23, 5  ;;  %v309_v37 = vshrl.u32 %v178_v7, 16  ;;  %v7261_v20 = vld [vmem:[%s7131_s9 + $0x40] sm:$0xf] }
  0x39   : > { %v315_v36 = vshll.u32 %v207_v13, 16  ;;  %v2088_v38 = vsel %vm7157_vm4, %v2083_v27, %v2087_v9  ;;  %v302_v39 = vor.u32 %v301_v31, %v298_v29  ;;  %v2100_v42 = vshrl.u32 %v5422_v24, 16 }
  0x3a   : > { %6127 = vmatprep.mubr.msk.bf16.mxu1 %vm657_vm3, %v5237_v25  ;;  %v2103_v43 = vshll.u32 %v5422_v24, 16  ;;  %v2093_v44 = vrot.slane %v2092_v34, 4  ;;  %v311_v45 = vrot.slane %v309_v37, 4  ;;  %v2109_v26 = vshll.u32 %v7236_v33, 16  ;;  %v7266_v34 = vld [vmem:[%s7131_s9 + $0x44] sm:$0x1] }
  0x3b   : > { %v317_v47 = vrot.slane %v315_v36, 5  ;;  %v303_v48 = vrot.slane %v302_v39, 4  ;;  %v2102_v49 = vrot.slane %v2100_v42, 4  ;;  %v2113_v51 = vshrl.u32 %v7236_v33, 16  ;;  %v181_v42 = vld [vmem:[%s7131_s9 + $0x3c] sm:$0xf] }
  0x3c   : > { %v2105_v50 = vrot.slane %v2103_v43, 5  ;;  %v2098_v53 = vsel %vm7157_vm4, %v2093_v44, %v2097_v21  ;;  %v312_v55 = vor.u32 %v311_v45, %v307_v35  ;;  %v2111_v56 = vrot.slane %v2109_v26, 5  ;;  %v182_v26 = vld [vmem:[%s7131_s9 + $0x40] sm:$0xf] }
  0x3d   : > { %v2119_v57 = vshll.u32 %v7244_v40, 16  ;;  %v5464_v59 = vcombine.low %v2088_v38, %v2098_v53  ;;  %v308_v61 = vsel %vm7157_vm4, %v303_v48, %v307_v35  ;;  %v2115_v2 = vrot.slane %v2113_v51, 4 }
  0x3e   : > { %v2106_v0 = vor.u32 %v2105_v50, %v2102_v49  ;;  %v313_v5 = vrot.slane %v312_v55, 4  ;;  %v320_v7 = vshrl.u32 %v179_v52, 16  ;;  %v323_v8 = vshll.u32 %v179_v52, 16 }
  0x3f   : > { %v2121_v6 = vrot.slane %v2119_v57, 5  ;;  %6263 = vmatprep.mubr.msk.bf16.mxu0 %vm657_vm3, %v5464_v59  ;;  %v2116_v17 = vor.u32 %v2115_v2, %v2111_v56  ;;  %v329_v10 = vshll.u32 %v180_v58, 16  ;;  %v333_v11 = vshrl.u32 %v180_v58, 16  ;;  %v5428_v2 = vld [vmem:[%s7131_s9 + $0x48] sm:$0xf] }
  0x40   : > { %v2107_v9 = vrot.slane %v2106_v0, 4  ;;  %v318_v13 = vsel %vm7157_vm4, %v313_v5, %v317_v47  ;;  %v322_v14 = vrot.slane %v320_v7, 4  ;;  %v325_v18 = vrot.slane %v323_v8, 5  ;;  %v7284_v8 = vld [vmem:[%s7131_s9 + $0x4c] sm:$0xf] }
  0x41   : > { %v339_v19 = vshll.u32 %v208_v4, 16  ;;  %v5238_v21 = vcombine.low %v308_v61, %v318_v13  ;;  %v2117_v24 = vrot.slane %v2116_v17, 4  ;;  %v331_v25 = vrot.slane %v329_v10, 5  ;;  %v209_v61 = vld [vmem:[%s7131_s9 + $0x44] sm:$0x1] }
  0x42   : > { %v2112_v23 = vsel %vm7157_vm4, %v2107_v9, %v2111_v56  ;;  %v326_v27 = vor.u32 %v325_v18, %v322_v14  ;;  %v335_v29 = vrot.slane %v333_v11, 4  ;;  %v2124_v35 = vshrl.u32 %v5425_v12, 16 }
  0x43   : > { %v341_v31 = vrot.slane %v339_v19, 5  ;;  %6128 = vmatmul.mubr.msk.bf16.gmra.mrb[4].mxu1 %vm657_vm3, %v5238_v21  ;;  %v2122_v37 = vsel %vm7157_vm4, %v2117_v24, %v2121_v6  ;;  %v2127_v36 = vshll.u32 %v5425_v12, 16  ;;  %v2133_v38 = vshll.u32 %v7261_v20, 16 }
  0x44   : > { %v2137_v39 = vshrl.u32 %v7261_v20, 16  ;;  %v5465_v43 = vcombine.low %v2112_v23, %v2122_v37  ;;  %v327_v44 = vrot.slane %v326_v27, 4  ;;  %v336_v45 = vor.u32 %v335_v29, %v331_v25  ;;  %v7292_v23 = vld [vmem:[%s7131_s9 + $0x50] sm:$0x1]  ;;  %v7296_v27 = vld [vmem:[%s7131_s9 + $0x48] sm:$0xf] }
  0x45   : > { %v2126_v47 = vrot.slane %v2124_v35, 4  ;;  %v2129_v48 = vrot.slane %v2127_v36, 5  ;;  %v2135_v49 = vrot.slane %v2133_v38, 5  ;;  %v2143_v51 = vshll.u32 %v7266_v34, 16  ;;  %v7299_v36 = vld [vmem:[%s7131_s9 + $0x4c] sm:$0xf] }
  0x46   : > { %v2139_v50 = vrot.slane %v2137_v39, 4  ;;  %6264 = vmatmul.mubr.msk.bf16.gmra.mrb[4].mxu0 %vm657_vm3, %v5465_v43  ;;  %v332_v52 = vsel %vm7157_vm4, %v327_v44, %v331_v25  ;;  %v337_v53 = vrot.slane %v336_v45, 4  ;;  %v344_v55 = vshrl.u32 %v181_v42, 16 }
  0x47   : > { %v347_v56 = vshll.u32 %v181_v42, 16  ;;  %v2130_v57 = vor.u32 %v2129_v48, %v2126_v47  ;;  %v2145_v59 = vrot.slane %v2143_v51, 5  ;;  %v353_v0 = vshll.u32 %v182_v26, 16 }
  0x48   : > { %v2140_v58 = vor.u32 %v2139_v50, %v2135_v49  ;;  %v342_v4 = vsel %vm7157_vm4, %v337_v53, %v341_v31  ;;  %v346_v5 = vrot.slane %v344_v55, 4  ;;  %v357_v7 = vshrl.u32 %v182_v26, 16  ;;  %v210_v26 = vld [vmem:[%s7131_s9 + $0x50] sm:$0x1]  ;;  %v5431_v53 = vld [vmem:[%s7131_s9 + $0x54] sm:$0xf] }
  0x49   : > { %v349_v6 = vrot.slane %v347_v56, 5  ;;  %v5239_v9 = vcombine.low %v332_v52, %v342_v4  ;;  %v2131_v17 = vrot.slane %v2130_v57, 4  ;;  %v355_v11 = vrot.slane %v353_v0, 5  ;;  %v7315_v4 = vld [vmem:[%s7131_s9 + $0x58] sm:$0xf] }
  0x4a   : > { %v2141_v10 = vrot.slane %v2140_v58, 4  ;;  %v359_v13 = vrot.slane %v357_v7, 4  ;;  %v363_v14 = vshll.u32 %v209_v61, 16  ;;  %v2148_v18 = vshrl.u32 %v5428_v2, 16 }
  0x4b   : > { %v350_v12 = vor.u32 %v349_v6, %v346_v5  ;;  %6131 = vmatprep.mubr.msk.bf16.mxu1 %vm657_vm3, %v5239_v9  ;;  %v2136_v19 = vsel %vm7157_vm4, %v2131_v17, %v2135_v49  ;;  %v2151_v24 = vshll.u32 %v5428_v2, 16  ;;  %v2157_v25 = vshll.u32 %v7284_v8, 16 }
  0x4c   : > { %v2146_v21 = vsel %vm7157_vm4, %v2141_v10, %v2145_v59  ;;  %v360_v35 = vor.u32 %v359_v13, %v355_v11  ;;  %v365_v37 = vrot.slane %v363_v14, 5  ;;  %v2150_v38 = vrot.slane %v2148_v18, 4 }
  0x4d   : > { %v5466_v29 = vcombine.low %v2136_v19, %v2146_v21  ;;  %v351_v31 = vrot.slane %v350_v12, 4  ;;  %v2153_v39 = vrot.slane %v2151_v24, 5  ;;  %v2159_v42 = vrot.slane %v2157_v25, 5  ;;  %v7321_v12 = vld [vmem:[%s7131_s9 + $0x5c] sm:$0x1] }
  0x4e   : > { %v2161_v43 = vshrl.u32 %v7284_v8, 16  ;;  %v361_v45 = vrot.slane %v360_v35, 4  ;;  %v2167_v47 = vshll.u32 %v7292_v23, 16  ;;  %v368_v48 = vshrl.u32 %v7296_v27, 16  ;;  %v7325_v24 = vld [vmem:[%s7131_s9 + $0x54] sm:$0xf] }
  0x4f   : > { %6267 = vmatprep.mubr.msk.bf16.mxu0 %vm657_vm3, %v5466_v29  ;;  %v356_v44 = vsel %vm7157_vm4, %v351_v31, %v355_v11  ;;  %v2154_v49 = vor.u32 %v2153_v39, %v2150_v38  ;;  %v371_v51 = vshll.u32 %v7296_v27, 16  ;;  %v377_v52 = vshll.u32 %v7299_v36, 16 }
  0x50   : > { %v2163_v50 = vrot.slane %v2161_v43, 4  ;;  %v366_v55 = vsel %vm7157_vm4, %v361_v45, %v365_v37  ;;  %v2169_v56 = vrot.slane %v2167_v47, 5  ;;  %v370_v57 = vrot.slane %v368_v48, 4  ;;  %v7331_v37 = vld [vmem:[%s7131_s9 + $0x58] sm:$0xf] }
  0x51   : > { %v381_v58 = vshrl.u32 %v7299_v36, 16  ;;  %v5240_v59 = vcombine.low %v356_v44, %v366_v55  ;;  %v2155_v61 = vrot.slane %v2154_v49, 4  ;;  %v373_v2 = vrot.slane %v371_v51, 5 }
  0x52   : > { %v2164_v0 = vor.u32 %v2163_v50, %v2159_v42  ;;  %v379_v5 = vrot.slane %v377_v52, 5  ;;  %v387_v7 = vshll.u32 %v210_v26, 16  ;;  %v2172_v9 = vshrl.u32 %v5431_v53, 16  ;;  %v211_v26 = vld [vmem:[%s7131_s9 + $0x5c] sm:$0x1] }
  0x53   : > { %v383_v6 = vrot.slane %v381_v58, 4  ;;  %6132 = vmatmul.mubr.msk.bf16.gmra.mrb[8].mxu1 %vm657_vm3, %v5240_v59  ;;  %v2160_v17 = vsel %vm7157_vm4, %v2155_v61, %v2159_v42  ;;  %v374_v11 = vor.u32 %v373_v2, %v370_v57  ;;  %v2175_v13 = vshll.u32 %v5431_v53, 16  ;;  %v5434_v53 = vld [vmem:[%s7131_s9 + $0x60] sm:$0xf]  ;;  %v7345_v59 = vld [vmem:[%s7131_s9 + $0x64] sm:$0xf] }
  0x54   : > { %v2165_v10 = vrot.slane %v2164_v0, 4  ;;  %v389_v18 = vrot.slane %v387_v7, 5  ;;  %v2174_v19 = vrot.slane %v2172_v9, 4  ;;  %v2181_v21 = vshll.u32 %v7315_v4, 16  ;;  %v7352_v9 = vld [vmem:[%s7131_s9 + $0x68] sm:$0x1] }
  0x55   : > { %v384_v14 = vor.u32 %v383_v6, %v379_v5  ;;  %v375_v29 = vrot.slane %v374_v11, 4  ;;  %v2177_v31 = vrot.slane %v2175_v13, 5  ;;  %v2185_v35 = vshrl.u32 %v7315_v4, 16 }
  0x56   : > { %v2170_v25 = vsel %vm7157_vm4, %v2165_v10, %v2169_v56  ;;  %v2183_v42 = vrot.slane %v2181_v21, 5  ;;  %v2191_v43 = vshll.u32 %v7321_v12, 16  ;;  %v392_v48 = vshrl.u32 %v7325_v24, 16 }
  0x57   : > { %v5467_v38 = vcombine.low %v2160_v17, %v2170_v25  ;;  %v385_v39 = vrot.slane %v384_v14, 4  ;;  %v380_v44 = vsel %vm7157_vm4, %v375_v29, %v379_v5  ;;  %v2178_v45 = vor.u32 %v2177_v31, %v2174_v19  ;;  %v7356_v19 = vld [vmem:[%s7131_s9 + $0x60] sm:$0xf] }
  0x58   : > { %v2187_v47 = vrot.slane %v2185_v35, 4  ;;  %v2193_v50 = vrot.slane %v2191_v43, 5  ;;  %v395_v51 = vshll.u32 %v7325_v24, 16  ;;  %v401_v52 = vshll.u32 %v7331_v37, 16  ;;  %v7362_v35 = vld [vmem:[%s7131_s9 + $0x64] sm:$0xf] }
  0x59   : > { %6268 = vmatmul.mubr.msk.bf16.gmra.mrb[8].mxu0 %vm657_vm3, %v5467_v38  ;;  %v390_v49 = vsel %vm7157_vm4, %v385_v39, %v389_v18  ;;  %v2179_v56 = vrot.slane %v2178_v45, 4  ;;  %v394_v58 = vrot.slane %v392_v48, 4  ;;  %v405_v2 = vshrl.u32 %v7331_v37, 16 }
  0x5a   : > { %v5241_v55 = vcombine.low %v380_v44, %v390_v49  ;;  %v2188_v57 = vor.u32 %v2187_v47, %v2183_v42  ;;  %v397_v61 = vrot.slane %v395_v51, 5  ;;  %v403_v0 = vrot.slane %v401_v52, 5 }
  0x5b   : > { %v411_v5 = vshll.u32 %v211_v26, 16  ;;  %v2184_v6 = vsel %vm7157_vm4, %v2179_v56, %v2183_v42  ;;  %v2196_v17 = vshrl.u32 %v5434_v53, 16  ;;  %v2199_v10 = vshll.u32 %v5434_v53, 16 }
  0x5c   : > { %6135 = vmatprep.mubr.msk.bf16.mxu1 %vm657_vm3, %v5241_v55  ;;  %v2189_v7 = vrot.slane %v2188_v57, 4  ;;  %v398_v11 = vor.u32 %v397_v61, %v394_v58  ;;  %v407_v13 = vrot.slane %v405_v2, 4  ;;  %v2205_v18 = vshll.u32 %v7345_v59, 16  ;;  %v5494_v58 = vld [vmem:[%s7131_s9 + $0xc] sm:$0xe] }
  0x5d   : > { %v413_v14 = vrot.slane %v411_v5, 5  ;;  %v2198_v25 = vrot.slane %v2196_v17, 4  ;;  %v2201_v29 = vrot.slane %v2199_v10, 5  ;;  %v2209_v31 = vshrl.u32 %v7345_v59, 16 }
  0x5e   : > { %v2194_v21 = vsel %vm7157_vm4, %v2189_v7, %v2193_v50  ;;  %v399_v39 = vrot.slane %v398_v11, 4  ;;  %v408_v42 = vor.u32 %v407_v13, %v403_v0  ;;  %v2207_v43 = vrot.slane %v2205_v18, 5  ;;  %v212_v50 = vld [vmem:[%s7131_s9 + $0x68] sm:$0x1] }
  0x5f   : > { %v5468_v38 = vcombine.low %v2184_v6, %v2194_v21  ;;  %v2202_v44 = vor.u32 %v2201_v29, %v2198_v25  ;;  %v2211_v45 = vrot.slane %v2209_v31, 4  ;;  %v2215_v47 = vshll.u32 %v7352_v9, 16  ;;  %v7390_v29 = vld [vmem:[%s7131_s9 + $0x70] sm:$0xf] }
  0x60   : > { %v416_v26 = vshrl.u32 %v7356_v19, 16  ;;  %v404_v48 = vsel %vm7157_vm4, %v399_v39, %v403_v0  ;;  %v409_v49 = vrot.slane %v408_v42, 4  ;;  %v419_v51 = vshll.u32 %v7356_v19, 16  ;;  %v7377_v0 = vld [vmem:[%s7131_s9 + $0x6c] sm:$0xf] }
  0x61   : > { %6271 = vmatprep.mubr.msk.bf16.mxu0 %vm657_vm3, %v5468_v38  ;;  %v425_v52 = vshll.u32 %v7362_v35, 16  ;;  %v2203_v53 = vrot.slane %v2202_v44, 4  ;;  %v2212_v55 = vor.u32 %v2211_v45, %v2207_v43  ;;  %v2217_v56 = vrot.slane %v2215_v47, 5 }
  0x62   : > { %v418_v57 = vrot.slane %v416_v26, 4  ;;  %v414_v61 = vsel %vm7157_vm4, %v409_v49, %v413_v14  ;;  %v421_v2 = vrot.slane %v419_v51, 5  ;;  %v429_v6 = vshrl.u32 %v7362_v35, 16  ;;  %v213_v26 = vld [vmem:[%s7131_s9 + $0x74] sm:$0x1] }
  0x63   : > { %v427_v5 = vrot.slane %v425_v52, 5  ;;  %v5242_v7 = vcombine.low %v404_v48, %v414_v61  ;;  %v2208_v17 = vsel %vm7157_vm4, %v2203_v53, %v2207_v43  ;;  %v2213_v10 = vrot.slane %v2212_v55, 4  ;;  %v5495_v48 = vld [vmem:[%s7131_s9 + $0x18] sm:$0xe] }
  0x64   : > { %v435_v11 = vshll.u32 %v212_v50, 16  ;;  %v422_v14 = vor.u32 %v421_v2, %v418_v57  ;;  %v431_v18 = vrot.slane %v429_v6, 4  ;;  %v5510_v21 = vrot.slane %v5494_v58, 9  ;;  %v7409_v53 = vld [vmem:[%s7131_s9 + $0x78] sm:$0xf] }
  0x65   : > { %v2773_v25 = vrot.slane %v2771_v62, 4  ;;  %6136 = vmatmul.mubr.msk.bf16.gmra.mrb[12].mxu1 %vm657_vm3, %v5242_v7  ;;  %v2218_v31 = vsel %vm7157_vm4, %v2213_v10, %v2217_v56  ;;  %v440_v39 = vshrl.u32 %v7377_v0, 16  ;;  %v443_v42 = vshll.u32 %v7377_v0, 16  ;;  %v214_v57 = vld [vmem:[%s7131_s9 + $0x80] sm:$0x1] }
  0x66   : > { %v437_v38 = vrot.slane %v435_v11, 5  ;;  %v5469_v43 = vcombine.low %v2208_v17, %v2218_v31  ;;  %v423_v44 = vrot.slane %v422_v14, 4  ;;  %v432_v45 = vor.u32 %v431_v18, %v427_v5  ;;  %v5496_v10 = vld [vmem:[%s7131_s9 + $0x24] sm:$0xe] }
  0x67   : > { %v2772_v47 = vsel %vm7383_vm7, %v5510_v21, %v2771_v62  ;;  %v2775_v49 = vsel %vm7383_vm7, %v2773_v25, %v2774_v63  ;;  %v442_v50 = vrot.slane %v440_v39, 4  ;;  %v445_v51 = vrot.slane %v443_v42, 5  ;;  %v7435_v39 = vld [vmem:[%s7131_s9 + $0x84] sm:$0xf] }
  0x68   : > { %v449_v52 = vshll.u32 %v7390_v29, 16  ;;  %6272 = vmatmul.mubr.msk.bf16.gmra.mrb[12].mxu0 %vm657_vm3, %v5469_v43  ;;  %v428_v15 = vsel %vm7157_vm4, %v423_v44, %v427_v5  ;;  %v433_v62 = vrot.slane %v432_v45, 4  ;;  %v5527_v55 = vcombine.low %v2772_v47, %v2775_v49  ;;  %v7443_v43 = vld [vmem:[%s7131_s9 + $0x88] sm:$0xf] }
  0x69   : > { %v453_v56 = vshrl.u32 %v7390_v29, 16  ;;  %v446_v63 = vor.u32 %v445_v51, %v442_v50  ;;  %v459_v61 = vshll.u32 %v213_v26, 16  ;;  %v5511_v2 = vrot.slane %v5495_v48, 9 }
  0x6a   : > { %v451_v58 = vrot.slane %v449_v52, 5  ;;  %v438_v6 = vsel %vm7157_vm4, %v433_v62, %v437_v38  ;;  %6293 = vmatprep.mubr.msk.bf16.mxu0 %vm657_vm3, %v5527_v55  ;;  %v2782_v5 = vsel %vm7383_vm7, %v7200_v30, %v2781_v28  ;;  %v464_v17 = vshrl.u32 %v7409_v53, 16  ;;  %v215_v52 = vld [vmem:[%s7131_s9 + $0x8c] sm:$0x1] }
  0x6b   : > { %v455_v7 = vrot.slane %v453_v56, 4  ;;  %v5243_v11 = vcombine.low %v428_v15, %v438_v6  ;;  %v447_v14 = vrot.slane %v446_v63, 4  ;;  %v461_v18 = vrot.slane %v459_v61, 5 }
  0x6c   : > { %v2779_v21 = vsel %vm7383_vm7, %v5511_v2, %v2778_v22  ;;  %v466_v38 = vrot.slane %v464_v17, 4  ;;  %v467_v1 = vshll.u32 %v7409_v53, 16  ;;  %v473_v30 = vshll.u32 %v7416_v16, 16  ;;  %v7448_v22 = vld [vmem:[%s9064_s1 + $0x1c] sm:$0xf] }
  0x6d   : > { %v456_v25 = vor.u32 %v455_v7, %v451_v58  ;;  %v5528_v31 = vcombine.low %v2779_v21, %v2782_v5  ;;  %6139 = vmatprep.mubr.msk.bf16.mxu1 %vm657_vm3, %v5243_v11  ;;  %v452_v28 = vsel %vm7157_vm4, %v447_v14, %v451_v58  ;;  %v477_v60 = vshrl.u32 %v7416_v16, 16  ;;  %v7467_v5 = vld [vmem:[%s7131_s9 + $0x90] sm:$0xf] }
  0x6e   : > { %v483_v42 = vshll.u32 %v214_v57, 16  ;;  %v469_v45 = vrot.slane %v467_v1, 5  ;;  %v5512_v47 = vrot.slane %v5496_v10, 9  ;;  %v2785_v26 = vrot.slane %v7207_v46, 5  ;;  %v5497_v57 = vld [vmem:[%s7131_s9 + $0x30] sm:$0xe] }
  0x6f   : > { %v457_v44 = vrot.slane %v456_v25, 4  ;;  %v475_v48 = vrot.slane %v473_v30, 5  ;;  %v479_v49 = vrot.slane %v477_v60, 4  ;;  %v2788_v51 = vrot.slane %v7216_v54, 5  ;;  %v7479_v30 = vld [vmem:[%s7131_s9 + $0x94] sm:$0xf] }
  0x70   : > { %v485_v50 = vrot.slane %v483_v42, 5  ;;  %6294 = vmatmul.mubr.msk.bf16.vlgmr.msra.gmra.mrb[0].mxu0 %vm657_vm3, %v5528_v31  ;;  %v470_v62 = vor.u32 %v469_v45, %v466_v38  ;;  %v2786_v55 = vsel %vm7383_vm7, %v5512_v47, %v2785_v26  ;;  %v2787_v56 = vrot.slane %v2785_v26, 4  ;;  %v216_v60 = vld [vmem:[%s7131_s9 + $0x98] sm:$0x1]  ;;  %v5498_v26 = vld [vmem:[%s7131_s9 + $0x3c] sm:$0xe] }
  0x71   : > { %v462_v15 = vsel %vm7157_vm4, %v457_v44, %v461_v18  ;;  %6326 = vmatpush3.bf16.msra.mxu0 %v7167_v41  ;;  %v480_v46 = vor.u32 %v479_v49, %v475_v48  ;;  %v488_v58 = vshrl.u32 %v7435_v39, 16  ;;  %v491_v54 = vshll.u32 %v7435_v39, 16 }
  0x72   : > { %v5244_v63 = vcombine.low %v452_v28, %v462_v15  ;;  %v471_v61 = vrot.slane %v470_v62, 4  ;;  %v2789_v2 = vsel %vm7383_vm7, %v2787_v56, %v2788_v51  ;;  %v497_v6 = vshll.u32 %v7443_v43, 16  ;;  %6693 = vmatprep.subr.msk.bf16.mxu0 %vm706_vm0, %v7448_v22 }
  0x73   : > { %v501_v7 = vshrl.u32 %v7443_v43, 16  ;;  %v481_v41 = vrot.slane %v480_v46, 4  ;;  %v5529_v17 = vcombine.low %v2786_v55, %v2789_v2  ;;  %v490_v10 = vrot.slane %v488_v58, 4  ;;  %v7499_v46 = vld [vmem:[%s7131_s9 + $0xa0] sm:$0xf] }
  0x74   : > { %6140 = vmatmul.mubr.msk.bf16.gmra.mrb[16].mxu1 %vm657_vm3, %v5244_v63  ;;  %v493_v11 = vrot.slane %v491_v54, 5  ;;  %v476_v14 = vsel %vm7157_vm4, %v471_v61, %v475_v48  ;;  %v499_v18 = vrot.slane %v497_v6, 5  ;;  %v507_v25 = vshll.u32 %v215_v52, 16  ;;  %v7488_v52 = vld [vmem:[%s7131_s9 + $0x9c] sm:$0xf] }
  0x75   : > { %v503_v21 = vrot.slane %v501_v7, 4  ;;  %v486_v31 = vsel %vm7157_vm4, %v481_v41, %v485_v50  ;;  %6297 = vmatprep.mubr.msk.bf16.mxu0 %vm657_vm3, %v5529_v17  ;;  %v5513_v1 = vrot.slane %v5497_v57, 9  ;;  %v2792_v28 = vrot.slane %v7236_v33, 5 }
  0x76   : > { %v494_v38 = vor.u32 %v493_v11, %v490_v10  ;;  %v5245_v42 = vcombine.low %v476_v14, %v486_v31  ;;  %v509_v45 = vrot.slane %v507_v25, 5  ;;  %v2795_v47 = vrot.slane %v7244_v40, 5  ;;  %v217_v10 = vld [vmem:[%s7131_s9 + $0xa4] sm:$0x1]  ;;  %v5499_v11 = vld [vmem:[%s7131_s9 + $0x48] sm:$0xe] }
  0x77   : > { %v504_v44 = vor.u32 %v503_v21, %v499_v18  ;;  %v2793_v49 = vsel %vm7383_vm7, %v5513_v1, %v2792_v28  ;;  %v2794_v50 = vrot.slane %v2792_v28, 4  ;;  %v512_v51 = vshrl.u32 %v7467_v5, 16 }
  0x78   : > { %v495_v48 = vrot.slane %v494_v38, 4  ;;  %6143 = vmatprep.mubr.msk.bf16.mxu1 %vm657_vm3, %v5245_v42  ;;  %v515_v15 = vshll.u32 %v7467_v5, 16  ;;  %v521_v62 = vshll.u32 %v7479_v30, 16  ;;  %v525_v40 = vshrl.u32 %v7479_v30, 16 }
  0x79   : > { %v505_v33 = vrot.slane %v504_v44, 4  ;;  %v2796_v56 = vsel %vm7383_vm7, %v2794_v50, %v2795_v47  ;;  %v514_v57 = vrot.slane %v512_v51, 4  ;;  %v531_v63 = vshll.u32 %v216_v60, 16 }
  0x7a   : > { %v500_v55 = vsel %vm7157_vm4, %v495_v48, %v499_v18  ;;  %v5530_v54 = vcombine.low %v2793_v49, %v2796_v56  ;;  %v517_v61 = vrot.slane %v515_v15, 5  ;;  %v523_v2 = vrot.slane %v521_v62, 5  ;;  %v7525_v56 = vld [vmem:[%s7131_s9 + $0xac] sm:$0xf] }
  0x7b   : > { %v510_v58 = vsel %vm7157_vm4, %v505_v33, %v509_v45  ;;  %v527_v7 = vrot.slane %v525_v40, 4  ;;  %v533_v41 = vrot.slane %v531_v63, 5  ;;  %v5514_v17 = vrot.slane %v5498_v26, 9  ;;  %v7520_v33 = vld [vmem:[%s7131_s9 + $0xa8] sm:$0xf] }
  0x7c   : > { %v5246_v6 = vcombine.low %v500_v55, %v510_v58  ;;  %6298 = vmatmul.mubr.msk.bf16.gmra.mrb[4].mxu0 %vm657_vm3, %v5530_v54  ;;  %v518_v14 = vor.u32 %v517_v61, %v514_v57  ;;  %v2799_v18 = vrot.slane %v7261_v20, 5  ;;  %v2802_v21 = vrot.slane %v7266_v34, 5  ;;  %v218_v61 = vld [vmem:[%s7131_s9 + $0xb0] sm:$0x1] }
  0x7d   : > { %v536_v25 = vshrl.u32 %v7488_v52, 16  ;;  %v528_v31 = vor.u32 %v527_v7, %v523_v2  ;;  %v539_v38 = vshll.u32 %v7488_v52, 16  ;;  %v545_v1 = vshll.u32 %v7499_v46, 16 }
  0x7e   : > { %6144 = vmatmul.mubr.msk.bf16.gmra.mrb[20].mxu1 %vm657_vm3, %v5246_v6  ;;  %v549_v28 = vshrl.u32 %v7499_v46, 16  ;;  %v519_v60 = vrot.slane %v518_v14, 4  ;;  %v2800_v42 = vsel %vm7383_vm7, %v5514_v17, %v2799_v18  ;;  %v2801_v20 = vrot.slane %v2799_v18, 4  ;;  %v7540_v14 = vld [vmem:[%s7131_s9 + $0xb4] sm:$0xf] }
  0x7f   : > { %v538_v44 = vrot.slane %v536_v25, 4  ;;  %v529_v34 = vrot.slane %v528_v31, 4  ;;  %v541_v45 = vrot.slane %v539_v38, 5  ;;  %v547_v47 = vrot.slane %v545_v1, 5 }
  0x80   : > { %v551_v26 = vrot.slane %v549_v28, 4  ;;  %v524_v48 = vsel %vm7157_vm4, %v519_v60, %v523_v2  ;;  %v2803_v49 = vsel %vm7383_vm7, %v2801_v20, %v2802_v21  ;;  %v555_v50 = vshll.u32 %v217_v10, 16  ;;  %v5500_v2 = vld [vmem:[%s7131_s9 + $0x54] sm:$0xe] }
  0x81   : > { %v5515_v51 = vrot.slane %v5499_v11, 9  ;;  %v534_v15 = vsel %vm7157_vm4, %v529_v34, %v533_v41  ;;  %v5531_v62 = vcombine.low %v2800_v42, %v2803_v49  ;;  %v542_v40 = vor.u32 %v541_v45, %v538_v44  ;;  %v7549_v42 = vld [vmem:[%s7131_s9 + $0xb8] sm:$0xf]  ;;  %v219_v49 = vld [vmem:[%s7131_s9 + $0xbc] sm:$0x1] }
  0x82   : > { %v552_v55 = vor.u32 %v551_v26, %v547_v47  ;;  %v5247_v57 = vcombine.low %v524_v48, %v534_v15  ;;  %v557_v63 = vrot.slane %v555_v50, 5  ;;  %v2806_v58 = vrot.slane %v7284_v8, 5 }
  0x83   : > { %v2809_v54 = vrot.slane %v7292_v23, 5  ;;  %6301 = vmatprep.mubr.msk.bf16.mxu0 %vm657_vm3, %v5531_v62  ;;  %v543_v6 = vrot.slane %v542_v40, 4  ;;  %v560_v41 = vshrl.u32 %v7520_v33, 16  ;;  %v563_v17 = vshll.u32 %v7520_v33, 16 }
  0x84   : > { %v553_v7 = vrot.slane %v552_v55, 4  ;;  %6147 = vmatprep.mubr.msk.bf16.mxu1 %vm657_vm3, %v5247_v57  ;;  %v2807_v10 = vsel %vm7383_vm7, %v5515_v51, %v2806_v58  ;;  %v2808_v11 = vrot.slane %v2806_v58, 4  ;;  %v569_v8 = vshll.u32 %v7525_v56, 16  ;;  %v5501_v55 = vld [vmem:[%s7131_s9 + $0x60] sm:$0xe] }
  0x85   : > { %v573_v23 = vshrl.u32 %v7525_v56, 16  ;;  %v548_v18 = vsel %vm7157_vm4, %v543_v6, %v547_v47  ;;  %v562_v25 = vrot.slane %v560_v41, 4  ;;  %v565_v31 = vrot.slane %v563_v17, 5  ;;  %v5502_v6 = vld [vmem:[%s7131_s9 + $0x6c] sm:$0xe] }
  0x86   : > { %v558_v21 = vsel %vm7157_vm4, %v553_v7, %v557_v63  ;;  %v2810_v1 = vsel %vm7383_vm7, %v2808_v11, %v2809_v54  ;;  %v571_v28 = vrot.slane %v569_v8, 5  ;;  %v579_v34 = vshll.u32 %v218_v61, 16  ;;  %v5438_v11 = vld [vmem:[%s7131_s9 + $0x70] sm:$0xf]  ;;  %v5439_v8 = vld [vmem:[%s7131_s9 + $0x74] sm:$0x1] }
  0x87   : > { %v5248_v38 = vcombine.low %v548_v18, %v558_v21  ;;  %v575_v60 = vrot.slane %v573_v23, 4  ;;  %v5532_v20 = vcombine.low %v2807_v10, %v2810_v1  ;;  %v566_v44 = vor.u32 %v565_v31, %v562_v25 }
  0x88   : > { %v5516_v45 = vrot.slane %v5500_v2, 9  ;;  %v2813_v26 = vrot.slane %v7315_v4, 5  ;;  %v2816_v48 = vrot.slane %v7321_v12, 5  ;;  %v584_v50 = vshrl.u32 %v7540_v14, 16 }
  0x89   : > { %6148 = vmatmul.mubr.msk.bf16.gmra.mrb[24].mxu1 %vm657_vm3, %v5248_v38  ;;  %v576_v47 = vor.u32 %v575_v60, %v571_v28  ;;  %6302 = vmatmul.mubr.msk.bf16.gmra.mrb[8].mxu0 %vm657_vm3, %v5532_v20  ;;  %v567_v51 = vrot.slane %v566_v44, 4  ;;  %v581_v15 = vrot.slane %v579_v34, 5  ;;  %v587_v62 = vshll.u32 %v7540_v14, 16 }
  0x8a   : > { %v593_v40 = vshll.u32 %v7549_v42, 16  ;;  %v2814_v4 = vsel %vm7383_vm7, %v5516_v45, %v2813_v26  ;;  %v2815_v12 = vrot.slane %v2813_v26, 4  ;;  %v586_v63 = vrot.slane %v584_v50, 4 }
  0x8b   : > { %v577_v57 = vrot.slane %v576_v47, 4  ;;  %v572_v58 = vsel %vm7157_vm4, %v567_v51, %v571_v28  ;;  %v589_v54 = vrot.slane %v587_v62, 5  ;;  %v597_v2 = vshrl.u32 %v7549_v42, 16  ;;  %v5503_v47 = vld [vmem:[%s7131_s9 + $0x78] sm:$0xe] }
  0x8c   : > { %v595_v61 = vrot.slane %v593_v40, 5  ;;  %v2817_v41 = vsel %vm7383_vm7, %v2815_v12, %v2816_v48  ;;  %v603_v17 = vshll.u32 %v219_v49, 16  ;;  %v5517_v10 = vrot.slane %v5501_v55, 9  ;;  %v6913_v51 = vld [vmem:[%s7131_s9] sm:$0xf] }
  0x8d   : > { %v582_v7 = vsel %vm7157_vm4, %v577_v57, %v581_v15  ;;  %v5533_v18 = vcombine.low %v2814_v4, %v2817_v41  ;;  %v590_v21 = vor.u32 %v589_v54, %v586_v63  ;;  %v599_v25 = vrot.slane %v597_v2, 4  ;;  %v7587_v15 = vld [vmem:[%s7131_s9 + $0x4] sm:$0xf]  ;;  %v7591_v40 = vld [vmem:[%s7131_s9 + $0x7c] sm:$0xf] }
  0x8e   : > { %v5249_v23 = vcombine.low %v572_v58, %v582_v7  ;;  %v605_v31 = vrot.slane %v603_v17, 5  ;;  %v2820_v38 = vrot.slane %v7345_v59, 5  ;;  %v2823_v1 = vrot.slane %v7352_v9, 5  ;;  %v7594_v55 = vld [vmem:[%s7131_s9 + $0x80] sm:$0x1] }
  0x8f   : > { %v5518_v28 = vrot.slane %v5502_v6, 9  ;;  %6305 = vmatprep.mubr.msk.bf16.mxu0 %vm657_vm3, %v5533_v18  ;;  %v591_v60 = vrot.slane %v590_v21, 4  ;;  %v600_v20 = vor.u32 %v599_v25, %v595_v61  ;;  %v2827_v44 = vrot.slane %v5438_v11, 5  ;;  %v5444_v57 = vld [vmem:[%s7131_s9 + $0x88] sm:$0xf] }
  0x90   : > { %6151 = vmatprep.mubr.msk.bf16.mxu1 %vm657_vm3, %v5249_v23  ;;  %v2830_v34 = vrot.slane %v5439_v8, 5  ;;  %v2821_v45 = vsel %vm7383_vm7, %v5517_v10, %v2820_v38  ;;  %v2822_v59 = vrot.slane %v2820_v38, 4  ;;  %v5267_v62 = vcombine.low %v6913_v51, %v7587_v15  ;;  %v5445_v54 = vld [vmem:[%s7131_s9 + $0x8c] sm:$0x1]  ;;  %v5447_v17 = vld [vmem:[%s7131_s9 + $0x94] sm:$0xf] }
  0x91   : > { %v596_v9 = vsel %vm7157_vm4, %v591_v60, %v595_v61  ;;  %v601_v26 = vrot.slane %v600_v20, 4  ;;  %v2828_v48 = vsel %vm7383_vm7, %v5518_v28, %v2827_v44  ;;  %v2829_v49 = vrot.slane %v2827_v44, 4  ;;  %v5504_v61 = vld [vmem:[%s7131_s9 + $0x84] sm:$0xe]  ;;  %v5505_v23 = vld [vmem:[%s7131_s9 + $0x90] sm:$0xe] }
  0x92   : > { %v2824_v50 = vsel %vm7383_vm7, %v2822_v59, %v2823_v1  ;;  %v5519_v58 = vrot.slane %v5503_v47, 9  ;;  %v2834_v7 = vrot.slane %v7591_v40, 5  ;;  %v2837_v41 = vrot.slane %v7594_v55, 5  ;;  %v5448_v25 = vld [vmem:[%s7131_s9 + $0x98] sm:$0x1] }
  0x93   : > { %v606_v4 = vsel %vm7157_vm4, %v601_v26, %v605_v31  ;;  %v5534_v12 = vcombine.low %v2821_v45, %v2824_v50  ;;  %v2831_v63 = vsel %vm7383_vm7, %v2829_v49, %v2830_v34  ;;  %v5520_v10 = vrot.slane %v5504_v61, 9  ;;  %v5450_v31 = vld [vmem:[%s7131_s9 + $0xa0] sm:$0xf]  ;;  %v5451_v60 = vld [vmem:[%s7131_s9 + $0xa4] sm:$0x1] }
  0x94   : > { %v5250_v2 = vcombine.low %v596_v9, %v606_v4  ;;  %v5535_v6 = vcombine.low %v2828_v48, %v2831_v63  ;;  %v2841_v11 = vrot.slane %v5444_v57, 5  ;;  %v2844_v8 = vrot.slane %v5445_v54, 5  ;;  %v5506_v20 = vld [vmem:[%s7131_s9 + $0x9c] sm:$0xe]  ;;  %v6915_v44 = vld [vmem:[%s7131_s9 + $0xc] sm:$0xf] }
  0x95   : > { %6306 = vmatmul.mubr.msk.bf16.gmra.mrb[12].mxu0 %vm657_vm3, %v5534_v12  ;;  %v2835_v18 = vsel %vm7383_vm7, %v5519_v58, %v2834_v7  ;;  %v2836_v21 = vrot.slane %v2834_v7, 4  ;;  %v2848_v28 = vrot.slane %v5447_v17, 5  ;;  %v7621_v34 = vld [vmem:[%s7131_s9 + $0x10] sm:$0xf]  ;;  %v6917_v47 = vld [vmem:[%s7131_s9 + $0x18] sm:$0xf] }
  0x96   : > { %6152 = vmatmul.mubr.msk.bf16.gmra.mrb[28].mxu1 %vm657_vm3, %v5250_v2  ;;  %6309 = vmatprep.mubr.msk.bf16.mxu0 %vm657_vm3, %v5535_v6  ;;  %v2842_v38 = vsel %vm7383_vm7, %v5520_v10, %v2841_v11  ;;  %v2843_v1 = vrot.slane %v2841_v11, 4  ;;  %v5268_v45 = vcombine.low %v6915_v44, %v7621_v34  ;;  %v7628_v9 = vld [vmem:[%s7131_s9 + $0x1c] sm:$0xf]  ;;  %v5521_v48 = vrot.slane %v5505_v23, 9  ;;  %v5453_v57 = vld [vmem:[%s7131_s9 + $0xac] sm:$0xf] }
  0x97   : > { %6157 = vmatprep.mubr.msk.bf16.mxu1 %vm657_vm3, %v5267_v62  ;;  %v2838_v59 = vsel %vm7383_vm7, %v2836_v21, %v2837_v41  ;;  %v5269_v26 = vcombine.low %v6917_v47, %v7628_v9  ;;  %v2850_v51 = vrot.slane %v2848_v28, 4  ;;  %v2851_v62 = vrot.slane %v5448_v25, 5  ;;  %v6919_v54 = vld [vmem:[%s9064_s1 + $0x8] sm:$0xf]  ;;  %v5456_v2 = vld [vmem:[%s7131_s9 + $0xb8] sm:$0xf] }
  0x98   : > { %v5536_v49 = vcombine.low %v2835_v18, %v2838_v59  ;;  %v2845_v50 = vsel %vm7383_vm7, %v2843_v1, %v2844_v8  ;;  %v5522_v12 = vrot.slane %v5506_v20, 9  ;;  %v2855_v63 = vrot.slane %v5450_v31, 5  ;;  %v7643_v7 = vld [vmem:[%s9064_s1 + $0xc] sm:$0xf]  ;;  %v5454_v10 = vld [vmem:[%s7131_s9 + $0xb0] sm:$0x1] }
  0x99   : > { %v5537_v4 = vcombine.low %v2842_v38, %v2845_v50  ;;  %v2858_v58 = vrot.slane %v5451_v60, 5  ;;  %v1425_v61 = vsel %vm706_vm0, %v6919_v54, 0  ;;  %v2849_v41 = vsel %vm7383_vm7, %v5521_v48, %v2848_v28  ;;  %v5507_v11 = vld [vmem:[%s7131_s9 + $0xa8] sm:$0xe]  ;;  %v5457_v25 = vld [vmem:[%s7131_s9 + $0xbc] sm:$0x1] }
  0x9a   : > { %v2857_v6 = vrot.slane %v2855_v63, 4  ;;  %v2852_v17 = vsel %vm7383_vm7, %v2850_v51, %v2851_v62  ;;  %v2862_v8 = vrot.slane %v5453_v57, 5  ;;  %v2856_v23 = vsel %vm7383_vm7, %v5522_v12, %v2855_v63  ;;  %v5508_v31 = vld [vmem:[%s7131_s9 + $0xb4] sm:$0xe]  ;;  %v6920_v38 = vld [vmem:[%s7131_s9 + $0x24] sm:$0xf] }
  0x9b   : > { %v2869_v21 = vrot.slane %v5456_v2, 5  ;;  %v7664_v1 = vld [vmem:[%s7131_s9 + $0x28] sm:$0xf]  ;;  %v5538_v60 = vcombine.low %v2849_v41, %v2852_v17  ;;  %v5523_v44 = vrot.slane %v5507_v11, 9  ;;  %v2865_v59 = vrot.slane %v5454_v10, 5 }
  0x9c   : > { %v2859_v18 = vsel %vm7383_vm7, %v2857_v6, %v2858_v58  ;;  %v5270_v28 = vcombine.low %v6920_v38, %v7664_v1  ;;  %v6922_v47 = vld [vmem:[%s7131_s9 + $0x30] sm:$0xf]  ;;  %v2872_v51 = vrot.slane %v5457_v25, 5  ;;  %v5459_v62 = vld [vmem:[%s7131_s9 + $0xc4] sm:$0xf]  ;;  %v2257_v25 = vshrl.u32 %v7591_v40, 16 }
  0x9d   : > { %6310 = vmatmul.mubr.msk.bf16.gmra.mrb[16].mxu0 %vm657_vm3, %v5536_v49  ;;  %v5539_v20 = vcombine.low %v2856_v23, %v2859_v18  ;;  %v5524_v49 = vrot.slane %v5508_v31, 9  ;;  %v2871_v50 = vrot.slane %v2869_v21, 4  ;;  %v2863_v57 = vsel %vm7383_vm7, %v5523_v44, %v2862_v8  ;;  %v5509_v12 = vld [vmem:[%s7131_s9 + $0xc0] sm:$0xe]  ;;  %v6924_v41 = vld [vmem:[%s7131_s9 + $0x3c] sm:$0xf] }
  0x9e   : > { %6158 = vmatmul.mubr.msk.bf16.vlgmr.msra.gmra.mrb[0].mxu1 %vm657_vm3, %v5268_v45  ;;  %6313 = vmatprep.mubr.msk.bf16.mxu0 %vm657_vm3, %v5537_v4  ;;  %v2864_v45 = vrot.slane %v2862_v8, 4  ;;  %v2876_v63 = vrot.slane %v5459_v62, 5  ;;  %v5525_v6 = vrot.slane %v5509_v12, 9  ;;  %v7689_v17 = vld [vmem:[%s7131_s9 + $0x40] sm:$0xf]  ;;  %v5273_v18 = vcombine.low %v7296_v27, %v7299_v36  ;;  %v6748_v62 = vld [vmem:[%s7131_s9 + $0x24] sm:$0xff]  }
  0x9f   : > { %6190 = vmatpush3.bf16.msra.mxu1 %v1425_v61  ;;  %6161 = vmatprep.mubr.msk.bf16.mxu1 %vm657_vm3, %v5269_v26  ;;  %v7669_v26 = vld [vmem:[%s7131_s9 + $0x34] sm:$0xf]  ;;  %v2870_v58 = vsel %vm7383_vm7, %v5524_v49, %v2869_v21  ;;  %v2873_v54 = vsel %vm7383_vm7, %v2871_v50, %v2872_v51  ;;  %v5460_v61 = vld [vmem:[%s7131_s9 + $0xc8] sm:$0x1]  ;;  %v5272_v10 = vcombine.low %v6924_v41, %v7689_v17  ;;  %v2253_v21 = vshll.u32 %v7591_v40, 16 }
  0xa0   : > { %6688 = vmatprep.subr.msk.bf16.mxu1 %vm706_vm0, %v7643_v7  ;;  %v5271_v48 = vcombine.low %v6922_v47, %v7669_v26  ;;  %v2866_v4 = vsel %vm7383_vm7, %v2864_v45, %v2865_v59  ;;  %v5541_v11 = vcombine.low %v2870_v58, %v2873_v54  ;;  %v2878_v8 = vrot.slane %v2876_v63, 4  ;;  %v1163_v45 = vld [vmem:[%s7131_s9] sm:$0xe]  ;;  %v1164_v59 = vld [vmem:[%s7131_s9 + $0xc] sm:$0xe] }
  0xa1   : > { %v5540_v2 = vcombine.low %v2863_v57, %v2866_v4  ;;  %v2879_v23 = vrot.slane %v5460_v61, 5  ;;  %v2877_v31 = vsel %vm7383_vm7, %v5525_v6, %v2876_v63  ;;  %v7704_v27 = vrot.slane %v2253_v21, 5  ;;  %v1167_v41 = vld [vmem:[%s7131_s9 + $0x30] sm:$0xe] }
  0xa2   : > { %v2259_v36 = vrot.slane %v2257_v25, 4  ;;  %v5275_v44 = vcombine.low %v7356_v19, %v7362_v35  ;;  %v2263_v47 = vshll.u32 %v7594_v55, 16  ;;  %v5299_v19 = vrot.slane %v1163_v45, 9 }
  0xa3   : > { %v2880_v38 = vsel %vm7383_vm7, %v2878_v8, %v2879_v23  ;;  %9087 = vst [vmem:[#allocation6_spill] sm:$0xff] %v7704_v27  ;;  %v5300_v35 = vrot.slane %v1164_v59, 9  ;;  %v1230_v4 = vrot.slane %v7628_v9, 5  ;;  %v1237_v12 = vrot.slane %v7664_v1, 5  ;;  %v1168_v8 = vld [vmem:[%s7131_s9 + $0x3c] sm:$0xe] }
  0xa4   : > { %v5542_v40 = vcombine.low %v2877_v31, %v2880_v38  ;;  %v2260_v49 = vor.u32 %v2259_v36, %v7704_v27  ;;  %v7724_v51 = vrot.slane %v2263_v47, 5  ;;  %v5276_v58 = vcombine.low %v7377_v0, %v7390_v29  ;;  %v1169_v31 = vld [vmem:[%s7131_s9 + $0x48] sm:$0xe]  ;;  %v6930_v59 = vld [vmem:[%s7131_s9 + $0x38] sm:$0x1] }
  0xa5   : > { %6314 = vmatmul.mubr.msk.bf16.gmra.mrb[20].mxu0 %vm657_vm3, %v5538_v60  ;;  %v5274_v60 = vcombine.low %v7325_v24, %v7331_v37  ;;  %v6927_v24 = vld [vmem:[%s7131_s9 + $0x14] sm:$0x1]  ;;  %v4065_v54 = vsel %vm706_vm0, %v7448_v22, 0  ;;  %v5277_v61 = vcombine.low %v7409_v53, %v7416_v16  ;;  %v5278_v6 = vcombine.low %v7435_v39, %v7443_v43  ;;  %v6928_v16 = vld [vmem:[%s7131_s9 + $0x20] sm:$0x1] }
  0xa6   : > { %6162 = vmatmul.mubr.msk.bf16.gmra.mrb[4].mxu1 %vm657_vm3, %v5270_v28  ;;  %6317 = vmatprep.mubr.msk.bf16.mxu0 %vm657_vm3, %v5539_v20  ;;  %v1223_v28 = vrot.slane %v7621_v34, 5  ;;  %v6746_v20 = vld [vmem:[%s7131_s9 + $0x18] sm:$0xff]   ;;  %v6926_v34 = vld [vmem:[%s7131_s9 + $0x8] sm:$0x1]  ;;  %v1226_v37 = vrot.slane %v6927_v24, 5  ;;  %9088 = vst [vmem:[#allocation7_spill] sm:$0xff] %v7724_v51  ;;  %v5279_v9 = vcombine.low %v7467_v5, %v7479_v30 }
  0xa7   : > { %6165 = vmatprep.mubr.msk.bf16.mxu1 %vm657_vm3, %v5271_v48  ;;  %v1216_v48 = vrot.slane %v7587_v15, 5  ;;  %v1219_v50 = vrot.slane %v6926_v34, 5  ;;  %v1165_v15 = vld [vmem:[%s7131_s9 + $0x18] sm:$0xe]  ;;  %v7729_v63 = vrot.slane %v2260_v49, 4  ;;  %v1233_v22 = vrot.slane %v6928_v16, 5 }
  0xa8   : > { %v1225_v55 = vrot.slane %v1223_v28, 4  ;;  %v5301_v1 = vrot.slane %v1165_v15, 9  ;;  %v7751_v29 = vsel %vm7383_vm7, %v5300_v35, %v1223_v28  ;;  %v1239_v25 = vrot.slane %v1237_v12, 4  ;;  %v5624_v24 = vld [vmem:[%s7131_s9 + $0x18] sm:$0xf] }
  0xa9   : > { %v1218_v57 = vrot.slane %v1216_v48, 4  ;;  %9089 = vst [vmem:[#allocation8_spill] sm:$0xff] %v7729_v63  ;;  %v7747_v0 = vsel %vm7383_vm7, %v5299_v19, %v1216_v48  ;;  %v1247_v47 = vrot.slane %v6930_v59, 5  ;;  %v7788_v49 = vsel %vm706_vm0, %v7643_v7, 0  ;;  %v5625_v7 = vld [vmem:[%s7131_s9 + $0x1c] sm:$0xf] }
  0xaa   : > { %v7755_v53 = vsel %vm7383_vm7, %v1225_v55, %v1226_v37  ;;  %v7792_v34 = vsel %vm7383_vm7, %v5301_v1, %v1230_v4  ;;  %v6752_v37 = vld [vmem:[%s7131_s9 + $0x3c] sm:$0xff]   ;;  %v5304_v35 = vrot.slane %v1168_v8, 9  ;;  %v6931_v55 = vld [vmem:[%s7131_s9 + $0x44] sm:$0x1]  ;;  %v3586_v8 = vshll.u32 %v5624_v24, 16 }
  0xab   : > { %v7766_v23 = vsel %vm7383_vm7, %v1218_v57, %v1219_v50  ;;  %v1170_v50 = vld [vmem:[%s7131_s9 + $0x54] sm:$0xe]  ;;  %v1254_v15 = vrot.slane %v6931_v55, 5  ;;  %v5628_v39 = vld [vmem:[%s7131_s9 + $0x28] sm:$0xf] }
  0xac   : > { %v6938_v5 = vld [vmem:[%s7131_s9 + $0x70] sm:$0xf] }
  0xad   : > { %6318 = vmatmul.mubr.msk.bf16.gmra.mrb[24].mxu0 %vm657_vm3, %v5540_v2  ;;  %v1166_v2 = vld [vmem:[%s7131_s9 + $0x24] sm:$0xe]  ;;  %v1279_v30 = vrot.slane %v6938_v5, 5 }
  0xae   : > { %6166 = vmatmul.mubr.msk.bf16.gmra.mrb[8].mxu1 %vm657_vm3, %v5272_v10  ;;  %6321 = vmatprep.mubr.msk.bf16.mxu0 %vm657_vm3, %v5541_v11  ;;  %v1244_v10 = vrot.slane %v7669_v26, 5  ;;  %v6750_v11 = vld [vmem:[%s7131_s9 + $0x30] sm:$0xff]   ;;  %v7762_v26 = vld [vmem:[%s9064_s1 + $0x20] sm:$0xf]  ;;  %v5302_v21 = vrot.slane %v1166_v2, 9 }
  0xaf   : > { %6169 = vmatprep.mubr.msk.bf16.mxu1 %vm657_vm3, %v5273_v18  ;;  %v1232_v18 = vrot.slane %v1230_v4, 4  ;;  %v1281_v48 = vrot.slane %v1279_v30, 4 }
  0xb0   : > { %v1246_v45 = vrot.slane %v1244_v10, 4  ;;  %v7799_v19 = vsel %vm7383_vm7, %v5302_v21, %v1237_v12  ;;  %v3596_v21 = vshrl.u32 %v5625_v7, 16 }
  0xb1   : > { %v7808_v4 = vsel %vm7383_vm7, %v1232_v18, %v1233_v22  ;;  %v3583_v22 = vshrl.u32 %v5624_v24, 16  ;;  %v3592_v18 = vshll.u32 %v5625_v7, 16  ;;  %v5627_v24 = vld [vmem:[%s7131_s9 + $0x24] sm:$0xf] }
  0xb2   : > { %v7821_v1 = vsel %vm7383_vm7, %v1246_v45, %v1247_v47 }
  0xb3   : > { %v3585_v43 = vrot.slane %v3583_v22, 4  ;;  %v7863_v7 = vrot.slane %v3592_v18, 5  ;;  %v3610_v22 = vshll.u32 %v5627_v24, 16  ;;  %v3620_v18 = vshrl.u32 %v5628_v39, 16 }
  0xb5   : > { %6322 = vmatmul.mubr.msk.bf16.gmra.mrb[28].mxu0 %vm657_vm3, %v5542_v40  ;;  %v6929_v40 = vld [vmem:[%s7131_s9 + $0x2c] sm:$0x1]  ;;  %v3612_v27 = vrot.slane %v3610_v22, 5 }
  0xb6   : > { %6170 = vmatmul.mubr.msk.bf16.gmra.mrb[12].mxu1 %vm657_vm3, %v5274_v60  ;;  %6327 = vmatprep.mubr.msk.bf16.mxu0 %vm657_vm3, %v6746_v20  ;;  %v1240_v28 = vrot.slane %v6929_v40, 5  ;;  %v1251_v60 = vrot.slane %v7689_v17, 5  ;;  %v6934_v40 = vld [vmem:[%s7131_s9 + $0x50] sm:$0x1]  ;;  %v6939_v17 = vld [vmem:[%s7131_s9 + $0x74] sm:$0x1] }
  0xb7   : > { %6173 = vmatprep.mubr.msk.bf16.mxu1 %vm657_vm3, %v5275_v44  ;;  %v5303_v44 = vrot.slane %v1167_v41, 9  ;;  %v5306_v41 = vrot.slane %v1170_v50, 9  ;;  %v1171_v50 = vld [vmem:[%s7131_s9 + $0x60] sm:$0xe]  ;;  %v5629_v20 = vld [vmem:[%s7131_s9 + $0x2c] sm:$0x1] }
  0xb8   : > { %v1253_v12 = vrot.slane %v1251_v60, 4  ;;  %v7834_v45 = vsel %vm7383_vm7, %v5304_v35, %v1251_v60  ;;  %v6935_v35 = vld [vmem:[%s7131_s9 + $0x5c] sm:$0x1] }
  0xb9   : > { %v7817_v2 = vsel %vm7383_vm7, %v5303_v44, %v1244_v10  ;;  %v1268_v55 = vrot.slane %v6935_v35, 5  ;;  %v1172_v35 = vld [vmem:[%s7131_s9 + $0x6c] sm:$0xe] }
  0xba   : > { %v7838_v59 = vsel %vm7383_vm7, %v1253_v12, %v1254_v15  ;;  %v6936_v15 = vld [vmem:[%s7131_s9 + $0x64] sm:$0xf]  ;;  %v3598_v12 = vrot.slane %v3596_v21, 4  ;;  %v5308_v5 = vrot.slane %v1172_v35, 9 }
  0xbb   : > { %v6758_v21 = vld [vmem:[%s7131_s9 + $0x60] sm:$0xff]  }
  0xbd   : > { %6328 = vmatmul.mubr.msk.bf16.vlgmr.msra.gmra.mrb[0].mxu0 %vm657_vm3, %v6748_v62  ;;  %v6932_v62 = vld [vmem:[%s7131_s9 + $0x4c] sm:$0xf] }
  0xbe   : > { %6174 = vmatmul.mubr.msk.bf16.gmra.mrb[16].mxu1 %vm657_vm3, %v5276_v58  ;;  %6360 = vmatpush3.bf16.msra.mxu0 %v4065_v54  ;;  %v1258_v57 = vrot.slane %v6932_v62, 5  ;;  %v7812_v58 = vsel %vm7383_vm7, %v1239_v25, %v1240_v28  ;;  %v5305_v54 = vrot.slane %v1169_v31, 9  ;;  %v1261_v28 = vrot.slane %v6934_v40, 5 }
  0xbf   : > { %6177 = vmatprep.mubr.msk.bf16.mxu1 %vm657_vm3, %v5277_v61  ;;  %6331 = vmatprep.mubr.msk.bf16.mxu0 %vm657_vm3, %v6750_v11  ;;  %v6754_v61 = vld [vmem:[%s7131_s9 + $0x48] sm:$0xff]   ;;  %v6933_v11 = vld [vmem:[%s7131_s9 + $0x58] sm:$0xf]  ;;  %v1272_v62 = vrot.slane %v6936_v15, 5  ;;  %v5631_v15 = vld [vmem:[%s7131_s9 + $0x34] sm:$0xf] }
  0xc0   : > { %6694 = vmatprep.subr.msk.bf16.mxu0 %vm706_vm0, %v7762_v26  ;;  %v1265_v16 = vrot.slane %v6933_v11, 5  ;;  %v1260_v31 = vrot.slane %v1258_v57, 4  ;;  %v7842_v47 = vsel %vm7383_vm7, %v5305_v54, %v1258_v57  ;;  %v5626_v57 = vld [vmem:[%s7131_s9 + $0x20] sm:$0x1]  ;;  %v5630_v54 = vld [vmem:[%s7131_s9 + $0x30] sm:$0xf] }
  0xc1   : > { %v5307_v11 = vrot.slane %v1171_v50, 9  ;;  %v3634_v50 = vshll.u32 %v5630_v54, 16  ;;  %v3602_v25 = vshll.u32 %v5626_v57, 16  ;;  %v3640_v36 = vshll.u32 %v5631_v15, 16 }
  0xc2   : > { %v7853_v60 = vsel %vm7383_vm7, %v5306_v41, %v1265_v16  ;;  %v7869_v41 = vsel %vm7383_vm7, %v1260_v31, %v1261_v28  ;;  %v1274_v31 = vrot.slane %v1272_v62, 4  ;;  %v3631_v28 = vshrl.u32 %v5630_v54, 16 }
  0xc3   : > { %v7911_v35 = vrot.slane %v3640_v36, 5 }
  0xc5   : > { %6332 = vmatmul.mubr.msk.bf16.gmra.mrb[4].mxu0 %vm657_vm3, %v6752_v37  ;;  %v1267_v37 = vrot.slane %v1265_v16, 4  ;;  %v6937_v16 = vld [vmem:[%s7131_s9 + $0x68] sm:$0x1] }
  0xc6   : > { %6178 = vmatmul.mubr.msk.bf16.gmra.mrb[20].mxu1 %vm657_vm3, %v5278_v6  ;;  %6335 = vmatprep.mubr.msk.bf16.mxu0 %vm657_vm3, %v6754_v61  ;;  %v3588_v6 = vrot.slane %v3586_v8, 5  ;;  %v6756_v61 = vld [vmem:[%s7131_s9 + $0x54] sm:$0xff]   ;;  %v1275_v40 = vrot.slane %v6937_v16, 5  ;;  %v3616_v8 = vshll.u32 %v5628_v39, 16  ;;  %v3599_v16 = vor.u32 %v3598_v12, %v7863_v7 }
  0xc7   : > { %6181 = vmatprep.mubr.msk.bf16.mxu1 %vm657_vm3, %v5279_v9  ;;  %v3607_v9 = vshrl.u32 %v5627_v24, 16  ;;  %v7878_v44 = vsel %vm7383_vm7, %v1267_v37, %v1268_v55  ;;  %v1282_v24 = vrot.slane %v6939_v17, 5  ;;  %v3644_v39 = vshrl.u32 %v5631_v15, 16 }
  0xc8   : > { %v3589_v10 = vor.u32 %v3588_v6, %v3585_v43  ;;  %v7884_v37 = vrot.slane %v3616_v8, 5  ;;  %v3622_v55 = vrot.slane %v3620_v18, 4  ;;  %v9090_v43 = vcombine.low %v7488_v52, %v7499_v46  ;;  %v6940_v8 = vld [vmem:[%s7131_s9 + $0x7c] sm:$0xf]  ;;  %v7920_v18 = vld [vmem:[%s7131_s9 + $0x38] sm:$0x1] }
  0xc9   : > { %v3609_v38 = vrot.slane %v3607_v9, 4  ;;  %v7893_v17 = vsel %vm7383_vm7, %v5307_v11, %v1272_v62  ;;  %v7897_v57 = vsel %vm7383_vm7, %v1274_v31, %v1275_v40  ;;  %v3633_v6 = vrot.slane %v3631_v28, 4  ;;  %9092 = vst [vmem:[#allocation9_spill] sm:$0xff] %v7920_v18 }
  0xca   : > { %v3636_v12 = vrot.slane %v3634_v50, 5  ;;  %v9091_v52 = vcombine.low %v7520_v33, %v7525_v56  ;;  %v3590_v46 = vrot.slane %v3589_v10, 4  ;;  %v3600_v54 = vrot.slane %v3599_v16, 4  ;;  %v6760_v33 = vld [vmem:[%s7131_s9 + $0x6c] sm:$0xff]   ;;  %v1174_v16 = vld [vmem:[%s7131_s9 + $0x84] sm:$0xe] }
  0xcb   : > { %v3626_v62 = vshll.u32 %v5629_v20, 16  ;;  %v7905_v11 = vsel %vm7383_vm7, %v5308_v5, %v1279_v30  ;;  %v7909_v40 = vsel %vm7383_vm7, %v1281_v48, %v1282_v24  ;;  %v3646_v9 = vrot.slane %v3644_v39, 4  ;;  %v6761_v48 = vld [vmem:[%s7131_s9 + $0x78] sm:$0xff]  }
  0xcc   : > { %v3613_v10 = vor.u32 %v3612_v27, %v3609_v38  ;;  %v3623_v20 = vor.u32 %v3622_v55, %v7884_v37  ;;  %v1286_v30 = vrot.slane %v6940_v8, 5  ;;  %v3637_v38 = vor.u32 %v3636_v12, %v3633_v6  ;;  %v5633_v5 = vld [vmem:[%s7131_s9 + $0x3c] sm:$0xf] }
  0xcd   : > { %6336 = vmatmul.mubr.msk.bf16.gmra.mrb[8].mxu0 %vm657_vm3, %v6756_v61  ;;  %v3604_v61 = vrot.slane %v3602_v25, 5  ;;  %v1173_v25 = vld [vmem:[%s7131_s9 + $0x78] sm:$0xe]  ;;  %v7936_v50 = vrot.slane %v3626_v62, 5  ;;  %v3647_v39 = vor.u32 %v3646_v9, %v7911_v35  ;;  %v3650_v55 = vshll.u32 %v7920_v18, 16 }
  0xce   : > { %6182 = vmatmul.mubr.msk.bf16.gmra.mrb[24].mxu1 %vm657_vm3, %v9090_v43  ;;  %6339 = vmatprep.mubr.msk.bf16.mxu0 %vm657_vm3, %v6758_v21  ;;  %v3595_v21 = vsel %vm7157_vm4, %v3590_v46, %v7863_v7  ;;  %v5309_v24 = vrot.slane %v1173_v25, 9  ;;  %v6941_v43 = vld [vmem:[%s7131_s9 + $0x88] sm:$0xf]  ;;  %v7944_v7 = vld [vmem:[%s7131_s9 + $0x40] sm:$0xf]  ;;  %v3614_v12 = vrot.slane %v3613_v10, 4  ;;  %v9094_v62 = vcombine.low %v7540_v14, %v7549_v42 }
  0xcf   : > { %6185 = vmatprep.mubr.msk.bf16.mxu1 %vm657_vm3, %v9091_v52  ;;  %v3605_v31 = vsel %vm7157_vm4, %v3600_v54, %v3604_v61  ;;  %v1293_v6 = vrot.slane %v6941_v43, 5  ;;  %9093 = vst [vmem:[#allocation10_spill] sm:$0xff] %v7944_v7  ;;  %v3624_v52 = vrot.slane %v3623_v20, 4  ;;  %v1288_v46 = vrot.slane %v1286_v30, 4  ;;  %v6942_v54 = vld [vmem:[%s7131_s9 + $0x80] sm:$0x1] }
  0xd0   : > { %v1289_v61 = vrot.slane %v6942_v54, 5  ;;  %v3638_v9 = vrot.slane %v3637_v38, 4  ;;  %v5310_v25 = vrot.slane %v1174_v16, 9  ;;  %v3655_v8 = vshrl.u32 %v5633_v5, 16  ;;  %v6762_v10 = vld [vmem:[%s7131_s9 + $0x84] sm:$0xff]  }
  0xd1   : > { %v3658_v43 = vshll.u32 %v5633_v5, 16  ;;  %v7958_v20 = vcombine.low %v3595_v21, %v3605_v31  ;;  %v7962_v14 = vsel %vm706_vm0, %v7762_v26, 0  ;;  %v3668_v38 = vshrl.u32 %v7944_v7, 16  ;;  %v6763_v21 = vld [vmem:[%s7131_s9 + $0x90] sm:$0xff]   ;;  %v6947_v18 = vld [vmem:[%s7131_s9 + $0xa0] sm:$0xf] }
  0xd2   : > { %v3648_v16 = vrot.slane %v3647_v39, 4  ;;  %v3652_v5 = vrot.slane %v3650_v55, 5  ;;  %v1295_v54 = vrot.slane %v1293_v6, 4  ;;  %v3619_v31 = vsel %vm7157_vm4, %v3614_v12, %v7884_v37 }
  0xd3   : > { %v3629_v26 = vsel %vm7157_vm4, %v3624_v52, %v7936_v50  ;;  %v7977_v39 = vsel %vm7383_vm7, %v5309_v24, %v1286_v30  ;;  %v7981_v55 = vsel %vm7383_vm7, %v1288_v46, %v1289_v61  ;;  %v3643_v37 = vsel %vm7157_vm4, %v3638_v9, %v7911_v35  ;;  %v5639_v30 = vld [vmem:[%s7131_s9 + $0x54] sm:$0xf]  ;;  %v7998_v24 = vld [vmem:[%s7131_s9 + $0x58] sm:$0xf]  ;;  %v8003_v61 = vld [vmem:[%s7131_s9 + $0x90] sm:$0xe] }
  0xd4   : > { %v7994_v12 = vsel %vm7383_vm7, %v5310_v25, %v1293_v6  ;;  %v3657_v50 = vrot.slane %v3655_v8, 4  ;;  %v3660_v52 = vrot.slane %v3658_v43, 5  ;;  %v3670_v46 = vrot.slane %v3668_v38, 4 }
  0xd5   : > { %6340 = vmatmul.mubr.msk.bf16.gmra.mrb[12].mxu0 %vm657_vm3, %v6760_v33  ;;  %v9095_v33 = vcombine.low %v7747_v0, %v7766_v23  ;;  %v6943_v0 = vld [vmem:[%s7131_s9 + $0x8c] sm:$0x1]  ;;  %v3653_v36 = vsel %vm7157_vm4, %v3648_v16, %v3652_v5  ;;  %v3703_v25 = vshrl.u32 %v5639_v30, 16  ;;  %v3706_v8 = vshll.u32 %v5639_v30, 16 }
  0xd6   : > { %6186 = vmatmul.mubr.msk.bf16.gmra.mrb[28].mxu1 %vm657_vm3, %v9094_v62  ;;  %6343 = vmatprep.mubr.msk.bf16.mxu0 %vm657_vm3, %v6761_v48  ;;  %v3664_v48 = vshll.u32 %v7944_v7, 16  ;;  %v1296_v23 = vrot.slane %v6943_v0, 5  ;;  %v5636_v62 = vld [vmem:[%s7131_s9 + $0x48] sm:$0xf]  ;;  %v7987_v0 = vld [vmem:[%s7131_s9 + $0x4c] sm:$0xf]  ;;  %v9097_v38 = vcombine.low %v7751_v29, %v7755_v53  ;;  %v8021_v16 = vcombine.low %v3619_v31, %v3629_v26 }
  0xd7   : > { %6191 = vmatprep.mubr.msk.bf16.mxu1 %vm657_vm3, %v9095_v33  ;;  %v7984_v33 = vld [vmem:[%s7131_s9 + $0x44] sm:$0x1]  ;;  %v3679_v27 = vshrl.u32 %v5636_v62, 16  ;;  %v3682_v15 = vshll.u32 %v5636_v62, 16  ;;  %v3688_v6 = vshll.u32 %v7987_v0, 16  ;;  %v3692_v9 = vshrl.u32 %v7987_v0, 16 }
  0xd8   : > { %9096 = vst [vmem:[#allocation11_spill] sm:$0xff] %v7984_v33  ;;  %v8000_v28 = vrot.slane %v3664_v48, 5  ;;  %v8009_v35 = vsel %vm7383_vm7, %v1295_v54, %v1296_v23  ;;  %v3712_v43 = vshll.u32 %v7998_v24, 16  ;;  %v3716_v48 = vshrl.u32 %v7998_v24, 16  ;;  %v5642_v31 = vld [vmem:[%s7131_s9 + $0x60] sm:$0xf] }
  0xd9   : > { %v3674_v5 = vshll.u32 %v7984_v33, 16  ;;  %v5311_v54 = vrot.slane %v8003_v61, 9  ;;  %v9098_v23 = vcombine.low %v7792_v34, %v7808_v4  ;;  %v8032_v29 = vcombine.low %v3643_v37, %v3653_v36  ;;  %v6764_v26 = vld [vmem:[%s7131_s9 + $0x9c] sm:$0xff]   ;;  %v6765_v30 = vld [vmem:[%s7131_s9 + $0xa8] sm:$0xff]   ;;  %v6944_v36 = vld [vmem:[%s9064_s1 + $0x10] sm:$0xf] }
  0xda   : > { %v3661_v53 = vor.u32 %v3660_v52, %v3657_v50  ;;  %v3681_v62 = vrot.slane %v3679_v27, 4  ;;  %v8043_v34 = vrot.slane %v3688_v6, 5  ;;  %v3694_v4 = vrot.slane %v3692_v9, 4  ;;  %v6945_v6 = vld [vmem:[%s7131_s9 + $0x94] sm:$0xf] }
  0xdb   : > { %v3705_v27 = vrot.slane %v3703_v25, 4  ;;  %v3708_v37 = vrot.slane %v3706_v8, 5  ;;  %v8052_v50 = vrot.slane %v3712_v43, 5  ;;  %v3718_v52 = vrot.slane %v3716_v48, 4  ;;  %v8058_v9 = vld [vmem:[%s7131_s9 + $0x64] sm:$0xf] }
  0xdc   : > { %9099 = vst [vmem:[#allocation12_spill] sm:$0xff] %v8058_v9  ;;  %v3727_v61 = vshrl.u32 %v5642_v31, 16  ;;  %v8060_v22 = vrot.slane %v3661_v53, 4  ;;  %v1307_v25 = vrot.slane %v6947_v18, 5  ;;  %v3695_v43 = vor.u32 %v3694_v4, %v8043_v34 }
  0xdd   : > { %6344 = vmatmul.mubr.msk.bf16.gmra.mrb[16].mxu0 %vm657_vm3, %v6762_v10  ;;  %v3730_v10 = vshll.u32 %v5642_v31, 16  ;;  %v3709_v31 = vor.u32 %v3708_v37, %v3705_v27  ;;  %v3719_v53 = vor.u32 %v3718_v52, %v8052_v50  ;;  %v9100_v18 = vcombine.low %v7799_v19, %v7812_v58  ;;  %v6766_v37 = vld [vmem:[%s7131_s9 + $0xb4] sm:$0xff]  }
  0xde   : > { %6192 = vmatmul.mubr.msk.bf16.vlgmr.msra.gmra.mrb[0].mxu1 %vm657_vm3, %v9097_v38  ;;  %6347 = vmatprep.mubr.msk.bf16.mxu0 %vm657_vm3, %v6763_v21  ;;  %v3684_v21 = vrot.slane %v3682_v15, 5  ;;  %v8041_v38 = vld [vmem:[%s7131_s9 + $0x50] sm:$0x1]  ;;  %v8050_v15 = vld [vmem:[%s7131_s9 + $0x5c] sm:$0x1]  ;;  %v9101_v27 = vcombine.low %v7817_v2, %v7821_v1  ;;  %v1309_v52 = vrot.slane %v1307_v25, 4 }
  0xdf   : > { %6224 = vmatpush3.bf16.msra.mxu1 %v7788_v49  ;;  %6195 = vmatprep.mubr.msk.bf16.mxu1 %vm657_vm3, %v9098_v23  ;;  %v3671_v49 = vor.u32 %v3670_v46, %v8000_v28  ;;  %v8054_v46 = vrot.slane %v3674_v5, 5  ;;  %v1300_v23 = vrot.slane %v6945_v6, 5  ;;  %v3698_v48 = vshll.u32 %v8041_v38, 16  ;;  %v1176_v5 = vld [vmem:[%s7131_s9 + $0x9c] sm:$0xe] }
  0xe0   : > { %6690 = vmatprep.subr.msk.bf16.mxu1 %vm706_vm0, %v6944_v36  ;;  %v6946_v36 = vld [vmem:[%s7131_s9 + $0x98] sm:$0x1]  ;;  %v3685_v7 = vor.u32 %v3684_v21, %v3681_v62  ;;  %v3722_v6 = vshll.u32 %v8050_v15, 16  ;;  %v3740_v62 = vshrl.u32 %v8058_v9, 16  ;;  %v3732_v4 = vrot.slane %v3730_v10, 5 }
  0xe1   : > { %v1303_v33 = vrot.slane %v6946_v36, 5  ;;  %v3672_v8 = vrot.slane %v3671_v49, 4  ;;  %v3736_v36 = vshll.u32 %v8058_v9, 16  ;;  %v8079_v21 = vsel %vm7383_vm7, %v5311_v54, %v1300_v23  ;;  %v8090_v2 = vld [vmem:[%s7131_s9 + $0x68] sm:$0x1] }
  0xe2   : > { %v3729_v49 = vrot.slane %v3727_v61, 4  ;;  %v3686_v19 = vrot.slane %v3685_v7, 4  ;;  %v5312_v58 = vrot.slane %v1176_v5, 9  ;;  %v3696_v3 = vrot.slane %v3695_v43, 4  ;;  %9102 = vst [vmem:[#allocation13_spill] sm:$0xff] %v8090_v2  ;;  %v6767_v5 = vld [vmem:[%s7131_s9 + $0xc0] sm:$0xff]  }
  0xe3   : > { %v3700_v54 = vrot.slane %v3698_v48, 5  ;;  %v3724_v63 = vrot.slane %v3722_v6, 5  ;;  %v1314_v61 = vrot.slane %v7525_v56, 5  ;;  %v3710_v10 = vrot.slane %v3709_v31, 4  ;;  %v1178_v31 = vld [vmem:[%s7131_s9 + $0xb4] sm:$0xe] }
  0xe4   : > { %v3720_v51 = vrot.slane %v3719_v53, 4  ;;  %v8092_v1 = vrot.slane %v3736_v36, 5  ;;  %v3742_v7 = vrot.slane %v3740_v62, 4  ;;  %v3667_v43 = vsel %vm7157_vm4, %v8060_v22, %v8000_v28  ;;  %v6949_v62 = vld [vmem:[%s7131_s9 + $0xb0] sm:$0x1] }
  0xe5   : > { %6348 = vmatmul.mubr.msk.bf16.gmra.mrb[20].mxu0 %vm657_vm3, %v6764_v26  ;;  %v1302_v26 = vrot.slane %v1300_v23, 4  ;;  %v1177_v23 = vld [vmem:[%s7131_s9 + $0xa8] sm:$0xe]  ;;  %v3677_v48 = vsel %vm7157_vm4, %v3672_v8, %v8054_v46  ;;  %v3733_v6 = vor.u32 %v3732_v4, %v3729_v49  ;;  %v3691_v53 = vsel %vm7157_vm4, %v3686_v19, %v8043_v34  ;;  %v5645_v46 = vld [vmem:[%s7131_s9 + $0x6c] sm:$0xf] }
  0xe6   : > { %6196 = vmatmul.mubr.msk.bf16.gmra.mrb[4].mxu1 %vm657_vm3, %v9100_v18  ;;  %6351 = vmatprep.mubr.msk.bf16.mxu0 %vm657_vm3, %v6765_v30  ;;  %v6948_v18 = vld [vmem:[%s7131_s9 + $0xa4] sm:$0x1]  ;;  %v8112_v36 = vsel %vm7383_vm7, %v5312_v58, %v1307_v25  ;;  %v5313_v28 = vrot.slane %v1177_v23, 9  ;;  %v1316_v8 = vrot.slane %v1314_v61, 4  ;;  %v3746_v49 = vshll.u32 %v8090_v2, 16 }
  0xe7   : > { %6199 = vmatprep.mubr.msk.bf16.mxu1 %vm657_vm3, %v9101_v27  ;;  %v1310_v30 = vrot.slane %v6948_v18, 5  ;;  %v8104_v56 = vsel %vm7383_vm7, %v1302_v26, %v1303_v33  ;;  %v3701_v33 = vsel %vm7157_vm4, %v3696_v3, %v3700_v54  ;;  %v1317_v26 = vrot.slane %v6949_v62, 5  ;;  %v5648_v18 = vld [vmem:[%s7131_s9 + $0x78] sm:$0xf]  ;;  %v8167_v54 = vld [vmem:[%s7131_s9 + $0xbc] sm:$0x1] }
  0xe8   : > { %v3715_v34 = vsel %vm7157_vm4, %v3710_v10, %v8052_v50  ;;  %v3725_v25 = vsel %vm7157_vm4, %v3720_v51, %v3724_v63  ;;  %v3743_v4 = vor.u32 %v3742_v7, %v8092_v1  ;;  %v5314_v27 = vrot.slane %v1178_v31, 9  ;;  %v8141_v51 = vld [vmem:[%s7131_s9 + $0x70] sm:$0xf]  ;;  %v8171_v10 = vld [vmem:[%s7131_s9 + $0x7c] sm:$0xf] }
  0xe9   : > { %v8116_v22 = vsel %vm7383_vm7, %v1309_v52, %v1310_v30  ;;  %v9104_v3 = vcombine.low %v7834_v45, %v7838_v59  ;;  %v8137_v19 = vrot.slane %v3733_v6, 4  ;;  %v1321_v50 = vrot.slane %v7549_v42, 5  ;;  %9105 = vst [vmem:[#allocation15_spill] sm:$0xff] %v8141_v51  ;;  %9107 = vst [vmem:[#allocation16_spill] sm:$0xff] %v8171_v10  ;;  %v5651_v7 = vld [vmem:[%s7131_s9 + $0x84] sm:$0xf] }
  0xea   : > { %9103 = vst [vmem:[#allocation14_spill] sm:$0xff] %v8116_v22  ;;  %v3751_v63 = vshrl.u32 %v5645_v46, 16  ;;  %v9106_v45 = vcombine.low %v7842_v47, %v7869_v41  ;;  %v8149_v58 = vcombine.low %v3691_v53, %v3701_v33  ;;  %v8155_v42 = vsel %vm7383_vm7, %v5313_v28, %v1314_v61  ;;  %v6768_v61 = vld [vmem:[%s7131_s9 + $0xcc] sm:$0xff]   ;;  %v8183_v31 = vld [vmem:[%s7131_s9 + $0x88] sm:$0xf] }
  0xeb   : > { %v8158_v30 = vcombine.low %v3715_v34, %v3725_v25  ;;  %v8162_v47 = vsel %vm7383_vm7, %v1316_v8, %v1317_v26  ;;  %v8164_v41 = vrot.slane %v3746_v49, 5  ;;  %v3760_v6 = vshll.u32 %v8141_v51, 16  ;;  %9108 = vst [vmem:[#allocation17_spill] sm:$0xff] %v8183_v31  ;;  %v5654_v62 = vld [vmem:[%s7131_s9 + $0x90] sm:$0xf] }
  0xec   : > { %v8189_v28 = vrot.slane %v1321_v50, 4  ;;  %v8191_v33 = vrot.slane %v3751_v63, 4  ;;  %v3764_v8 = vshrl.u32 %v8141_v51, 16  ;;  %v3775_v26 = vshrl.u32 %v5648_v18, 16  ;;  %v8198_v25 = vld [vmem:[%s7131_s9 + $0x94] sm:$0xf] }
  0xed   : > { %6352 = vmatmul.mubr.msk.bf16.gmra.mrb[24].mxu0 %vm657_vm3, %v6766_v37  ;;  %v8135_v37 = vcombine.low %v3667_v43, %v3677_v48  ;;  %v8179_v43 = vsel %vm7383_vm7, %v5314_v27, %v1321_v50  ;;  %v3754_v48 = vshll.u32 %v5645_v46, 16  ;;  %v3778_v49 = vshll.u32 %v5648_v18, 16  ;;  %9109 = vst [vmem:[#allocation18_spill] sm:$0xff] %v8198_v25  ;;  %v8236_v2 = vld [vmem:[%s7131_s9 + $0x8c] sm:$0x1] }
  0xee   : > { %6200 = vmatmul.mubr.msk.bf16.gmra.mrb[8].mxu1 %vm657_vm3, %v9104_v3  ;;  %6355 = vmatprep.mubr.msk.bf16.mxu0 %vm657_vm3, %v6767_v5  ;;  %v8175_v5 = vrot.slane %v3743_v4, 4  ;;  %v3784_v46 = vshll.u32 %v8171_v10, 16  ;;  %v3788_v34 = vshrl.u32 %v8171_v10, 16  ;;  %v3799_v4 = vshrl.u32 %v5651_v7, 16 }
  0xef   : > { %6203 = vmatprep.mubr.msk.bf16.mxu1 %vm657_vm3, %v9106_v45  ;;  %v3802_v27 = vshll.u32 %v5651_v7, 16  ;;  %v3808_v3 = vshll.u32 %v8183_v31, 16  ;;  %v3812_v50 = vshrl.u32 %v8183_v31, 16  ;;  %v8208_v45 = vld [vmem:[%s7131_s9 + $0x74] sm:$0x1]  ;;  %v3756_v18 = vrot.slane %v3754_v48, 5 }
  0xf0   : > { %v3823_v52 = vshrl.u32 %v5654_v62, 16  ;;  %v3826_v53 = vshll.u32 %v5654_v62, 16  ;;  %v9110_v7 = vcombine.low %v7853_v60, %v7878_v44  ;;  %v3766_v59 = vrot.slane %v3764_v8, 4  ;;  %v5657_v48 = vld [vmem:[%s7131_s9 + $0x9c] sm:$0xf] }
  0xf1   : > { %v3832_v63 = vshll.u32 %v8198_v25, 16  ;;  %v3836_v23 = vshrl.u32 %v8198_v25, 16  ;;  %v9111_v62 = vcombine.low %v7893_v17, %v7897_v57  ;;  %v8226_v44 = vld [vmem:[%s7131_s9 + $0x80] sm:$0x1]  ;;  %v3777_v60 = vrot.slane %v3775_v26, 4 }
  0xf2   : > { %9112 = vst [vmem:[#allocation19_spill] sm:$0xff] %v8226_v44  ;;  %v3801_v31 = vrot.slane %v3799_v4, 4  ;;  %v3804_v8 = vrot.slane %v3802_v27, 5  ;;  %v8230_v10 = vrot.slane %v3808_v3, 5  ;;  %v3814_v51 = vrot.slane %v3812_v50, 4 }
  0xf3   : > { %v8233_v25 = vld [vmem:[%s7131_s9 + $0xa0] sm:$0xf]  ;;  %v3825_v17 = vrot.slane %v3823_v52, 4  ;;  %v3828_v57 = vrot.slane %v3826_v53, 5  ;;  %v3850_v9 = vshll.u32 %v5657_v48, 16  ;;  %v3757_v26 = vor.u32 %v3756_v18, %v8191_v33 }
  0xf4   : > { %v3794_v27 = vshll.u32 %v8226_v44, 16  ;;  %v8245_v3 = vld [vmem:[%s7131_s9 + $0x98] sm:$0x1]  ;;  %v3856_v50 = vshll.u32 %v8233_v25, 16  ;;  %v3860_v52 = vshrl.u32 %v8233_v25, 16  ;;  %v3805_v22 = vor.u32 %v3804_v8, %v3801_v31 }
  0xf5   : > { %6356 = vmatmul.mubr.msk.bf16.gmra.mrb[28].mxu0 %vm657_vm3, %v6768_v61  ;;  %v8216_v61 = vrot.slane %v3760_v6, 5  ;;  %v3790_v6 = vrot.slane %v3788_v34, 4  ;;  %v3838_v34 = vrot.slane %v3836_v23, 4  ;;  %v3818_v33 = vshll.u32 %v8236_v2, 16 }
  0xf6   : > { %6204 = vmatmul.mubr.msk.bf16.gmra.mrb[12].mxu1 %vm657_vm3, %v9110_v7  ;;  %6361 = vmatprep.mubr.msk.bf16.mxu0 %vm657_vm3, %v7958_v20  ;;  %v3780_v7 = vrot.slane %v3778_v49, 5  ;;  %v8228_v20 = vrot.slane %v3784_v46, 5  ;;  %v3770_v49 = vshll.u32 %v8208_v45, 16  ;;  %v8240_v46 = vrot.slane %v3832_v63, 5 }
  0xf7   : > { %6207 = vmatprep.mubr.msk.bf16.mxu1 %vm657_vm3, %v9111_v62  ;;  %v3847_v62 = vshrl.u32 %v5657_v48, 16  ;;  %v3767_v4 = vor.u32 %v3766_v59, %v8216_v61  ;;  %v3815_v23 = vor.u32 %v3814_v51, %v8230_v10  ;;  %v3829_v59 = vor.u32 %v3828_v57, %v3825_v17  ;;  %v8278_v57 = vld [vmem:[%s7131_s9 + $0xa4] sm:$0x1] }
  0xf8   : > { %v3781_v53 = vor.u32 %v3780_v7, %v3777_v60  ;;  %v3791_v48 = vor.u32 %v3790_v6, %v8228_v20  ;;  %v3852_v18 = vrot.slane %v3850_v9, 5  ;;  %v9113_v44 = vcombine.low %v7905_v11, %v7909_v40 }
  0xf9   : > { %v3849_v63 = vrot.slane %v3847_v62, 4  ;;  %v9114_v31 = vrot.slane %v8167_v54, 5  ;;  %v3772_v51 = vrot.slane %v3770_v49, 5  ;;  %v3839_v60 = vor.u32 %v3838_v34, %v8240_v46  ;;  %v8281_v34 = vld [vmem:[%s7131_s9 + $0xac] sm:$0xf] }
  0xfa   : > { %v3842_v9 = vshll.u32 %v8245_v3, 16  ;;  %v9115_v11 = vcombine.low %v7977_v39, %v7981_v55  ;;  %v3758_v40 = vrot.slane %v3757_v26, 4  ;;  %v8274_v54 = vrot.slane %v3856_v50, 5 }
  0xfb   : > { %v3782_v7 = vrot.slane %v3781_v53, 4  ;;  %v3792_v6 = vrot.slane %v3791_v48, 4  ;;  %v3796_v8 = vrot.slane %v3794_v27, 5  ;;  %v3820_v17 = vrot.slane %v3818_v33, 5  ;;  %v8291_v48 = vld [vmem:[%s7131_s9 + $0xb0] sm:$0x1] }
  0xfc   : > { %v3806_v39 = vrot.slane %v3805_v22, 4  ;;  %v3816_v55 = vrot.slane %v3815_v23, 4  ;;  %v3830_v62 = vrot.slane %v3829_v59, 4  ;;  %v3853_v49 = vor.u32 %v3852_v18, %v3849_v63 }
  0xfd   : > { %6362 = vmatmul.mubr.msk.bf16.vlgmr.msra.gmra.mrb[0].mxu0 %vm657_vm3, %v8021_v16  ;;  %v8264_v16 = vsel %vm7383_vm7, %v8189_v28, %v9114_v31  ;;  %v3862_v28 = vrot.slane %v3860_v52, 4  ;;  %v3844_v26 = vrot.slane %v3842_v9, 5  ;;  %v3763_v52 = vsel %vm7157_vm4, %v3758_v40, %v8216_v61 }
  0xfe   : > { %6208 = vmatmul.mubr.msk.bf16.gmra.mrb[16].mxu1 %vm657_vm3, %v9113_v44  ;;  %6394 = vmatpush3.bf16.msra.mxu0 %v7962_v14  ;;  %v3768_v14 = vrot.slane %v3767_v4, 4  ;;  %v5660_v44 = vld [vmem:[%s7131_s9 + $0xa8] sm:$0xf]  ;;  %v3866_v22 = vshll.u32 %v8278_v57, 16  ;;  %v3787_v33 = vsel %vm7157_vm4, %v3782_v7, %v8228_v20  ;;  %v3797_v23 = vsel %vm7157_vm4, %v3792_v6, %v3796_v8 }
  0xff   : > { %6211 = vmatprep.mubr.msk.bf16.mxu1 %vm657_vm3, %v9115_v11  ;;  %6365 = vmatprep.mubr.msk.bf16.mxu0 %vm657_vm3, %v8032_v29  ;;  %v3840_v29 = vrot.slane %v3839_v60, 4  ;;  %v3871_v4 = vshrl.u32 %v5660_v44, 16  ;;  %v3874_v50 = vshll.u32 %v5660_v44, 16  ;;  %v3863_v53 = vor.u32 %v3862_v28, %v8274_v54  ;;  %v5709_v11 = vld [vmem:[%s7131_s9 + $0x48] sm:$0xe] }
 0x100   : > { %v3773_v27 = vsel %vm7157_vm4, %v3768_v14, %v3772_v51  ;;  %v3880_v59 = vshll.u32 %v8281_v34, 16  ;;  %v3884_v61 = vshrl.u32 %v8281_v34, 16  ;;  %v3811_v63 = vsel %vm7157_vm4, %v3806_v39, %v8230_v10  ;;  %v8356_v39 = vld [vmem:[%s7131_s9 + $0xb8] sm:$0xf] }
 0x101   : > { %v3821_v18 = vsel %vm7157_vm4, %v3816_v55, %v3820_v17  ;;  %v3835_v20 = vsel %vm7157_vm4, %v3830_v62, %v8240_v46  ;;  %v3854_v31 = vrot.slane %v3853_v49, 4  ;;  %v9116_v51 = vcombine.low %v7994_v12, %v8009_v35 }
 0x102   : > { %v3873_v10 = vrot.slane %v3871_v4, 4  ;;  %v3876_v60 = vrot.slane %v3874_v50, 5  ;;  %v3890_v9 = vshll.u32 %v8291_v48, 16  ;;  %v9117_v46 = vcombine.low %v8079_v21, %v8104_v56  ;;  %v5663_v21 = vld [vmem:[%s7131_s9 + $0xb4] sm:$0xf] }
 0x103   : > { %v5330_v12 = vcombine.low %v8155_v42, %v8162_v47  ;;  %v9118_v35 = vsel %vm7157_vm4, %v8175_v5, %v8164_v41  ;;  %v3864_v14 = vrot.slane %v3863_v53, 4  ;;  %v3868_v28 = vrot.slane %v3866_v22, 5  ;;  %v5711_v4 = vld [vmem:[%s7131_s9 + $0x60] sm:$0xe]  ;;  %v5712_v53 = vld [vmem:[%s7131_s9 + $0x6c] sm:$0xe] }
 0x104   : > { %v5331_v56 = vcombine.low %v8179_v43, %v8264_v16  ;;  %v8339_v44 = vcombine.low %v3763_v52, %v3773_v27  ;;  %v8341_v42 = vrot.slane %v3880_v59, 5  ;;  %v3886_v47 = vrot.slane %v3884_v61, 4  ;;  %v9127_v16 = vld [vmem:[#allocation7_spill] sm:$0xff] }
 0x105   : > { %6366 = vmatmul.mubr.msk.bf16.gmra.mrb[4].mxu0 %vm657_vm3, %v8135_v37  ;;  %v3845_v37 = vsel %vm7157_vm4, %v3840_v29, %v3844_v26  ;;  %v8343_v41 = vcombine.low %v3787_v33, %v3797_v23  ;;  %v8345_v5 = vcombine.low %v3811_v63, %v3821_v18  ;;  %v3859_v6 = vsel %vm7157_vm4, %v3854_v31, %v8274_v54  ;;  %v9120_v23 = vld [vmem:[#allocation14_spill] sm:$0xff]  ;;  %v5666_v63 = vld [vmem:[%s7131_s9 + $0xc0] sm:$0xf]  ;;  %v9122_v18 = vld [vmem:[#allocation12_spill] sm:$0xff] }
 0x106   : > { %6212 = vmatmul.mubr.msk.bf16.gmra.mrb[20].mxu1 %vm657_vm3, %v9116_v51  ;;  %6369 = vmatprep.mubr.msk.bf16.mxu0 %vm657_vm3, %v8149_v58  ;;  %v9119_v58 = vsel %vm7157_vm4, %v8137_v19, %v8092_v1  ;;  %v8347_v7 = vcombine.low %v3835_v20, %v3845_v37  ;;  %v5725_v1 = vrot.slane %v5709_v11, 9  ;;  %v5710_v19 = vld [vmem:[%s7131_s9 + $0x54] sm:$0xe]  ;;  %v3877_v8 = vor.u32 %v3876_v60, %v3873_v10 }
 0x107   : > { %6215 = vmatprep.mubr.msk.bf16.mxu1 %vm657_vm3, %v9117_v46  ;;  %v5679_v40 = vcombine.low %v9119_v58, %v9118_v35  ;;  %v8353_v17 = vrot.slane %v3890_v9, 5  ;;  %v3895_v55 = vshrl.u32 %v5663_v21, 16  ;;  %v3869_v62 = vsel %vm7157_vm4, %v3864_v14, %v3868_v28  ;;  %v9123_v31 = vld [vmem:[#allocation13_spill] sm:$0xff]  ;;  %v9124_v9 = vld [vmem:[#allocation15_spill] sm:$0xff]  ;;  %v8405_v35 = vld [vmem:[%s7131_s9 + $0xbc] sm:$0x1] }
 0x108   : > { %v3898_v49 = vshll.u32 %v5663_v21, 16  ;;  %v4354_v29 = vrot.slane %v7987_v0, 5  ;;  %v4357_v26 = vrot.slane %v8041_v38, 5  ;;  %v3887_v50 = vor.u32 %v3886_v47, %v8341_v42  ;;  %v8408_v58 = vld [vmem:[%s7131_s9 + $0xc4] sm:$0xf] }
 0x109   : > { %v5726_v52 = vrot.slane %v5710_v19, 9  ;;  %v4361_v54 = vrot.slane %v7998_v24, 5  ;;  %v4364_v27 = vrot.slane %v8050_v15, 5  ;;  %v3904_v22 = vshll.u32 %v8356_v39, 16  ;;  %v5713_v19 = vld [vmem:[%s7131_s9 + $0x78] sm:$0xe] }
 0x10a   : > { %v3908_v33 = vshrl.u32 %v8356_v39, 16  ;;  %v8373_v0 = vsel %vm7383_vm7, %v5725_v1, %v4354_v29  ;;  %v4356_v38 = vrot.slane %v4354_v29, 4  ;;  %v9121_v59 = vcombine.low %v8112_v36, %v9120_v23  ;;  %v9125_v23 = vld [vmem:[#allocation16_spill] sm:$0xff] }
 0x10b   : > { %v8380_v24 = vcombine.low %v3859_v6, %v3869_v62  ;;  %v8384_v15 = vsel %vm7383_vm7, %v5726_v52, %v4361_v54  ;;  %v5727_v61 = vrot.slane %v5711_v4, 9  ;;  %v4368_v20 = vrot.slane %v9122_v18, 5  ;;  %v6769_v6 = vld [vmem:[%s7131_s9 + $0xc] sm:$0xff]  }
 0x10c   : > { %v8390_v36 = vsel %vm7383_vm7, %v4356_v38, %v4357_v26  ;;  %v4371_v51 = vrot.slane %v9123_v31, 5  ;;  %v5728_v37 = vrot.slane %v5712_v53, 9  ;;  %v4375_v11 = vrot.slane %v9124_v9, 5 }
 0x10d   : > { %6370 = vmatmul.mubr.msk.bf16.gmra.mrb[8].mxu0 %vm657_vm3, %v8158_v30  ;;  %v4363_v30 = vrot.slane %v4361_v54, 4  ;;  %v5742_v10 = vcombine.low %v8373_v0, %v8390_v36  ;;  %v4378_v46 = vrot.slane %v8208_v45, 5  ;;  %v8414_v14 = vsel %vm7383_vm7, %v5727_v61, %v4368_v20 }
 0x10e   : > { %6216 = vmatmul.mubr.msk.bf16.gmra.mrb[24].mxu1 %vm657_vm3, %v9121_v59  ;;  %6373 = vmatprep.mubr.msk.bf16.mxu0 %vm657_vm3, %v5679_v40  ;;  %v4370_v28 = vrot.slane %v4368_v20, 4  ;;  %v8416_v21 = vrot.slane %v3895_v55, 4  ;;  %v3919_v47 = vshrl.u32 %v5666_v63, 16  ;;  %v8420_v45 = vsel %vm7383_vm7, %v5728_v37, %v4375_v11  ;;  %v5440_v55 = vld [vmem:[%s7131_s9 + $0x78] sm:$0xf]  ;;  %v9126_v59 = vld [vmem:[#allocation19_spill] sm:$0xff] }
 0x10f   : > { %6219 = vmatprep.mubr.msk.bf16.mxu1 %vm657_vm3, %v5330_v12  ;;  %v8398_v60 = vsel %vm7383_vm7, %v4363_v30, %v4364_v27  ;;  %v8402_v12 = vrot.slane %v3877_v8, 4  ;;  %v4377_v1 = vrot.slane %v4375_v11, 4  ;;  %v8424_v8 = vrot.slane %v3887_v50, 4 }
 0x110   : > { %v5743_v40 = vcombine.low %v8384_v15, %v8398_v60  ;;  %v8426_v62 = vrot.slane %v3898_v49, 5  ;;  %v3922_v29 = vshll.u32 %v5666_v63, 16  ;;  %v8430_v26 = vsel %vm7383_vm7, %v4370_v28, %v4371_v51  ;;  %v9129_v28 = vld [vmem:[#allocation17_spill] sm:$0xff]  ;;  %v6960_v60 = vld [vmem:[%s7131_s9 + $0xa0] sm:$0xf] }
 0x111   : > { %v8433_v4 = vrot.slane %v3904_v22, 5  ;;  %v8435_v52 = vrot.slane %v3908_v33, 4  ;;  %v5744_v54 = vcombine.low %v8414_v14, %v8430_v26  ;;  %v8441_v27 = vsel %vm7383_vm7, %v4377_v1, %v4378_v46  ;;  %v5714_v33 = vld [vmem:[%s7131_s9 + $0x84] sm:$0xe]  ;;  %v6770_v1 = vld [vmem:[%s7131_s9 + $0x18] sm:$0xff]  }
 0x112   : > { %v3914_v49 = vshll.u32 %v8405_v35, 16  ;;  %v3928_v50 = vshll.u32 %v8408_v58, 16  ;;  %v5745_v53 = vcombine.low %v8420_v45, %v8441_v27  ;;  %v5729_v22 = vrot.slane %v5713_v19, 9  ;;  %v6964_v27 = vld [vmem:[%s7131_s9 + $0xac] sm:$0xf] }
 0x113   : > { %v3921_v38 = vrot.slane %v3919_v47, 4  ;;  %v4385_v30 = vrot.slane %v9126_v59, 5  ;;  %v2244_v61 = vshrl.u32 %v5440_v55, 16  ;;  %v3924_v63 = vrot.slane %v3922_v29, 5  ;;  %v5669_v29 = vld [vmem:[%s7131_s9 + $0xcc] sm:$0xf] }
 0x114   : > { %v3932_v18 = vshrl.u32 %v8408_v58, 16  ;;  %v2247_v43 = vshll.u32 %v5440_v55, 16  ;;  %v5730_v37 = vrot.slane %v5714_v33, 9  ;;  %v3883_v9 = vsel %vm7157_vm4, %v8402_v12, %v8341_v42  ;;  %v8484_v55 = vld [vmem:[%s7131_s9 + $0xd0] sm:$0xf] }
 0x115   : > { %6374 = vmatmul.mubr.msk.bf16.gmra.mrb[12].mxu0 %vm657_vm3, %v8339_v44  ;;  %v4382_v44 = vrot.slane %v9125_v23, 5  ;;  %v2246_v51 = vrot.slane %v2244_v61, 4  ;;  %v3901_v11 = vor.u32 %v8426_v62, %v8416_v21  ;;  %v4389_v47 = vrot.slane %v9129_v28, 5  ;;  %v6771_v21 = vld [vmem:[%s7131_s9 + $0x24] sm:$0xff]  }
 0x116   : > { %6220 = vmatmul.mubr.msk.bf16.gmra.mrb[28].mxu1 %vm657_vm3, %v5331_v56  ;;  %6377 = vmatprep.mubr.msk.bf16.mxu0 %vm657_vm3, %v8343_v41  ;;  %v9128_v56 = vld [vmem:[#allocation8_spill] sm:$0xff]  ;;  %v2249_v46 = vrot.slane %v2247_v43, 5  ;;  %v3893_v19 = vsel %vm7157_vm4, %v8424_v8, %v8353_v17  ;;  %v4392_v12 = vrot.slane %v8236_v2, 5  ;;  %v8492_v62 = vrot.slane %v3928_v50, 5  ;;  %v5715_v8 = vld [vmem:[%s7131_s9 + $0x90] sm:$0xe] }
 0x117   : > { %6225 = vmatprep.mubr.msk.bf16.mxu1 %vm657_vm3, %v6769_v6  ;;  %v2266_v41 = vsel %vm7157_vm4, %v9128_v56, %v9127_v16  ;;  %v8466_v20 = vsel %vm7383_vm7, %v5729_v22, %v4382_v44  ;;  %v4384_v31 = vrot.slane %v4382_v44, 4  ;;  %v3911_v6 = vor.u32 %v8435_v52, %v8433_v4  ;;  %v8498_v52 = vld [vmem:[%s7131_s9 + $0xc8] sm:$0x1]  ;;  %v9131_v16 = vld [vmem:[#allocation5_spill] sm:$0xff] }
 0x118   : > { %v3934_v22 = vrot.slane %v3932_v18, 4  ;;  %v2250_v17 = vor.u32 %v2249_v46, %v2246_v51  ;;  %v3916_v23 = vrot.slane %v3914_v49, 5  ;;  %v3925_v44 = vor.u32 %v3924_v63, %v3921_v38  ;;  %v9132_v51 = vld [vmem:[#allocation6_spill] sm:$0xff] }
 0x119   : > { %v8488_v42 = vsel %vm7383_vm7, %v4384_v31, %v4385_v30  ;;  %v8502_v59 = vsel %vm7383_vm7, %v5730_v37, %v4389_v47  ;;  %v4391_v30 = vrot.slane %v4389_v47, 4  ;;  %v3943_v2 = vshrl.u32 %v5669_v29, 16 }
 0x11a   : > { %v5746_v33 = vcombine.low %v8466_v20, %v8488_v42  ;;  %v3946_v50 = vshll.u32 %v5669_v29, 16  ;;  %v3952_v61 = vshll.u32 %v8484_v55, 16  ;;  %v2251_v18 = vrot.slane %v2250_v17, 4  ;;  %v6772_v29 = vld [vmem:[%s7131_s9 + $0x30] sm:$0xff]  }
 0x11b   : > { %v3956_v49 = vshrl.u32 %v8484_v55, 16  ;;  %v8513_v38 = vsel %vm7383_vm7, %v4391_v30, %v4392_v12  ;;  %v5731_v63 = vrot.slane %v5715_v8, 9  ;;  %v3935_v56 = vor.u32 %v3934_v22, %v8492_v62 }
 0x11c   : > { %v3938_v31 = vshll.u32 %v8498_v52, 16  ;;  %v5747_v37 = vcombine.low %v8502_v59, %v8513_v38  ;;  %v5685_v46 = vcombine.low %v3883_v9, %v3893_v19  ;;  %v3902_v28 = vrot.slane %v3901_v11, 4  ;;  %v5716_v11 = vld [vmem:[%s7131_s9 + $0x9c] sm:$0xe] }
 0x11d   : > { %6378 = vmatmul.mubr.msk.bf16.gmra.mrb[16].mxu0 %vm657_vm3, %v8345_v5  ;;  %v9130_v5 = vld [vmem:[#allocation18_spill] sm:$0xff]  ;;  %v3912_v47 = vrot.slane %v3911_v6, 4  ;;  %v3926_v12 = vrot.slane %v3925_v44, 4  ;;  %v4399_v8 = vrot.slane %v8245_v3, 5  ;;  %v3945_v30 = vrot.slane %v3943_v2, 4 }
 0x11e   : > { %6226 = vmatmul.mubr.msk.bf16.vlgmr.msra.gmra.mrb[0].mxu1 %vm657_vm3, %v6770_v1  ;;  %6381 = vmatprep.mubr.msk.bf16.mxu0 %vm657_vm3, %v8347_v7  ;;  %v4396_v43 = vrot.slane %v9130_v5, 5  ;;  %v2256_v7 = vsel %vm7157_vm4, %v2251_v18, %v9132_v51  ;;  %v3948_v18 = vrot.slane %v3946_v50, 5  ;;  %v8536_v5 = vrot.slane %v3952_v61, 5  ;;  %v6773_v19 = vld [vmem:[%s7131_s9 + $0x3c] sm:$0xff]  }
 0x11f   : > { %6428 = vmatpush3.bf16.msra.mxu1 %v9131_v16  ;;  %6229 = vmatprep.mubr.msk.bf16.mxu1 %vm657_vm3, %v6771_v21  ;;  %v8525_v1 = vcombine.low %v2256_v7, %v2266_v41  ;;  %v8529_v21 = vld [vmem:[%s7131_s9 + $0xd4] sm:$0x1]  ;;  %v3958_v9 = vrot.slane %v3956_v49, 4  ;;  %v3936_v41 = vrot.slane %v3935_v56, 4  ;;  %v3940_v6 = vrot.slane %v3938_v31, 5 }
 0x120   : > { %v8533_v22 = vsel %vm7383_vm7, %v5731_v63, %v4396_v43  ;;  %v4398_v17 = vrot.slane %v4396_v43, 4  ;;  %v3907_v63 = vsel %vm7157_vm4, %v3902_v28, %v8433_v4  ;;  %v3917_v2 = vsel %vm7157_vm4, %v3912_v47, %v3916_v23  ;;  %v6951_v16 = vld [vmem:[%s7131_s9 + $0x1c] sm:$0xf]  ;;  %v5717_v28 = vld [vmem:[%s7131_s9 + $0xa8] sm:$0xe] }
 0x121   : > { %v3962_v50 = vshll.u32 %v8529_v21, 16  ;;  %v5732_v61 = vrot.slane %v5716_v11, 9  ;;  %v4403_v49 = vrot.slane %v8233_v25, 5  ;;  %v3931_v4 = vsel %vm7157_vm4, %v3926_v12, %v8492_v62  ;;  %v5705_v62 = vld [vmem:[%s7131_s9 + $0x18] sm:$0xe]  ;;  %v6774_v47 = vld [vmem:[%s7131_s9 + $0x48] sm:$0xff]  }
 0x122   : > { %v8542_v44 = vsel %vm7383_vm7, %v4398_v17, %v4399_v8  ;;  %v3959_v43 = vor.u32 %v3958_v9, %v8536_v5  ;;  %v4406_v23 = vrot.slane %v8278_v57, 5  ;;  %v3941_v25 = vsel %vm7157_vm4, %v3936_v41, %v3940_v6  ;;  %v6952_v11 = vld [vmem:[%s7131_s9 + $0x20] sm:$0x1] }
 0x123   : > { %v5748_v3 = vcombine.low %v8533_v22, %v8542_v44  ;;  %v4326_v56 = vrot.slane %v6951_v16, 5  ;;  %v8568_v31 = vsel %vm7383_vm7, %v5732_v61, %v4403_v49  ;;  %v4405_v51 = vrot.slane %v4403_v49, 4  ;;  %v5718_v49 = vld [vmem:[%s7131_s9 + $0xb4] sm:$0xe] }
 0x124   : > { %v5686_v7 = vcombine.low %v3907_v63, %v3917_v2  ;;  %v3960_v17 = vrot.slane %v3959_v43, 4  ;;  %v5733_v41 = vrot.slane %v5717_v28, 9  ;;  %v4410_v6 = vrot.slane %v8281_v34, 5  ;;  %v5706_v2 = vld [vmem:[%s7131_s9 + $0x24] sm:$0xe] }
 0x125   : > { %6382 = vmatmul.mubr.msk.bf16.gmra.mrb[20].mxu0 %vm657_vm3, %v8380_v24  ;;  %v3949_v24 = vor.u32 %v3948_v18, %v3945_v30  ;;  %v8573_v57 = vsel %vm7383_vm7, %v4405_v51, %v4406_v23  ;;  %v6775_v30 = vld [vmem:[%s7131_s9 + $0x54] sm:$0xff]   ;;  %v5721_v18 = vrot.slane %v5705_v62, 9  ;;  %v4328_v9 = vrot.slane %v4326_v56, 4  ;;  %v6955_v28 = vld [vmem:[%s7131_s9 + $0x2c] sm:$0x1] }
 0x126   : > { %6230 = vmatmul.mubr.msk.bf16.gmra.mrb[4].mxu1 %vm657_vm3, %v6772_v29  ;;  %6385 = vmatprep.mubr.msk.bf16.mxu0 %vm657_vm3, %v5685_v46  ;;  %v3964_v46 = vrot.slane %v3962_v50, 5  ;;  %v5687_v29 = vcombine.low %v3931_v4, %v3941_v25  ;;  %v5749_v8 = vcombine.low %v8568_v31, %v8573_v57  ;;  %v4413_v63 = vrot.slane %v8291_v48, 5  ;;  %v6953_v50 = vld [vmem:[%s7131_s9 + $0x28] sm:$0xf]  ;;  %v5707_v25 = vld [vmem:[%s7131_s9 + $0x30] sm:$0xe] }
 0x127   : > { %6233 = vmatprep.mubr.msk.bf16.mxu1 %vm657_vm3, %v6773_v19  ;;  %v3950_v12 = vrot.slane %v3949_v24, 4  ;;  %v4329_v19 = vrot.slane %v6952_v11, 5  ;;  %v4333_v61 = vrot.slane %v6953_v50, 5  ;;  %v8596_v48 = vsel %vm7383_vm7, %v5733_v41, %v4410_v6  ;;  %v6777_v11 = vld [vmem:[%s7131_s9 + $0x6c] sm:$0xff]   ;;  %v5719_v50 = vld [vmem:[%s7131_s9 + $0xc0] sm:$0xe] }
 0x128   : > { %v3965_v34 = vsel %vm7157_vm4, %v3960_v17, %v3964_v46  ;;  %v4412_v24 = vrot.slane %v4410_v6, 4  ;;  %v4327_v43 = vsel %vm7383_vm7, %v5721_v18, %v4326_v56  ;;  %v5722_v51 = vrot.slane %v5706_v2, 9  ;;  %v9133_v41 = vld [vmem:[#allocation9_spill] sm:$0xff]  ;;  %v6969_v31 = vld [vmem:[%s7131_s9 + $0xc8] sm:$0x1] }
 0x129   : > { %v3955_v4 = vsel %vm7157_vm4, %v3950_v12, %v8536_v5  ;;  %v4330_v23 = vsel %vm7383_vm7, %v4328_v9, %v4329_v19  ;;  %v6954_v5 = vld [vmem:[%s7131_s9 + $0x34] sm:$0xf]  ;;  %v6776_v12 = vld [vmem:[%s7131_s9 + $0x60] sm:$0xff]   ;;  %v5723_v18 = vrot.slane %v5707_v25, 9  ;;  %v4420_v9 = vrot.slane %v8405_v35, 5 }
 0x12a   : > { %v4340_v16 = vrot.slane %v6954_v5, 5  ;;  %v8607_v62 = vsel %vm7383_vm7, %v4412_v24, %v4413_v63  ;;  %v5688_v46 = vcombine.low %v3955_v4, %v3965_v34  ;;  %v5738_v17 = vcombine.low %v4327_v43, %v4330_v23  ;;  %v5708_v24 = vld [vmem:[%s7131_s9 + $0x3c] sm:$0xe] }
 0x12b   : > { %v5750_v56 = vcombine.low %v8596_v48, %v8607_v62  ;;  %v4343_v6 = vrot.slane %v9133_v41, 5  ;;  %v4334_v35 = vsel %vm7383_vm7, %v5722_v51, %v4333_v61  ;;  %v5735_v5 = vrot.slane %v5719_v50, 9 }
 0x12c   : > { %v4342_v19 = vrot.slane %v4340_v16, 4  ;;  %v4341_v23 = vsel %vm7383_vm7, %v5723_v18, %v4340_v16  ;;  %v4427_v51 = vrot.slane %v8498_v52, 5  ;;  %v2407_v57 = vshll.u32 %v6969_v31, 16 }
 0x12d   : > { %6386 = vmatmul.mubr.msk.bf16.gmra.mrb[24].mxu0 %vm657_vm3, %v5686_v7  ;;  %v5734_v7 = vrot.slane %v5718_v49, 9 }
 0x12e   : > { %6234 = vmatmul.mubr.msk.bf16.gmra.mrb[8].mxu1 %vm657_vm3, %v6774_v47  ;;  %6389 = vmatprep.mubr.msk.bf16.mxu0 %vm657_vm3, %v5687_v29  ;;  %v4336_v47 = vrot.slane %v6955_v28, 5  ;;  %v4417_v29 = vrot.slane %v8356_v39, 5  ;;  %v9134_v39 = vld [vmem:[#allocation10_spill] sm:$0xff]  ;;  %v4344_v25 = vsel %vm7383_vm7, %v4342_v19, %v4343_v6  ;;  %v5724_v28 = vrot.slane %v5708_v24, 9 }
 0x12f   : > { %6237 = vmatprep.mubr.msk.bf16.mxu1 %vm657_vm3, %v6775_v30  ;;  %v4335_v30 = vrot.slane %v4333_v61, 4  ;;  %v4347_v49 = vrot.slane %v9134_v39, 5  ;;  %v4424_v61 = vrot.slane %v8408_v58, 5  ;;  %v6956_v39 = vld [vmem:[%s7131_s9 + $0x70] sm:$0xf]  ;;  %v4431_v24 = vrot.slane %v8484_v55, 5 }
 0x130   : > { %v8619_v63 = vsel %vm7383_vm7, %v5734_v7, %v4417_v29  ;;  %v4419_v2 = vrot.slane %v4417_v29, 4  ;;  %v5437_v7 = vld [vmem:[%s7131_s9 + $0x6c] sm:$0xf]  ;;  %v9135_v29 = vld [vmem:[#allocation11_spill] sm:$0xff] }
 0x131   : > { %v4337_v34 = vsel %vm7383_vm7, %v4335_v30, %v4336_v47  ;;  %v4349_v47 = vrot.slane %v4347_v49, 4  ;;  %v6778_v30 = vld [vmem:[%s7131_s9 + $0x78] sm:$0xff]   ;;  %v8650_v16 = vsel %vm7383_vm7, %v5735_v5, %v4424_v61  ;;  %v4426_v18 = vrot.slane %v4424_v61, 4 }
 0x132   : > { %v8626_v4 = vsel %vm7383_vm7, %v4419_v2, %v4420_v9  ;;  %v5740_v9 = vcombine.low %v4341_v23, %v4344_v25  ;;  %v2220_v19 = vshrl.u32 %v5437_v7, 16  ;;  %v2223_v41 = vshll.u32 %v5437_v7, 16 }
 0x133   : > { %v5751_v43 = vcombine.low %v8619_v63, %v8626_v4  ;;  %v8655_v58 = vsel %vm7383_vm7, %v4426_v18, %v4427_v51  ;;  %v4348_v6 = vsel %vm7383_vm7, %v5724_v28, %v4347_v49  ;;  %v4434_v49 = vrot.slane %v8529_v21, 5  ;;  %v6780_v51 = vld [vmem:[%s7131_s9 + $0x90] sm:$0xff]   ;;  %v6781_v21 = vld [vmem:[%s7131_s9 + $0x9c] sm:$0xff]  }
 0x134   : > { %v5752_v50 = vcombine.low %v8650_v16, %v8655_v58  ;;  %v2222_v23 = vrot.slane %v2220_v19, 4  ;;  %v2225_v25 = vrot.slane %v2223_v41, 5  ;;  %v4433_v7 = vrot.slane %v4431_v24, 4 }
 0x135   : > { %6390 = vmatmul.mubr.msk.bf16.gmra.mrb[28].mxu0 %vm657_vm3, %v5688_v46  ;;  %v5739_v46 = vcombine.low %v4334_v35, %v4337_v34  ;;  %v2229_v35 = vshll.u32 %v6956_v39, 16  ;;  %v2233_v34 = vshrl.u32 %v6956_v39, 16 }
 0x136   : > { %6238 = vmatmul.mubr.msk.bf16.gmra.mrb[12].mxu1 %vm657_vm3, %v6776_v12  ;;  %6395 = vmatprep.mubr.msk.bf16.mxu0 %vm657_vm3, %v5738_v17  ;;  %v4350_v12 = vrot.slane %v9135_v29, 5  ;;  %v5720_v17 = vld [vmem:[%s7131_s9 + $0xcc] sm:$0xe]  ;;  %v8677_v55 = vsel %vm7383_vm7, %v4433_v7, %v4434_v49 }
 0x137   : > { %6241 = vmatprep.mubr.msk.bf16.mxu1 %vm657_vm3, %v6777_v11  ;;  %v6779_v11 = vld [vmem:[%s7131_s9 + $0x84] sm:$0xff]   ;;  %v5736_v52 = vrot.slane %v5720_v17, 9  ;;  %v2235_v28 = vrot.slane %v2233_v34, 4  ;;  %v6957_v17 = vld [vmem:[%s7131_s9 + $0x74] sm:$0x1] }
 0x138   : > { %v4351_v2 = vsel %vm7383_vm7, %v4349_v47, %v4350_v12  ;;  %v5443_v47 = vld [vmem:[%s7131_s9 + $0x84] sm:$0xf]  ;;  %v2226_v12 = vor.u32 %v2225_v25, %v2222_v23  ;;  %v6783_v34 = vld [vmem:[%s7131_s9 + $0xb4] sm:$0xff]  }
 0x139   : > { %v8672_v5 = vsel %vm7383_vm7, %v5736_v52, %v4431_v24  ;;  %v5741_v61 = vcombine.low %v4348_v6, %v4351_v2  ;;  %v2271_v18 = vshll.u32 %v5443_v47, 16  ;;  %v5446_v6 = vld [vmem:[%s7131_s9 + $0x90] sm:$0xf]  ;;  %v6782_v2 = vld [vmem:[%s7131_s9 + $0xa8] sm:$0xff]  }
 0x13a   : > { %v5753_v29 = vcombine.low %v8672_v5, %v8677_v55  ;;  %v2227_v52 = vrot.slane %v2226_v12, 4  ;;  %v2292_v23 = vshrl.u32 %v5446_v6, 16  ;;  %v2295_v25 = vshll.u32 %v5446_v6, 16 }
 0x13b   : > { %v2325_v12 = vshll.u32 %v6960_v60, 16 }
 0x13c   : > { %v2297_v14 = vrot.slane %v2295_v25, 5  ;;  %v6963_v25 = vld [vmem:[%s7131_s9 + $0xa4] sm:$0x1] }
 0x13d   : > { %6396 = vmatmul.mubr.msk.bf16.vlgmr.msra.gmra.mrb[0].mxu0 %vm657_vm3, %v5739_v46  ;;  %v2231_v46 = vrot.slane %v2229_v35, 5  ;;  %v5449_v35 = vld [vmem:[%s7131_s9 + $0x9c] sm:$0xf]  ;;  %v8719_v6 = vrot.slane %v2325_v12, 5 }
 0x13e   : > { %6242 = vmatmul.mubr.msk.bf16.gmra.mrb[16].mxu1 %vm657_vm3, %v6778_v30  ;;  %6399 = vmatprep.mubr.msk.bf16.mxu0 %vm657_vm3, %v5740_v9  ;;  %v2239_v30 = vshll.u32 %v6957_v17, 16  ;;  %v2268_v9 = vshrl.u32 %v5443_v47, 16  ;;  %v2319_v47 = vshll.u32 %v5449_v35, 16  ;;  %v6961_v17 = vld [vmem:[%s7131_s9 + $0x8c] sm:$0x1] }
 0x13f   : > { %6245 = vmatprep.mubr.msk.bf16.mxu1 %vm657_vm3, %v6779_v11  ;;  %v2236_v13 = vor.u32 %v2235_v28, %v2231_v46  ;;  %v6958_v11 = vld [vmem:[%s7131_s9 + $0x88] sm:$0xf]  ;;  %v2232_v7 = vsel %vm7157_vm4, %v2227_v52, %v2231_v46 }
 0x140   : > { %v2277_v19 = vshll.u32 %v6958_v11, 16  ;;  %v2281_v41 = vshrl.u32 %v6958_v11, 16  ;;  %v2241_v0 = vrot.slane %v2239_v30, 5  ;;  %v2270_v36 = vrot.slane %v2268_v9, 4 }
 0x141   : > { %v2237_v39 = vrot.slane %v2236_v13, 4  ;;  %v2287_v30 = vshll.u32 %v6961_v17, 16  ;;  %v2294_v9 = vrot.slane %v2292_v23, 4  ;;  %v2321_v11 = vrot.slane %v2319_v47, 5 }
 0x142   : > { %v8696_v24 = vrot.slane %v2277_v19, 5  ;;  %v2283_v49 = vrot.slane %v2281_v41, 4  ;;  %v6784_v19 = vld [vmem:[%s7131_s9 + $0xc0] sm:$0xff]  }
 0x143   : > { %v2242_v46 = vsel %vm7157_vm4, %v2237_v39, %v2241_v0  ;;  %v5452_v39 = vld [vmem:[%s7131_s9 + $0xa8] sm:$0xf] }
 0x144   : > { %v2284_v13 = vor.u32 %v2283_v49, %v8696_v24  ;;  %v5470_v41 = vcombine.low %v2232_v7, %v2242_v46  ;;  %v2335_v7 = vshll.u32 %v6963_v25, 16  ;;  %v2343_v45 = vshll.u32 %v5452_v39, 16 }
 0x145   : > { %6400 = vmatmul.mubr.msk.bf16.gmra.mrb[4].mxu0 %vm657_vm3, %v5741_v61  ;;  %v6959_v61 = vld [vmem:[%s7131_s9 + $0x94] sm:$0xf] }
 0x146   : > { %6246 = vmatmul.mubr.msk.bf16.gmra.mrb[20].mxu1 %vm657_vm3, %v6780_v51  ;;  %6403 = vmatprep.mubr.msk.bf16.mxu0 %vm657_vm3, %v5742_v10  ;;  %v2273_v10 = vrot.slane %v2271_v18, 5  ;;  %v2301_v51 = vshll.u32 %v6959_v61, 16  ;;  %v2305_v28 = vshrl.u32 %v6959_v61, 16  ;;  %v2285_v0 = vrot.slane %v2284_v13, 4 }
 0x147   : > { %6249 = vmatprep.mubr.msk.bf16.mxu1 %vm657_vm3, %v6781_v21  ;;  %v2316_v21 = vshrl.u32 %v5449_v35, 16  ;;  %v6962_v35 = vld [vmem:[%s7131_s9 + $0x98] sm:$0x1]  ;;  %v2340_v61 = vshrl.u32 %v5452_v39, 16  ;;  %v5458_v39 = vld [vmem:[%s7131_s9 + $0xc0] sm:$0xf] }
 0x148   : > { %v2274_v15 = vor.u32 %v2273_v10, %v2270_v36  ;;  %v8716_v26 = vrot.slane %v2301_v51, 5  ;;  %v2289_v36 = vrot.slane %v2287_v30, 5  ;;  %v2298_v10 = vor.u32 %v2297_v14, %v2294_v9  ;;  %v5455_v51 = vld [vmem:[%s7131_s9 + $0xb4] sm:$0xf] }
 0x149   : > { %v2318_v18 = vrot.slane %v2316_v21, 4  ;;  %v2353_v21 = vshrl.u32 %v6964_v27, 16  ;;  %v2364_v20 = vshrl.u32 %v5455_v51, 16  ;;  %v2367_v42 = vshll.u32 %v5455_v51, 16 }
 0x14a   : > { %v2275_v52 = vrot.slane %v2274_v15, 4  ;;  %v2290_v46 = vsel %vm7157_vm4, %v2285_v0, %v2289_v36  ;;  %v2299_v15 = vrot.slane %v2298_v10, 4  ;;  %v2337_v30 = vrot.slane %v2335_v7, 5 }
 0x14b   : > { %v2322_v23 = vor.u32 %v2321_v11, %v2318_v18  ;;  %v2342_v9 = vrot.slane %v2340_v61, 4  ;;  %v2355_v11 = vrot.slane %v2353_v21, 4  ;;  %v6968_v61 = vld [vmem:[%s7131_s9 + $0xbc] sm:$0x1] }
 0x14c   : > { %v2280_v47 = vsel %vm7157_vm4, %v2275_v52, %v8696_v24  ;;  %v2304_v0 = vsel %vm7157_vm4, %v2299_v15, %v8716_v26  ;;  %v2383_v22 = vshll.u32 %v6968_v61, 16 }
 0x14d   : > { %6404 = vmatmul.mubr.msk.bf16.gmra.mrb[8].mxu0 %vm657_vm3, %v5743_v40  ;;  %v2329_v40 = vshrl.u32 %v6960_v60, 16  ;;  %v2323_v17 = vrot.slane %v2322_v23, 4  ;;  %v5472_v24 = vcombine.low %v2280_v47, %v2290_v46 }
 0x14e   : > { %6250 = vmatmul.mubr.msk.bf16.gmra.mrb[24].mxu1 %vm657_vm3, %v6782_v2  ;;  %6407 = vmatprep.mubr.msk.bf16.mxu0 %vm657_vm3, %v5744_v54  ;;  %v2307_v54 = vrot.slane %v2305_v28, 4 }
 0x14f   : > { %6253 = vmatprep.mubr.msk.bf16.mxu1 %vm657_vm3, %v6783_v34  ;;  %v2331_v2 = vrot.slane %v2329_v40, 4  ;;  %v2311_v34 = vshll.u32 %v6962_v35, 16  ;;  %v2328_v10 = vsel %vm7157_vm4, %v2323_v17, %v8719_v6  ;;  %v2409_v17 = vrot.slane %v2407_v57, 5 }
 0x150   : > { %v2308_v49 = vor.u32 %v2307_v54, %v8716_v26  ;;  %v2345_v54 = vrot.slane %v2343_v45, 5  ;;  %v6966_v26 = vld [vmem:[%s7131_s9 + $0xb0] sm:$0x1] }
 0x151   : > { %v2332_v28 = vor.u32 %v2331_v2, %v8719_v6  ;;  %v2313_v60 = vrot.slane %v2311_v34, 5  ;;  %v2359_v35 = vshll.u32 %v6966_v26, 16  ;;  %v2388_v34 = vshrl.u32 %v5458_v39, 16 }
 0x152   : > { %v2309_v13 = vrot.slane %v2308_v49, 4  ;;  %v2346_v38 = vor.u32 %v2345_v54, %v2342_v9  ;;  %v2391_v6 = vshll.u32 %v5458_v39, 16  ;;  %v6967_v49 = vld [vmem:[%s7131_s9 + $0xc4] sm:$0xf] }
 0x153   : > { %v2333_v14 = vrot.slane %v2332_v28, 4  ;;  %v2397_v23 = vshll.u32 %v6967_v49, 16  ;;  %v2401_v25 = vshrl.u32 %v6967_v49, 16  ;;  %v2361_v45 = vrot.slane %v2359_v35, 5 }
 0x154   : > { %v2314_v36 = vsel %vm7157_vm4, %v2309_v13, %v2313_v60  ;;  %v2347_v51 = vrot.slane %v2346_v38, 4  ;;  %v2385_v60 = vrot.slane %v2383_v22, 5 }
 0x155   : > { %6408 = vmatmul.mubr.msk.bf16.gmra.mrb[12].mxu0 %vm657_vm3, %v5745_v53  ;;  %v2349_v53 = vshll.u32 %v6964_v27, 16  ;;  %v2338_v59 = vsel %vm7157_vm4, %v2333_v14, %v2337_v30  ;;  %v5473_v44 = vcombine.low %v2304_v0, %v2314_v36  ;;  %v2390_v27 = vrot.slane %v2388_v34, 4 }
 0x156   : > { %6254 = vmatmul.mubr.msk.bf16.gmra.mrb[28].mxu1 %vm657_vm3, %v6784_v19  ;;  %6411 = vmatprep.mubr.msk.bf16.mxu0 %vm657_vm3, %v5746_v33  ;;  %v6965_v33 = vld [vmem:[%s7131_s9 + $0xb8] sm:$0xf]  ;;  %v2366_v19 = vrot.slane %v2364_v20, 4  ;;  %v2399_v21 = vrot.slane %v2397_v23, 5  ;;  %v2403_v47 = vrot.slane %v2401_v25, 4  ;;  %s8892_s9 = sshll.u32 %s161_s8, 7 }
 0x157   : > { %6275 = vmatprep.mubr.msk.bf16.mxu1 %vm657_vm3, %v5470_v41  ;;  %v2373_v12 = vshll.u32 %v6965_v33, 16  ;;  %v2377_v40 = vshrl.u32 %v6965_v33, 16  ;;  %v2351_v18 = vrot.slane %v2349_v53, 5  ;;  %v2369_v41 = vrot.slane %v2367_v42, 5  ;;  %s8904_s10 = scalar_lea.vmem [#allocation2], %s8892_s9 }
 0x158   : > { %v2393_v53 = vrot.slane %v2391_v6, 5  ;;  %s5166_s17 = sshll.u32 %s8904_s10, 4  ;;  %s9016_s17 = int_to_ptr.vmem [resolvable:$true] %s5166_s17 }
 0x159   : > { %v2375_v52 = vrot.slane %v2373_v12, 5  ;;  %v2379_v2 = vrot.slane %v2377_v40, 4  ;;  %v2352_v20 = vsel %vm7157_vm4, %v2347_v51, %v2351_v18  ;;  %v2404_v12 = vor.u32 %v2403_v47, %v2399_v21  ;;  %s6970_s25 = scalar_lea.vmem %s9016_s17, 2048  ;;  %p6977_p0 = scmp.lt.s32.totalorder %s9016_s17, %s6975_s27 }
 0x15a   : > { %v2394_v33 = vor.u32 %v2393_v53, %v2390_v27  ;;  %p6971_p11 = scmp.ne.s32.totalorder %s9016_s17, %s6970_s25  ;;  %p6978_p1 = scmp.lt.s32.totalorder %s6976_s28, %s6970_s25 }
 0x15b   : > { %v2380_v7 = vor.u32 %v2379_v2, %v2375_v52  ;;  %v2405_v13 = vrot.slane %v2404_v12, 4 }
 0x15c   : > { %v2395_v40 = vrot.slane %v2394_v33, 4  ;;  %p6972_p12 = pnand %p6971_p11, %p7095_p5  ;;  %p6979_p2 = por %p6978_p1, %p6977_p0 }
 0x15d   : > { %6412 = vmatmul.mubr.msk.bf16.gmra.mrb[16].mxu0 %vm657_vm3, %v5747_v37  ;;  %v2356_v37 = vor.u32 %v2355_v11, %v2351_v18  ;;  %v2381_v15 = vrot.slane %v2380_v7, 4  ;;  %v2410_v9 = vsel %vm7157_vm4, %v2405_v13, %v2409_v17 }
 0x15e   : > { %6276 = vmatmul.mubr.msk.bf16.vlgmr.msra.gmra.mrb[16].mxu1 %vm657_vm3, %v8525_v1  ;;  %6415 = vmatprep.mubr.msk.bf16.mxu0 %vm657_vm3, %v5748_v3  ;;  %v2370_v1 = vor.u32 %v2369_v41, %v2366_v19  ;;  %v5474_v3 = vcombine.low %v2328_v10, %v2338_v59  ;;  %v2400_v30 = vsel %vm7157_vm4, %v2395_v40, %v2399_v21  ;;  %p6973_p13 = pneg %p6972_p12 }
 0x15f   : > { %6279 = vmatprep.mubr.msk.bf16.mxu1 %vm657_vm3, %v5472_v24  ;;  %v2357_v28 = vrot.slane %v2356_v37, 4  ;;  %v2386_v48 = vsel %vm7157_vm4, %v2381_v15, %v2385_v60  ;;  %v5477_v14 = vcombine.low %v2400_v30, %v2410_v9 }
 0x160   : > { %v2371_v46 = vrot.slane %v2370_v1, 4  ;;  %p6980_p3 = pnand %p6979_p2, %p6973_p13 }
 0x161   : > { %v2362_v42 = vsel %vm7157_vm4, %v2357_v28, %v2361_v45 }
 0x162   : > { %v5475_v62 = vcombine.low %v2352_v20, %v2362_v42 }
 0x165   : > { %6416 = vmatmul.mubr.msk.bf16.gmra.mrb[20].mxu0 %vm657_vm3, %v5749_v8  ;;  %v2376_v8 = vsel %vm7157_vm4, %v2371_v46, %v2375_v52  ;;  %v8820_v52 = vld [vmem:[%s9065_s2] ss:$0 sm:$0xff] }
 0x166   : > { %6280 = vmatmul.mubr.msk.bf16.gmra.mrb[20].mxu1 %vm657_vm3, %v5473_v44  ;;  %6419 = vmatprep.mubr.msk.bf16.mxu0 %vm657_vm3, %v5750_v56  ;;  %v5476_v56 = vcombine.low %v2376_v8, %v2386_v48 }
 0x167   : > { %6283 = vmatprep.mubr.msk.bf16.mxu1 %vm657_vm3, %v5474_v3 }
 0x16d   : > { %6420 = vmatmul.mubr.msk.bf16.gmra.mrb[24].mxu0 %vm657_vm3, %v5751_v43 }
 0x16e   : > { %6284 = vmatmul.mubr.msk.bf16.gmra.mrb[24].mxu1 %vm657_vm3, %v5475_v62  ;;  %6423 = vmatprep.mubr.msk.bf16.mxu0 %vm657_vm3, %v5752_v50 }
 0x16f   : > { %6287 = vmatprep.mubr.msk.bf16.mxu1 %vm657_vm3, %v5476_v56 }
 0x175   : > { %6424 = vmatmul.mubr.msk.bf16.gmra.mrb[28].mxu0 %vm657_vm3, %v5753_v29 }
 0x176   : > { %6288 = vmatmul.mubr.msk.bf16.gmra.mrb[28].mxu1 %vm657_vm3, %v5477_v14 }
 0x1f1   : > { %v6227_v63 = vpop.f32.mrb[0].mxu1 }
 0x1f2   : > { %v1820_v4 = vpop.f32.mrb[1].mxu1 }
 0x1f3   : > { %v6228_v43 = vpop.f32.mrb[2].mxu1 }
 0x1f4   : > { %v1823_v16 = vpop.f32.mrb[3].mxu1 }
 0x1f9   : > { %v6231_v58 = vpop.f32.mrb[4].mxu1 }
 0x1fa   : > { %v1836_v50 = vpop.f32.mrb[5].mxu1 }
 0x1fb   : > { %v6232_v54 = vpop.f32.mrb[6].mxu1 }
 0x1fc   : > { %v1839_v18 = vpop.f32.mrb[7].mxu1 }
 0x201   : > { %v6235_v11 = vpop.f32.mrb[8].mxu1 }
 0x202   : > { %v1852_v24 = vpop.f32.mrb[9].mxu1 }
 0x203   : > { %v6236_v32 = vpop.f32.mrb[10].mxu1 }
 0x204   : > { %v8807_v19 = vpop.f32.mrb[11].mxu1 }
 0x209   : > { %v8809_v41 = vpop.f32.mrb[12].mxu1 }
 0x20a   : > { %v8811_v5 = vpop.f32.mrb[13].mxu1 }
 0x20b   : > { %v8813_v55 = vpop.f32.mrb[14].mxu1 }
 0x20c   : > { %v8815_v29 = vpop.f32.mrb[15].mxu1 }
 0x210   : > { %v6397_v2 = vpop.f32.mrb[0].mxu0 }
 0x211   : > { %v6429_v39 = vadd.f32 %v6397_v2, %v6227_v63  ;;  %v4571_v0 = vpop.f32.mrb[1].mxu0 }
 0x212   : > { %v6430_v36 = vadd.f32 %v4571_v0, %v1820_v4  ;;  %v6398_v10 = vpop.f32.mrb[2].mxu0 }
 0x213   : > { %v8823_v59 = vadd.f32 %v6429_v39, %v8820_v52  ;;  %v6431_v38 = vadd.f32 %v6398_v10, %v6228_v43  ;;  %v4574_v37 = vpop.f32.mrb[3].mxu0 }
 0x214   : > { %v8826_v26 = vadd.f32 %v6430_v36, %v8820_v52  ;;  %v6432_v35 = vadd.f32 %v4574_v37, %v1823_v16 }
 0x215   : > { %v5773_v34 = vmul.f32 -1.442695, %v8823_v59  ;;  %v8830_v6 = vadd.f32 %v6431_v38, %v8820_v52 }
 0x216   : > { %v5771_v49 = vmul.f32 -1.442695, %v8826_v26  ;;  %v8834_v23 = vadd.f32 %v6432_v35, %v8820_v52 }
 0x217   : > { %6785 = vpow2.f32 %v5773_v34  ;;  %v5774_v25 = vmul.f32 -1.442695, %v8830_v6 }
 0x218   : > { %6787 = vpow2.f32 %v5771_v49  ;;  %v5772_v1 = vmul.f32 -1.442695, %v8834_v23  ;;  %v6401_v7 = vpop.f32.mrb[4].mxu0 }
 0x219   : > { %6789 = vpow2.f32 %v5774_v25  ;;  %v6433_v61 = vadd.f32 %v6401_v7, %v6231_v58  ;;  %v4587_v22 = vpop.f32.mrb[5].mxu0 }
 0x21a   : > { %6791 = vpow2.f32 %v5772_v1  ;;  %v6434_v44 = vadd.f32 %v4587_v22, %v1836_v50  ;;  %v6402_v3 = vpop.f32.mrb[6].mxu0 }
 0x21b   : > { %v8839_v51 = vadd.f32 %v6433_v61, %v8820_v52  ;;  %v6435_v28 = vadd.f32 %v6402_v3, %v6232_v54  ;;  %v4590_v45 = vpop.f32.mrb[7].mxu0 }
 0x21c   : > { %v8842_v27 = vadd.f32 %v6434_v44, %v8820_v52  ;;  %v6436_v53 = vadd.f32 %v4590_v45, %v1839_v18 }
 0x21d   : > { %v5777_v21 = vmul.f32 -1.442695, %v8839_v51  ;;  %v8846_v47 = vadd.f32 %v6435_v28, %v8820_v52 }
 0x21e   : > { %v5775_v46 = vmul.f32 -1.442695, %v8842_v27  ;;  %v8850_v15 = vadd.f32 %v6436_v53, %v8820_v52 }
 0x21f   : > { %6793 = vpow2.f32 %v5777_v21  ;;  %v5778_v60 = vmul.f32 -1.442695, %v8846_v47 }
 0x220   : > { %6795 = vpow2.f32 %v5775_v46  ;;  %v5776_v20 = vmul.f32 -1.442695, %v8850_v15  ;;  %v6405_v42 = vpop.f32.mrb[8].mxu0 }
 0x221   : > { %v6786_v33 = vpop.eup %6785  ;;  %6797 = vpow2.f32 %v5778_v60  ;;  %v6437_v12 = vadd.f32 %v6405_v42, %v6235_v11  ;;  %v4603_v31 = vpop.f32.mrb[9].mxu0 }
 0x222   : > { %v6788_v57 = vpop.eup %6787  ;;  %v4866_v8 = vadd.f32 1.0, %v6786_v33  ;;  %6799 = vpow2.f32 %v5776_v20  ;;  %v6438_v48 = vadd.f32 %v4603_v31, %v1852_v24  ;;  %v6406_v62 = vpop.f32.mrb[10].mxu0 }
 0x223   : > { %v6790_v56 = vpop.eup %6789  ;;  %v4864_v40 = vadd.f32 1.0, %v6788_v57  ;;  %v8855_v13 = vadd.f32 %v6437_v12, %v8820_v52  ;;  %v6439_v17 = vadd.f32 %v6406_v62, %v6236_v32  ;;  %v4606_v30 = vpop.f32.mrb[11].mxu0 }
 0x224   : > { %v6792_v9 = vpop.eup %6791  ;;  %6801 = vrcp.f32 %v4866_v8  ;;  %v4867_v14 = vadd.f32 1.0, %v6790_v56  ;;  %v8858_v63 = vadd.f32 %v6438_v48, %v8820_v52  ;;  %v6440_v4 = vadd.f32 %v4606_v30, %v8807_v19 }
 0x225   : > { %6803 = vrcp.f32 %v4864_v40  ;;  %v4865_v43 = vadd.f32 1.0, %v6792_v9  ;;  %v5781_v16 = vmul.f32 -1.442695, %v8855_v13  ;;  %v8863_v58 = vadd.f32 %v6439_v17, %v8820_v52 }
 0x226   : > { %6805 = vrcp.f32 %v4867_v14  ;;  %v5779_v50 = vmul.f32 -1.442695, %v8858_v63  ;;  %v8867_v54 = vadd.f32 %v6440_v4, %v8820_v52 }
 0x227   : > { %6807 = vrcp.f32 %v4865_v43  ;;  %v5782_v18 = vmul.f32 -1.442695, %v8863_v58 }
 0x228   : > { %6809 = vpow2.f32 %v5781_v16  ;;  %v5780_v11 = vmul.f32 -1.442695, %v8867_v54  ;;  %v6409_v24 = vpop.f32.mrb[12].mxu0 }
 0x229   : > { %v6794_v32 = vpop.eup %6793  ;;  %6811 = vpow2.f32 %v5779_v50  ;;  %v6441_v19 = vadd.f32 %v6409_v24, %v8809_v41  ;;  %v4619_v2 = vpop.f32.mrb[13].mxu0 }
 0x22a   : > { %v6796_v39 = vpop.eup %6795  ;;  %v4870_v0 = vadd.f32 1.0, %v6794_v32  ;;  %6813 = vpow2.f32 %v5782_v18  ;;  %v6442_v36 = vadd.f32 %v4619_v2, %v8811_v5  ;;  %v6410_v10 = vpop.f32.mrb[14].mxu0 }
 0x22b   : > { %v6798_v38 = vpop.eup %6797  ;;  %v4868_v37 = vadd.f32 1.0, %v6796_v39  ;;  %6815 = vpow2.f32 %v5780_v11  ;;  %v8874_v35 = vadd.f32 %v6441_v19, %v8820_v52  ;;  %v6443_v34 = vadd.f32 %v6410_v10, %v8813_v55  ;;  %v4622_v49 = vpop.f32.mrb[15].mxu0 }
 0x22c   : > { %v6800_v25 = vpop.eup %6799  ;;  %6817 = vrcp.f32 %v4870_v0  ;;  %v4871_v41 = vadd.f32 1.0, %v6798_v38  ;;  %v8879_v1 = vadd.f32 %v6442_v36, %v8820_v52  ;;  %v6444_v5 = vadd.f32 %v4622_v49, %v8815_v29 }
 0x22d   : > { %6819 = vrcp.f32 %v4868_v37  ;;  %v4869_v7 = vadd.f32 1.0, %v6800_v25  ;;  %v5785_v61 = vmul.f32 -1.442695, %v8874_v35  ;;  %v8884_v22 = vadd.f32 %v6443_v34, %v8820_v52 }
 0x22e   : > { %v6802_v44 = vpop.eup %6801  ;;  %6821 = vrcp.f32 %v4871_v41  ;;  %v5783_v55 = vmul.f32 -1.442695, %v8879_v1  ;;  %v8888_v3 = vadd.f32 %v6444_v5, %v8820_v52 }
 0x22f   : > { %v6804_v28 = vpop.eup %6803  ;;  %6823 = vrcp.f32 %v4869_v7  ;;  %v5786_v29 = vmul.f32 -1.442695, %v8884_v22  ;;  %v4962_v60 = vmul.f32 %v6802_v44, %v8823_v59 }
 0x230   : > { %v6806_v45 = vpop.eup %6805  ;;  %6825 = vpow2.f32 %v5785_v61  ;;  %v5784_v53 = vmul.f32 -1.442695, %v8888_v3  ;;  %v6413_v21 = vpop.f32.mrb[16].mxu0  ;;  %v4960_v31 = vmul.f32 %v6804_v28, %v8826_v26 }
 0x231   : > { %v6808_v46 = vpop.eup %6807  ;;  %v4963_v20 = vmul.f32 %v6806_v45, %v8830_v6  ;;  %6827 = vpow2.f32 %v5783_v55  ;;  %v6277_v42 = vpop.f32.mrb[16].mxu1 }
 0x232   : > { %v4635_v33 = vpop.f32.mrb[17].mxu0  ;;  %v6810_v12 = vpop.eup %6809  ;;  %v4961_v57 = vmul.f32 %v6808_v46, %v8834_v23  ;;  %6829 = vpow2.f32 %v5786_v29  ;;  %v6445_v8 = vadd.f32 %v6413_v21, %v6277_v42 }
 0x233   : > { %v2610_v48 = vpop.f32.mrb[17].mxu1  ;;  %v6414_v62 = vpop.f32.mrb[18].mxu0  ;;  %v5881_v40 = vpack.c.bf16 %v4963_v20, %v4962_v60  ;;  %v4874_v17 = vadd.f32 1.0, %v6810_v12  ;;  %6831 = vpow2.f32 %v5784_v53 }
 0x234   : > { %v6812_v56 = vpop.eup %6811  ;;  %v6446_v59 = vadd.f32 %v4635_v33, %v2610_v48  ;;  %v6278_v30 = vpop.f32.mrb[18].mxu1  ;;  %v5876_v14 = vpack.c.bf16 %v4961_v57, %v4960_v31  ;;  %v8901_v43 = vadd.f32 %v6445_v8, %v8820_v52 }
 0x235   : > { %v4638_v6 = vpop.f32.mrb[19].mxu0  ;;  %v6814_v9 = vpop.eup %6813  ;;  %v4872_v4 = vadd.f32 1.0, %v6812_v56  ;;  %v6447_v26 = vadd.f32 %v6414_v62, %v6278_v30  ;;  %5953 = vst [vmem:[%s8904_s10 + $0x8] sm:$0xff] %v5881_v40   ;;  %6833 = vrcp.f32 %v4874_v17 }
 0x236   : > { %v2613_v23 = vpop.f32.mrb[19].mxu1  ;;  %v6816_v16 = vpop.eup %6815  ;;  %v4875_v50 = vadd.f32 1.0, %v6814_v9  ;;  %v8908_v18 = vadd.f32 %v6446_v59, %v8820_v52  ;;  %5877 = vst [vmem:[%s8904_s10] sm:$0xff] %v5876_v14   ;;  %v5789_v19 = vmul.f32 -1.442695, %v8901_v43 }
 0x237   : > { %v6448_v11 = vadd.f32 %v4638_v6, %v2613_v23  ;;  %v6818_v24 = vpop.eup %6817  ;;  %6835 = vrcp.f32 %v4872_v4  ;;  %v4873_v32 = vadd.f32 1.0, %v6816_v16  ;;  %v8913_v2 = vadd.f32 %v6447_v26, %v8820_v52 }
 0x238   : > { %v6820_v39 = vpop.eup %6819  ;;  %6837 = vrcp.f32 %v4875_v50  ;;  %v5787_v0 = vmul.f32 -1.442695, %v8908_v18  ;;  %v6417_v37 = vpop.f32.mrb[20].mxu0  ;;  %v4966_v49 = vmul.f32 %v6818_v24, %v8839_v51 }
 0x239   : > { %v8917_v36 = vadd.f32 %v6448_v11, %v8820_v52  ;;  %v6822_v10 = vpop.eup %6821  ;;  %6839 = vrcp.f32 %v4873_v32  ;;  %v5790_v38 = vmul.f32 -1.442695, %v8913_v2  ;;  %v6281_v5 = vpop.f32.mrb[20].mxu1  ;;  %v4964_v44 = vmul.f32 %v6820_v39, %v8842_v27 }
 0x23a   : > { %v6824_v34 = vpop.eup %6823  ;;  %v4967_v25 = vmul.f32 %v6822_v10, %v8846_v47  ;;  %6841 = vpow2.f32 %v5789_v19  ;;  %v4651_v7 = vpop.f32.mrb[21].mxu0  ;;  %v6449_v28 = vadd.f32 %v6417_v37, %v6281_v5 }
 0x23b   : > { %v5788_v41 = vmul.f32 -1.442695, %v8917_v36  ;;  %v6826_v61 = vpop.eup %6825  ;;  %v4965_v55 = vmul.f32 %v6824_v34, %v8850_v15  ;;  %6843 = vpow2.f32 %v5787_v0  ;;  %v2626_v29 = vpop.f32.mrb[21].mxu1 }
 0x23c   : > { %v6418_v45 = vpop.f32.mrb[22].mxu0  ;;  %v6828_v53 = vpop.eup %6827  ;;  %v5891_v21 = vpack.c.bf16 %v4967_v25, %v4966_v49  ;;  %v4878_v51 = vadd.f32 1.0, %v6826_v61  ;;  %6845 = vpow2.f32 %v5790_v38  ;;  %v6450_v47 = vadd.f32 %v4651_v7, %v2626_v29 }
 0x23d   : > { %v6282_v46 = vpop.f32.mrb[22].mxu1  ;;  %v4654_v60 = vpop.f32.mrb[23].mxu0  ;;  %v5886_v42 = vpack.c.bf16 %v4965_v55, %v4964_v44  ;;  %v4876_v33 = vadd.f32 1.0, %v6828_v53  ;;  %6847 = vpow2.f32 %v5788_v41  ;;  %v8926_v27 = vadd.f32 %v6449_v28, %v8820_v52 }
 0x23e   : > { %v6830_v20 = vpop.eup %6829  ;;  %v2629_v15 = vpop.f32.mrb[23].mxu1  ;;  %5955 = vst [vmem:[%s8904_s10 + $0x18] sm:$0xff] %v5891_v21   ;;  %6849 = vrcp.f32 %v4878_v51  ;;  %v8930_v57 = vadd.f32 %v6450_v47, %v8820_v52  ;;  %v6451_v8 = vadd.f32 %v6418_v45, %v6282_v46 }
 0x23f   : > { %v6832_v12 = vpop.eup %6831  ;;  %v4879_v31 = vadd.f32 1.0, %v6830_v20  ;;  %5954 = vst [vmem:[%s8904_s10 + $0x10] sm:$0xff] %v5886_v42   ;;  %6851 = vrcp.f32 %v4876_v33  ;;  %v5793_v62 = vmul.f32 -1.442695, %v8926_v27  ;;  %v6452_v56 = vadd.f32 %v4654_v60, %v2629_v15 }
 0x240   : > { %v4877_v48 = vadd.f32 1.0, %v6832_v12  ;;  %v6834_v40 = vpop.eup %6833  ;;  %v5791_v17 = vmul.f32 -1.442695, %v8930_v57  ;;  %v8936_v59 = vadd.f32 %v6451_v8, %v8820_v52  ;;  %v6421_v9 = vpop.f32.mrb[24].mxu0 }
 0x241   : > { %6853 = vrcp.f32 %v4879_v31  ;;  %v6836_v30 = vpop.eup %6835  ;;  %v8939_v6 = vadd.f32 %v6452_v56, %v8820_v52  ;;  %v4970_v4 = vmul.f32 %v6834_v40, %v8855_v13  ;;  %v6285_v23 = vpop.f32.mrb[24].mxu1 }
 0x242   : > { %6855 = vrcp.f32 %v4877_v48  ;;  %v6838_v14 = vpop.eup %6837  ;;  %v5794_v26 = vmul.f32 -1.442695, %v8936_v59  ;;  %v4667_v16 = vpop.f32.mrb[25].mxu0  ;;  %v6453_v32 = vadd.f32 %v6421_v9, %v6285_v23  ;;  %v4968_v10 = vmul.f32 %v6836_v30, %v8858_v63 }
 0x243   : > { %6857 = vpow2.f32 %v5793_v62  ;;  %v6840_v50 = vpop.eup %6839  ;;  %v4971_v11 = vmul.f32 %v6838_v14, %v8863_v58  ;;  %v5792_v24 = vmul.f32 -1.442695, %v8939_v6  ;;  %v2642_v19 = vpop.f32.mrb[25].mxu1 }
 0x244   : > { %6859 = vpow2.f32 %v5791_v17  ;;  %v6422_v39 = vpop.f32.mrb[26].mxu0  ;;  %v6842_v0 = vpop.eup %6841  ;;  %v4969_v38 = vmul.f32 %v6840_v50, %v8867_v54  ;;  %v6454_v13 = vadd.f32 %v4667_v16, %v2642_v19  ;;  %v8948_v58 = vadd.f32 %v6453_v32, %v8820_v52 }
 0x245   : > { %6861 = vpow2.f32 %v5794_v26  ;;  %v6286_v37 = vpop.f32.mrb[26].mxu1  ;;  %v4670_v34 = vpop.f32.mrb[27].mxu0  ;;  %v5901_v25 = vpack.c.bf16 %v4971_v11, %v4970_v4  ;;  %v4882_v41 = vadd.f32 1.0, %v6842_v0 }
 0x246   : > { %v6844_v49 = vpop.eup %6843  ;;  %6863 = vpow2.f32 %v5792_v24  ;;  %v2645_v5 = vpop.f32.mrb[27].mxu1  ;;  %v5896_v61 = vpack.c.bf16 %v4969_v38, %v4968_v10  ;;  %v8951_v63 = vadd.f32 %v6454_v13, %v8820_v52  ;;  %v6455_v54 = vadd.f32 %v6422_v39, %v6286_v37 }
 0x247   : > { %v6846_v7 = vpop.eup %6845  ;;  %v4880_v44 = vadd.f32 1.0, %v6844_v49  ;;  %5957 = vst [vmem:[%s8904_s10 + $0x28] sm:$0xff] %v5901_v25   ;;  %6865 = vrcp.f32 %v4882_v41  ;;  %v5797_v29 = vmul.f32 -1.442695, %v8948_v58  ;;  %v6456_v45 = vadd.f32 %v4670_v34, %v2645_v5 }
 0x248   : > { %v6848_v55 = vpop.eup %6847  ;;  %v4883_v28 = vadd.f32 1.0, %v6846_v7  ;;  %5956 = vst [vmem:[%s8904_s10 + $0x20] sm:$0xff] %v5896_v61   ;;  %v5795_v51 = vmul.f32 -1.442695, %v8951_v63  ;;  %v8958_v47 = vadd.f32 %v6455_v54, %v8820_v52  ;;  %v6425_v20 = vpop.f32.mrb[28].mxu0 }
 0x249   : > { %v6850_v53 = vpop.eup %6849  ;;  %6867 = vrcp.f32 %v4880_v44  ;;  %v4881_v21 = vadd.f32 1.0, %v6848_v55  ;;  %v8961_v60 = vadd.f32 %v6456_v45, %v8820_v52  ;;  %v6289_v12 = vpop.f32.mrb[28].mxu1 }
 0x24a   : > { %v6852_v46 = vpop.eup %6851  ;;  %6869 = vrcp.f32 %v4883_v28  ;;  %v4974_v33 = vmul.f32 %v6850_v53, %v8874_v35  ;;  %v5798_v15 = vmul.f32 -1.442695, %v8958_v47  ;;  %v4683_v31 = vpop.f32.mrb[29].mxu0  ;;  %v6457_v56 = vadd.f32 %v6425_v20, %v6289_v12 }
 0x24b   : > { %v6854_v42 = vpop.eup %6853  ;;  %6871 = vrcp.f32 %v4881_v21  ;;  %v5796_v62 = vmul.f32 -1.442695, %v8961_v60  ;;  %v2658_v40 = vpop.f32.mrb[29].mxu1  ;;  %v4972_v9 = vmul.f32 %v6852_v46, %v8879_v1 }
 0x24c   : > { %v6856_v8 = vpop.eup %6855  ;;  %v4975_v48 = vmul.f32 %v6854_v42, %v8884_v22  ;;  %6873 = vpow2.f32 %v5797_v29  ;;  %v6426_v17 = vpop.f32.mrb[30].mxu0  ;;  %v6458_v35 = vadd.f32 %v4683_v31, %v2658_v40  ;;  %v8970_v50 = vadd.f32 %v6457_v56, %v8820_v52 }
 0x24d   : > { %v6858_v30 = vpop.eup %6857  ;;  %v4973_v14 = vmul.f32 %v6856_v8, %v8888_v3  ;;  %6875 = vpow2.f32 %v5795_v51  ;;  %v6290_v4 = vpop.f32.mrb[30].mxu1 }
 0x24e   : > { %v4686_v26 = vpop.f32.mrb[31].mxu0  ;;  %v6860_v23 = vpop.eup %6859  ;;  %v5911_v16 = vpack.c.bf16 %v4975_v48, %v4974_v33  ;;  %v4886_v22 = vadd.f32 1.0, %v6858_v30  ;;  %6877 = vpow2.f32 %v5798_v15  ;;  %v8973_v1 = vadd.f32 %v6458_v35, %v8820_v52 }
 0x24f   : > { %v2661_v11 = vpop.f32.mrb[31].mxu1  ;;  %v6862_v24 = vpop.eup %6861  ;;  %v5906_v32 = vpack.c.bf16 %v4973_v14, %v4972_v9  ;;  %v4884_v19 = vadd.f32 1.0, %v6860_v23  ;;  %6879 = vpow2.f32 %v5796_v62  ;;  %v5801_v0 = vmul.f32 -1.442695, %v8970_v50 }
 0x250   : > { %v6864_v3 = vpop.eup %6863  ;;  %5959 = vst [vmem:[%s8904_s10 + $0x38] sm:$0xff] %v5911_v16   ;;  %6881 = vrcp.f32 %v4886_v22  ;;  %v4887_v39 = vadd.f32 1.0, %v6862_v24  ;;  %v6459_v10 = vadd.f32 %v6426_v17, %v6290_v4  ;;  %v5799_v13 = vmul.f32 -1.442695, %v8973_v1 }
 0x251   : > { %5958 = vst [vmem:[%s8904_s10 + $0x30] sm:$0xff] %v5906_v32   ;;  %6883 = vrcp.f32 %v4884_v19  ;;  %v4885_v38 = vadd.f32 1.0, %v6864_v3  ;;  %v6460_v37 = vadd.f32 %v4686_v26, %v2661_v11  ;;  %v6866_v34 = vpop.eup %6865 }
 0x252   : > { %6885 = vrcp.f32 %v4887_v39  ;;  %v8980_v49 = vadd.f32 %v6459_v10, %v8820_v52  ;;  %v4978_v44 = vmul.f32 %v6866_v34, %v8901_v43 }
 0x253   : > { %v6868_v25 = vpop.eup %6867  ;;  %6887 = vrcp.f32 %v4885_v38  ;;  %v8983_v41 = vadd.f32 %v6460_v37, %v8820_v52 }
 0x254   : > { %v6870_v5 = vpop.eup %6869  ;;  %6889 = vpow2.f32 %v5801_v0  ;;  %v5802_v7 = vmul.f32 -1.442695, %v8980_v49  ;;  %v4976_v29 = vmul.f32 %v6868_v25, %v8908_v18 }
 0x255   : > { %v6872_v61 = vpop.eup %6871  ;;  %v4979_v54 = vmul.f32 %v6870_v5, %v8913_v2  ;;  %6891 = vpow2.f32 %v5799_v13  ;;  %v5800_v55 = vmul.f32 -1.442695, %v8983_v41 }
 0x256   : > { %v6874_v28 = vpop.eup %6873  ;;  %v4977_v52 = vmul.f32 %v6872_v61, %v8917_v36  ;;  %6893 = vpow2.f32 %v5802_v7 }
 0x257   : > { %v6876_v45 = vpop.eup %6875  ;;  %v5921_v53 = vpack.c.bf16 %v4979_v54, %v4978_v44  ;;  %v4890_v21 = vadd.f32 1.0, %v6874_v28  ;;  %6895 = vpow2.f32 %v5800_v55 }
 0x258   : > { %v6878_v51 = vpop.eup %6877  ;;  %v5916_v46 = vpack.c.bf16 %v4977_v52, %v4976_v29  ;;  %v4888_v43 = vadd.f32 1.0, %v6876_v45 }
 0x259   : > { %v6880_v20 = vpop.eup %6879  ;;  %5961 = vst [vmem:[%s8904_s10 + $0x48] sm:$0xff] %v5921_v53   ;;  %6897 = vrcp.f32 %v4890_v21  ;;  %v4891_v2 = vadd.f32 1.0, %v6878_v51 }
 0x25a   : > { %v6882_v42 = vpop.eup %6881  ;;  %5960 = vst [vmem:[%s8904_s10 + $0x40] sm:$0xff] %v5916_v46   ;;  %6899 = vrcp.f32 %v4888_v43  ;;  %v4889_v33 = vadd.f32 1.0, %v6880_v20 }
 0x25b   : > { %v6884_v15 = vpop.eup %6883  ;;  %6901 = vrcp.f32 %v4891_v2  ;;  %v4982_v12 = vmul.f32 %v6882_v42, %v8926_v27 }
 0x25c   : > { %v6886_v18 = vpop.eup %6885  ;;  %6903 = vrcp.f32 %v4889_v33  ;;  %v4980_v48 = vmul.f32 %v6884_v15, %v8930_v57 }
 0x25d   : > { %v6888_v36 = vpop.eup %6887  ;;  %v4983_v31 = vmul.f32 %v6886_v18, %v8936_v59 }
 0x25e   : > { %v6890_v8 = vpop.eup %6889  ;;  %v4981_v62 = vmul.f32 %v6888_v36, %v8939_v6 }
 0x25f   : > { %v6892_v56 = vpop.eup %6891  ;;  %v5931_v40 = vpack.c.bf16 %v4983_v31, %v4982_v12  ;;  %v4894_v17 = vadd.f32 1.0, %v6890_v8 }
 0x260   : > { %v6894_v30 = vpop.eup %6893  ;;  %v5926_v9 = vpack.c.bf16 %v4981_v62, %v4980_v48  ;;  %v4892_v14 = vadd.f32 1.0, %v6892_v56 }
 0x261   : > { %v6896_v35 = vpop.eup %6895  ;;  %5963 = vst [vmem:[%s8904_s10 + $0x58] sm:$0xff] %v5931_v40   ;;  %6905 = vrcp.f32 %v4894_v17  ;;  %v4895_v4 = vadd.f32 1.0, %v6894_v30 }
 0x262   : > { %5962 = vst [vmem:[%s8904_s10 + $0x50] sm:$0xff] %v5926_v9   ;;  %6907 = vrcp.f32 %v4892_v14  ;;  %v4893_v27 = vadd.f32 1.0, %v6896_v35 }
 0x263   : > { %v6898_v59 = vpop.eup %6897  ;;  %6909 = vrcp.f32 %v4895_v4 }
 0x264   : > { %v6900_v57 = vpop.eup %6899  ;;  %6911 = vrcp.f32 %v4893_v27  ;;  %v4986_v23 = vmul.f32 %v6898_v59, %v8948_v58 }
 0x265   : > { %v6902_v6 = vpop.eup %6901  ;;  %v4984_v22 = vmul.f32 %v6900_v57, %v8951_v63 }
 0x266   : > { %v6904_v26 = vpop.eup %6903  ;;  %v4987_v16 = vmul.f32 %v6902_v6, %v8958_v47 }
 0x267   : > { %v4985_v11 = vmul.f32 %v6904_v26, %v8961_v60 }
 0x268   : > { %v5941_v24 = vpack.c.bf16 %v4987_v16, %v4986_v23 }
 0x269   : > { %v5936_v32 = vpack.c.bf16 %v4985_v11, %v4984_v22 }
 0x26a   : > { %5965 = vst [vmem:[%s8904_s10 + $0x68] sm:$0xff] %v5941_v24  }
 0x26b   : > { %v6906_v19 = vpop.eup %6905  ;;  %5964 = vst [vmem:[%s8904_s10 + $0x60] sm:$0xff] %v5936_v32  }
 0x26c   : > { %v6908_v3 = vpop.eup %6907  ;;  %v4990_v47 = vmul.f32 %v6906_v19, %v8970_v50 }
 0x26d   : > { %v6910_v39 = vpop.eup %6909  ;;  %v4988_v60 = vmul.f32 %v6908_v3, %v8973_v1 }
 0x26e   : > { %v6912_v58 = vpop.eup %6911  ;;  %v4991_v63 = vmul.f32 %v6910_v39, %v8980_v49 }
 0x26f   : > { %v4989_v0 = vmul.f32 %v6912_v58, %v8983_v41 }
 0x270   : > { %v5951_v10 = vpack.c.bf16 %v4991_v63, %v4990_v47 }
 0x271   : > { %v5946_v38 = vpack.c.bf16 %v4989_v0, %v4988_v60 }
 0x272   : > { %5967 = vst [vmem:[%s8904_s10 + $0x78] sm:$0xff] %v5951_v10  }
 0x273   : > { %5966 = vst [vmem:[%s8904_s10 + $0x70] sm:$0xff] %v5946_v38  }
 0x274   : > { %6983 = shalt.err (!%p6980_p3)
}
 0x275   : > { %s6984_s29 = scalar_lea.hbm %s9014_s24, 2048  ;;  %s6988_s5 = scalar_lea.hbm %s9066_s3, 4096 }
 0x276   : > { %p6985_p4 = scmp.ne.s32.totalorder %s9014_s24, %s6984_s29  ;;  %p6989_p9 = scmp.lt.u32.totalorder %s9014_s24, %s9066_s3 }
 0x277   : > { %p6990_p10 = scmp.lt.u32.totalorder %s6988_s5, %s6984_s29  ;;  %p6992_p12 = scmp.lt.u32.totalorder %s6984_s29, %s9014_s24 }
 0x278   : > { %p6986_p7 = pnand %p6985_p4, %p7095_p5 }
 0x279   : > { %p6991_p11 = por %p6990_p10, %p6989_p9 }
 0x27a   : > { %p6987_p8 = pneg %p6986_p7 }
 0x27b   : > { %p6993_p13 = por %p6992_p12, %p6991_p11 }
 0x27d   : > { %p6994_p0 = pnand %p6993_p13, %p6987_p8 }
 0x27f   : > { %6997 = shalt.err (!%p6994_p0)
}
 0x280   : > { %s7035_s8 = smov 64   ;;  %s7036_s9 = smov 4  }
 0x281   : > { %6696 = dma.vmem_to_hbm [thread:$0]  (%p7095_p5), %s9016_s17, 2048, %s9014_s24, %s9022_s16, %s7035_s8, %s7035_s8, %s7036_s9  }
 0x282 PF: > { %p6702_p1 = scmp.ge.s32.totalorder %s7032_s15, 2  ;;  %s5181_s10 = sand.u32 1, %s7020_s12  }
 0x283   : > { %s5182_s11 = scalar_lea.sflag [#allocation3], %s5181_s10 }
 0x284   : > { %p6699_p2 = pnand %p6702_p1, %p7099_p6 }
 0x286   : > { %7015 = dma.done.wait (!%p6699_p2), %s5182_s11, 2048  }
 0x287   : > { %7017 = vsyncadd (!%p6699_p2), %s5182_s11, 4294965248  ;;  %p13_p3 = scmp.ge.s32.totalorder %s7082_s18, 4   ;;  %s9136_s12 = smov %s7024_s13 }
 0x288   : > { %s9137_s13 = smov %s7028_s14  ;;  %s9138_s14 = smov %s7093_s21 }
 0x289   : > { %s9139_s15 = smov %s7082_s18  ;;  %15 = sbr.rel (!%p13_p3) target bundleno = 3 (0x3), region = 77 }
 0x290   :  { %5187 = vsyncpa [#allocation3], 1 }
 0x291   :  { %5189 = vsyncpa [#allocation3 + $0x1], 1 }

</bundles_post_ra>
